<compile_context>
chip_gen: v6e
topology: v6e:2x2x1
jax: 0.10.0
libtpu: 0.0.40
codegen_flags: <defaults>
</compile_context>

<pallas_src>
import functools

import jax
import jax.numpy as jnp
from jax import lax
from jax.experimental import pallas as pl
from jax.experimental.pallas import tpu as pltpu


# ----------------------------- Pallas kernels ------------------------------

def _conv3x3_silu_kernel(x_ref, w_ref, b_ref, o_ref, *, H, W):
    """conv1: 3x3, stride 1, pad 1 (pad already applied to the input slab) + SiLU.

    x_ref: (H+2, W+2, Cin)   padded NHWC slab for one image
    w_ref: (9, Cin, C1)      tap-major conv weights
    b_ref: (1, C1)
    o_ref: (H*W, C1)
    """
    x = x_ref[...]
    cin = x.shape[-1]
    c1 = w_ref.shape[-1]
    acc = jnp.zeros((H * W, c1), jnp.float32)
    # 9 taps -> 9 small MXU dots accumulated in f32 (no HBM im2col).
    for dy in range(3):
        for dx in range(3):
            tap = x[dy:dy + H, dx:dx + W, :].reshape(H * W, cin)
            acc = acc + jnp.dot(tap, w_ref[3 * dy + dx],
                                preferred_element_type=jnp.float32)
    acc = acc + b_ref[...]
    o_ref[...] = (acc * jax.nn.sigmoid(acc)).astype(o_ref.dtype)   # SiLU in f32


def _s2d_conv_silu_conv_ln_kernel(g_ref, w2_ref, b2_ref, w3_ref, b3_ref,
                                  gma_ref, bta_ref, o_ref, *, Ho, Wo, eps):
    """conv2 (3x3, stride 2, pad 1) on a space-to-depth'd h1, + SiLU,
    fused with conv3 (1x1) + bias and LayerNorm over channels.

    g_ref:  (Ho+1, Wo+1, 4*C1)   g[u,v,(py*2+px)*C1+c] = h1_padded[2u+py, 2v+px, c]
    w2_ref: (4, 4*C1, C2)        stride-2 conv as four unit-stride taps
    b2_ref: (1, C2)
    w3_ref: (C2, C1); b3_ref, gma_ref, bta_ref: (1, C1)
    o_ref:  (Ho*Wo, C1)
    """
    g = g_ref[...]
    k4 = g.shape[-1]
    c2 = w2_ref.shape[-1]
    acc = jnp.zeros((Ho * Wo, c2), jnp.float32)
    for a in range(2):
        for b in range(2):
            tap = g[a:a + Ho, b:b + Wo, :].reshape(Ho * Wo, k4)
            acc = acc + jnp.dot(tap, w2_ref[2 * a + b],
                                preferred_element_type=jnp.float32)
    h = acc + b2_ref[...]
    h = h * jax.nn.sigmoid(h)                          # SiLU in f32
    # conv3 (1x1): cast the live activation to the streaming dtype (bf16 path),
    # accumulate in f32.
    y = jnp.dot(h.astype(w3_ref.dtype), w3_ref[...],
                preferred_element_type=jnp.float32) + b3_ref[...]
    # LayerNorm over channel (last) dim, biased variance, eps inside rsqrt.
    mean = jnp.mean(y, axis=-1, keepdims=True)
    var = jnp.mean(jnp.square(y - mean), axis=-1, keepdims=True)
    yn = (y - mean) * lax.rsqrt(var + eps)
    o_ref[...] = (yn * gma_ref[...] + bta_ref[...]).astype(o_ref.dtype)


# ------------------------------ call wrappers -------------------------------

def _conv1_call(xp, w9, b1, *, H, W, out_dtype):
    B, Hp, Wp, Cin = xp.shape
    C1 = w9.shape[-1]
    cost = pl.CostEstimate(
        flops=2 * B * H * W * 9 * Cin * C1,
        transcendentals=B * H * W * C1,
        bytes_accessed=(xp.size * xp.dtype.itemsize + w9.size * w9.dtype.itemsize
                        + B * H * W * C1 * jnp.dtype(out_dtype).itemsize),
    )
    kern = functools.partial(_conv3x3_silu_kernel, H=H, W=W)
    return pl.pallas_call(
        kern,
        out_shape=jax.ShapeDtypeStruct((B, H * W, C1), out_dtype),
        grid=(B,),
        in_specs=[
            pl.BlockSpec((None, Hp, Wp, Cin), lambda i: (i, 0, 0, 0)),
            pl.BlockSpec((9, Cin, C1), lambda i: (0, 0, 0)),
            pl.BlockSpec((1, C1), lambda i: (0, 0)),
        ],
        out_specs=pl.BlockSpec((None, H * W, C1), lambda i: (i, 0, 0)),
        compiler_params=pltpu.CompilerParams(dimension_semantics=("parallel",)),
        cost_estimate=cost,
    )(xp, w9, b1)


def _stage2_call(g, w2s, b2, w3, b3, gamma, beta, *, Ho, Wo, eps, out_dtype):
    B = g.shape[0]
    K4 = g.shape[-1]
    C2 = w2s.shape[-1]
    C1 = w3.shape[-1]
    M = Ho * Wo
    cost = pl.CostEstimate(
        flops=2 * B * M * (K4 * C2 + C2 * C1),
        transcendentals=B * M * C2,
        bytes_accessed=(g.size * g.dtype.itemsize + w2s.size * w2s.dtype.itemsize
                        + w3.size * w3.dtype.itemsize
                        + B * M * C1 * jnp.dtype(out_dtype).itemsize),
    )
    kern = functools.partial(_s2d_conv_silu_conv_ln_kernel, Ho=Ho, Wo=Wo, eps=eps)
    return pl.pallas_call(
        kern,
        out_shape=jax.ShapeDtypeStruct((B, M, C1), out_dtype),
        grid=(B,),
        in_specs=[
            pl.BlockSpec((None, Ho + 1, Wo + 1, K4), lambda i: (i, 0, 0, 0)),
            pl.BlockSpec((4, K4, C2), lambda i: (0, 0, 0)),
            pl.BlockSpec((1, C2), lambda i: (0, 0)),
            pl.BlockSpec((C2, C1), lambda i: (0, 0)),
            pl.BlockSpec((1, C1), lambda i: (0, 0)),
            pl.BlockSpec((1, C1), lambda i: (0, 0)),
            pl.BlockSpec((1, C1), lambda i: (0, 0)),
        ],
        out_specs=pl.BlockSpec((None, M, C1), lambda i: (i, 0, 0)),
        compiler_params=pltpu.CompilerParams(dimension_semantics=("parallel",)),
        cost_estimate=cost,
    )(g, w2s, b2, w3, b3, gamma, beta)


# ------------------------ wrapper-side layout helpers -------------------------

def _space_to_depth_pad1(h1):
    """h1 (B,H,W,C) -> g (B, Ho+1, Wo+1, 4*C) with
    g[b,u,v,(py*2+px)*C+c] = h1pad[b, 2u+py, 2v+px, c],
    where h1pad is h1 with a 1-pixel zero border (plus bottom/right zero fill).
    This turns the stride-2 3x3 conv into four unit-stride taps inside the kernel."""
    b, h, w, c = h1.shape
    ho = (h - 1) // 2 + 1
    wo = (w - 1) // 2 + 1
    hp = 2 * (ho + 1)
    wp = 2 * (wo + 1)
    h1p = jnp.pad(h1, ((0, 0), (1, hp - 1 - h), (1, wp - 1 - w), (0, 0)))
    g = h1p.reshape(b, ho + 1, 2, wo + 1, 2, c)
    g = g.transpose(0, 1, 3, 2, 4, 5).reshape(b, ho + 1, wo + 1, 4 * c)
    return g, ho, wo


def _space_to_depth_weights(w2_hwio):
    """(3,3,C1,C2) HWIO -> (4, 4*C1, C2): tap index = 2*a + b for the stride-1
    2x2 conv over the space-to-depth grid; K index = (py*2+px)*C1 + c."""
    _, _, c1, c2 = w2_hwio.shape
    zeros = jnp.zeros((c1, c2), w2_hwio.dtype)
    taps = []
    for a in range(2):
        for b in range(2):
            blocks = []
            for py in range(2):
                for px in range(2):
                    dy, dx = 2 * a + py, 2 * b + px
                    blocks.append(w2_hwio[dy, dx] if (dy < 3 and dx < 3) else zeros)
            taps.append(jnp.concatenate(blocks, axis=0))      # (4*C1, C2)
    return jnp.stack(taps, axis=0)                            # (4, 4*C1, C2)


# ------------------------------ parameters -----------------------------------

def _xavier_conv(key, kh, kw, cin, cout):
    fan_in = cin * kh * kw
    fan_out = cout * kh * kw
    a = (6.0 / (fan_in + fan_out)) ** 0.5
    return jax.random.uniform(key, (kh, kw, cin, cout), jnp.float32, -a, a)  # HWIO


def init_params(key, in_channels, out_channels):
    k1, k2, k3 = jax.random.split(key, 3)
    c1 = out_channels
    return dict(
        w1=_xavier_conv(k1, 3, 3, in_channels, c1),
        b1=jnp.zeros((c1,), jnp.float32),
        w2=_xavier_conv(k2, 3, 3, c1, 2 * c1),
        b2=jnp.zeros((2 * c1,), jnp.float32),
        w3=_xavier_conv(k3, 1, 1, 2 * c1, c1),
        b3=jnp.zeros((c1,), jnp.float32),
        ln_gamma=jnp.ones((c1,), jnp.float32),
        ln_beta=jnp.zeros((c1,), jnp.float32),
    )


# ------------------------------ forward pass ----------------------------------

def control_encoder_latent(params, x_nchw, *, compute_dtype=jnp.float32):
    """x_nchw: (B, Cin, H, W) -> (B, Cout, ceil(H/2), ceil(W/2))  (NCHW).

    compute_dtype=jnp.bfloat16 streams activations/weights to the MXU in bf16
    (f32 accumulation + f32 SiLU/LayerNorm); default f32 matches the reference
    to ~1e-6.
    """
    b, cin, h, w = x_nchw.shape
    c1 = params["w1"].shape[-1]
    x = jnp.transpose(x_nchw, (0, 2, 3, 1)).astype(jnp.float32)  # NHWC

    # conv1 (3x3, pad 1) + SiLU — taps formed in-kernel from a halo'd slab.
    xp = jnp.pad(x, ((0, 0), (1, 1), (1, 1), (0, 0))).astype(compute_dtype)
    w1 = params["w1"].reshape(9, cin, c1).astype(compute_dtype)
    h1 = _conv1_call(xp, w1, params["b1"].reshape(1, c1),
                     H=h, W=w, out_dtype=compute_dtype)
    h1 = h1.reshape(b, h, w, c1)

    # conv2 (3x3, s=2, pad 1) + SiLU + conv3 (1x1) + LayerNorm2d (eps 1e-6), fused.
    g, ho, wo = _space_to_depth_pad1(h1)
    g = g.astype(compute_dtype)
    w2s = _space_to_depth_weights(params["w2"]).astype(compute_dtype)
    w3 = params["w3"].reshape(2 * c1, c1).astype(compute_dtype)
    y = _stage2_call(
        g, w2s,
        params["b2"].reshape(1, 2 * c1),
        w3,
        params["b3"].reshape(1, c1),
        params["ln_gamma"].reshape(1, c1),
        params["ln_beta"].reshape(1, c1),
        Ho=ho, Wo=wo, eps=1e-6, out_dtype=jnp.float32)
    y = y.reshape(b, ho, wo, c1)
    return jnp.transpose(y, (0, 3, 1, 2))  # back to NCHW


# ------------------------------ pure-JAX reference -----------------------------

def _conv_ref(x_nhwc, w_hwio, b, stride, pad):
    y = lax.conv_general_dilated(
        x_nhwc, w_hwio, window_strides=(stride, stride),
        padding=((pad, pad), (pad, pad)),
        dimension_numbers=("NHWC", "HWIO", "NHWC"),
        precision=lax.Precision.HIGHEST)
    return y + b


def reference(params, x_nchw):
    x = jnp.transpose(x_nchw, (0, 2, 3, 1)).astype(jnp.float32)
    h = _conv_ref(x, params["w1"], params["b1"], 1, 1)
    h = h * jax.nn.sigmoid(h)
    h = _conv_ref(h, params["w2"], params["b2"], 2, 1)
    h = h * jax.nn.sigmoid(h)
    y = _conv_ref(h, params["w3"], params["b3"], 1, 0)
    mean = jnp.mean(y, -1, keepdims=True)
    var = jnp.mean((y - mean) ** 2, -1, keepdims=True)
    y = (y - mean) / jnp.sqrt(var + 1e-6) * params["ln_gamma"] + params["ln_beta"]
    return jnp.transpose(y, (0, 3, 1, 2))


# ------------------------------------ main -------------------------------------

if __name__ == "__main__":
    key = jax.random.PRNGKey(0)
    kx, kp = jax.random.split(key)

    B, Cin, H, W = 2, 4, 16, 16
    Cout = 8  # out_channels

    x = jax.random.normal(kx, (B, Cin, H, W), jnp.float32)
    params = init_params(kp, Cin, Cout)

    out = jax.jit(control_encoder_latent)(params, x)
    out = jax.block_until_ready(out)

    assert out.shape == (B, Cout, H // 2, W // 2), out.shape
    ref = reference(params, x)
    err = float(jnp.max(jnp.abs(out - ref)))
    if err < 1e-2:
        print("KERNEL_OK")
    else:
        print(f"MISMATCH max_abs_err={err}")
</pallas_src>

<mosaic_0001>
module attributes {stable_mosaic.version = 11 : i64} {
  func.func @_conv3x3_silu_kernel(%arg0: i32, %arg1: memref<1x18x18x4xf32, #tpu.memory_space<vmem>>, %arg2: memref<9x4x8xf32, #tpu.memory_space<vmem>>, %arg3: memref<1x8xf32, #tpu.memory_space<vmem>>, %arg4: memref<1x256x8xf32, #tpu.memory_space<vmem>>) attributes {dimension_semantics = [#tpu.dimension_semantics<parallel>], iteration_bounds = array<i64: 2>, scalar_prefetch = 0 : i64, scratch_operands = 0 : i64, tpu.core_type = #tpu.core_type<tc>, window_params = [{transform_indices = @transform_0, window_bounds = array<i64: 1, 18, 18, 4>}, {pipeline_mode = #tpu.pipeline_mode<synchronous>, transform_indices = @transform_1, window_bounds = array<i64: 9, 4, 8>}, {pipeline_mode = #tpu.pipeline_mode<synchronous>, transform_indices = @transform_2, window_bounds = array<i64: 1, 8>}, {transform_indices = @transform_3, window_bounds = array<i64: 1, 256, 8>}]} {
    %c0 = arith.constant 0 : index
    %c0_0 = arith.constant 0 : index
    %c0_1 = arith.constant 0 : index
    %c0_2 = arith.constant 0 : index
    %0 = vector.load %arg1[%c0, %c0_0, %c0_1, %c0_2] : memref<1x18x18x4xf32, #tpu.memory_space<vmem>>, vector<1x18x18x4xf32>
    %1 = vector.shape_cast %0 : vector<1x18x18x4xf32> to vector<18x18x4xf32>
    %cst = arith.constant 0.000000e+00 : f32
    %2 = vector.broadcast %cst : f32 to vector<256x8xf32>
    %3 = vector.extract_strided_slice %1 {offsets = [0, 0, 0], sizes = [16, 16, 4], strides = [1, 1, 1]} : vector<18x18x4xf32> to vector<16x16x4xf32>
    %4 = vector.shape_cast %3 : vector<16x16x4xf32> to vector<256x4xf32>
    %c0_3 = arith.constant 0 : index
    %c0_4 = arith.constant 0 : index
    %c0_5 = arith.constant 0 : index
    %5 = vector.load %arg2[%c0_3, %c0_4, %c0_5] : memref<9x4x8xf32, #tpu.memory_space<vmem>>, vector<1x4x8xf32>
    %6 = vector.shape_cast %5 : vector<1x4x8xf32> to vector<4x8xf32>
    %cst_6 = arith.constant dense<0.000000e+00> : vector<256x8xf32>
    %7 = tpu.matmul %4, %6, %cst_6 {dimension_numbers = #tpu.dot_dimension_numbers<[1], [0], [0], [1], [0, 0, 1, 1], [], []>} : vector<256x4xf32>, vector<4x8xf32>, vector<256x8xf32> -> vector<256x8xf32>
    %8 = arith.addf %2, %7 : vector<256x8xf32>
    %9 = vector.extract_strided_slice %1 {offsets = [0, 1, 0], sizes = [16, 16, 4], strides = [1, 1, 1]} : vector<18x18x4xf32> to vector<16x16x4xf32>
    %10 = vector.shape_cast %9 : vector<16x16x4xf32> to vector<256x4xf32>
    %c1 = arith.constant 1 : index
    %c0_7 = arith.constant 0 : index
    %c0_8 = arith.constant 0 : index
    %11 = vector.load %arg2[%c1, %c0_7, %c0_8] : memref<9x4x8xf32, #tpu.memory_space<vmem>>, vector<1x4x8xf32>
    %12 = vector.shape_cast %11 : vector<1x4x8xf32> to vector<4x8xf32>
    %cst_9 = arith.constant dense<0.000000e+00> : vector<256x8xf32>
    %13 = tpu.matmul %10, %12, %cst_9 {dimension_numbers = #tpu.dot_dimension_numbers<[1], [0], [0], [1], [0, 0, 1, 1], [], []>} : vector<256x4xf32>, vector<4x8xf32>, vector<256x8xf32> -> vector<256x8xf32>
    %14 = arith.addf %8, %13 : vector<256x8xf32>
    %15 = vector.extract_strided_slice %1 {offsets = [0, 2, 0], sizes = [16, 16, 4], strides = [1, 1, 1]} : vector<18x18x4xf32> to vector<16x16x4xf32>
    %16 = vector.shape_cast %15 : vector<16x16x4xf32> to vector<256x4xf32>
    %c2 = arith.constant 2 : index
    %c0_10 = arith.constant 0 : index
    %c0_11 = arith.constant 0 : index
    %17 = vector.load %arg2[%c2, %c0_10, %c0_11] : memref<9x4x8xf32, #tpu.memory_space<vmem>>, vector<1x4x8xf32>
    %18 = vector.shape_cast %17 : vector<1x4x8xf32> to vector<4x8xf32>
    %cst_12 = arith.constant dense<0.000000e+00> : vector<256x8xf32>
    %19 = tpu.matmul %16, %18, %cst_12 {dimension_numbers = #tpu.dot_dimension_numbers<[1], [0], [0], [1], [0, 0, 1, 1], [], []>} : vector<256x4xf32>, vector<4x8xf32>, vector<256x8xf32> -> vector<256x8xf32>
    %20 = arith.addf %14, %19 : vector<256x8xf32>
    %21 = vector.extract_strided_slice %1 {offsets = [1, 0, 0], sizes = [16, 16, 4], strides = [1, 1, 1]} : vector<18x18x4xf32> to vector<16x16x4xf32>
    %22 = vector.shape_cast %21 : vector<16x16x4xf32> to vector<256x4xf32>
    %c3 = arith.constant 3 : index
    %c0_13 = arith.constant 0 : index
    %c0_14 = arith.constant 0 : index
    %23 = vector.load %arg2[%c3, %c0_13, %c0_14] : memref<9x4x8xf32, #tpu.memory_space<vmem>>, vector<1x4x8xf32>
    %24 = vector.shape_cast %23 : vector<1x4x8xf32> to vector<4x8xf32>
    %cst_15 = arith.constant dense<0.000000e+00> : vector<256x8xf32>
    %25 = tpu.matmul %22, %24, %cst_15 {dimension_numbers = #tpu.dot_dimension_numbers<[1], [0], [0], [1], [0, 0, 1, 1], [], []>} : vector<256x4xf32>, vector<4x8xf32>, vector<256x8xf32> -> vector<256x8xf32>
    %26 = arith.addf %20, %25 : vector<256x8xf32>
    %27 = vector.extract_strided_slice %1 {offsets = [1, 1, 0], sizes = [16, 16, 4], strides = [1, 1, 1]} : vector<18x18x4xf32> to vector<16x16x4xf32>
    %28 = vector.shape_cast %27 : vector<16x16x4xf32> to vector<256x4xf32>
    %c4 = arith.constant 4 : index
    %c0_16 = arith.constant 0 : index
    %c0_17 = arith.constant 0 : index
    %29 = vector.load %arg2[%c4, %c0_16, %c0_17] : memref<9x4x8xf32, #tpu.memory_space<vmem>>, vector<1x4x8xf32>
    %30 = vector.shape_cast %29 : vector<1x4x8xf32> to vector<4x8xf32>
    %cst_18 = arith.constant dense<0.000000e+00> : vector<256x8xf32>
    %31 = tpu.matmul %28, %30, %cst_18 {dimension_numbers = #tpu.dot_dimension_numbers<[1], [0], [0], [1], [0, 0, 1, 1], [], []>} : vector<256x4xf32>, vector<4x8xf32>, vector<256x8xf32> -> vector<256x8xf32>
    %32 = arith.addf %26, %31 : vector<256x8xf32>
    %33 = vector.extract_strided_slice %1 {offsets = [1, 2, 0], sizes = [16, 16, 4], strides = [1, 1, 1]} : vector<18x18x4xf32> to vector<16x16x4xf32>
    %34 = vector.shape_cast %33 : vector<16x16x4xf32> to vector<256x4xf32>
    %c5 = arith.constant 5 : index
    %c0_19 = arith.constant 0 : index
    %c0_20 = arith.constant 0 : index
    %35 = vector.load %arg2[%c5, %c0_19, %c0_20] : memref<9x4x8xf32, #tpu.memory_space<vmem>>, vector<1x4x8xf32>
    %36 = vector.shape_cast %35 : vector<1x4x8xf32> to vector<4x8xf32>
    %cst_21 = arith.constant dense<0.000000e+00> : vector<256x8xf32>
    %37 = tpu.matmul %34, %36, %cst_21 {dimension_numbers = #tpu.dot_dimension_numbers<[1], [0], [0], [1], [0, 0, 1, 1], [], []>} : vector<256x4xf32>, vector<4x8xf32>, vector<256x8xf32> -> vector<256x8xf32>
    %38 = arith.addf %32, %37 : vector<256x8xf32>
    %39 = vector.extract_strided_slice %1 {offsets = [2, 0, 0], sizes = [16, 16, 4], strides = [1, 1, 1]} : vector<18x18x4xf32> to vector<16x16x4xf32>
    %40 = vector.shape_cast %39 : vector<16x16x4xf32> to vector<256x4xf32>
    %c6 = arith.constant 6 : index
    %c0_22 = arith.constant 0 : index
    %c0_23 = arith.constant 0 : index
    %41 = vector.load %arg2[%c6, %c0_22, %c0_23] : memref<9x4x8xf32, #tpu.memory_space<vmem>>, vector<1x4x8xf32>
    %42 = vector.shape_cast %41 : vector<1x4x8xf32> to vector<4x8xf32>
    %cst_24 = arith.constant dense<0.000000e+00> : vector<256x8xf32>
    %43 = tpu.matmul %40, %42, %cst_24 {dimension_numbers = #tpu.dot_dimension_numbers<[1], [0], [0], [1], [0, 0, 1, 1], [], []>} : vector<256x4xf32>, vector<4x8xf32>, vector<256x8xf32> -> vector<256x8xf32>
    %44 = arith.addf %38, %43 : vector<256x8xf32>
    %45 = vector.extract_strided_slice %1 {offsets = [2, 1, 0], sizes = [16, 16, 4], strides = [1, 1, 1]} : vector<18x18x4xf32> to vector<16x16x4xf32>
    %46 = vector.shape_cast %45 : vector<16x16x4xf32> to vector<256x4xf32>
    %c7 = arith.constant 7 : index
    %c0_25 = arith.constant 0 : index
    %c0_26 = arith.constant 0 : index
    %47 = vector.load %arg2[%c7, %c0_25, %c0_26] : memref<9x4x8xf32, #tpu.memory_space<vmem>>, vector<1x4x8xf32>
    %48 = vector.shape_cast %47 : vector<1x4x8xf32> to vector<4x8xf32>
    %cst_27 = arith.constant dense<0.000000e+00> : vector<256x8xf32>
    %49 = tpu.matmul %46, %48, %cst_27 {dimension_numbers = #tpu.dot_dimension_numbers<[1], [0], [0], [1], [0, 0, 1, 1], [], []>} : vector<256x4xf32>, vector<4x8xf32>, vector<256x8xf32> -> vector<256x8xf32>
    %50 = arith.addf %44, %49 : vector<256x8xf32>
    %51 = vector.extract_strided_slice %1 {offsets = [2, 2, 0], sizes = [16, 16, 4], strides = [1, 1, 1]} : vector<18x18x4xf32> to vector<16x16x4xf32>
    %52 = vector.shape_cast %51 : vector<16x16x4xf32> to vector<256x4xf32>
    %c8 = arith.constant 8 : index
    %c0_28 = arith.constant 0 : index
    %c0_29 = arith.constant 0 : index
    %53 = vector.load %arg2[%c8, %c0_28, %c0_29] : memref<9x4x8xf32, #tpu.memory_space<vmem>>, vector<1x4x8xf32>
    %54 = vector.shape_cast %53 : vector<1x4x8xf32> to vector<4x8xf32>
    %cst_30 = arith.constant dense<0.000000e+00> : vector<256x8xf32>
    %55 = tpu.matmul %52, %54, %cst_30 {dimension_numbers = #tpu.dot_dimension_numbers<[1], [0], [0], [1], [0, 0, 1, 1], [], []>} : vector<256x4xf32>, vector<4x8xf32>, vector<256x8xf32> -> vector<256x8xf32>
    %56 = arith.addf %50, %55 : vector<256x8xf32>
    %c0_31 = arith.constant 0 : index
    %c0_32 = arith.constant 0 : index
    %57 = vector.load %arg3[%c0_31, %c0_32] : memref<1x8xf32, #tpu.memory_space<vmem>>, vector<1x8xf32>
    %58 = vector.broadcast %57 : vector<1x8xf32> to vector<256x8xf32>
    %59 = arith.addf %56, %58 : vector<256x8xf32>
    %60 = arith.negf %59 : vector<256x8xf32>
    %61 = math.exp %60 : vector<256x8xf32>
    %cst_33 = arith.constant 1.000000e+00 : f32
    %62 = vector.broadcast %cst_33 : f32 to vector<256x8xf32>
    %63 = arith.addf %62, %61 : vector<256x8xf32>
    %64 = arith.divf %62, %63 : vector<256x8xf32>
    %65 = arith.mulf %59, %64 : vector<256x8xf32>
    %c0_34 = arith.constant 0 : index
    %c0_35 = arith.constant 0 : index
    %c0_36 = arith.constant 0 : index
    %66 = vector.load %arg4[%c0_34, %c0_35, %c0_36] : memref<1x256x8xf32, #tpu.memory_space<vmem>>, vector<1x256x8xf32>
    %67 = vector.shape_cast %66 : vector<1x256x8xf32> to vector<256x8xf32>
    %68 = vector.shape_cast %65 : vector<256x8xf32> to vector<1x256x8xf32>
    tpu.vector_store %arg4[%c0_34, %c0_35, %c0_36], %68 {strides = array<i32>} : memref<1x256x8xf32, #tpu.memory_space<vmem>>, vector<1x256x8xf32>,
    return
  }
  func.func @transform_0(%arg0: i32) -> (i32, i32, i32, i32) {
    %c0_i32 = arith.constant 0 : i32
    %c0_i32_0 = arith.constant 0 : i32
    %c0_i32_1 = arith.constant 0 : i32
    %c0_i32_2 = arith.constant 0 : i32
    return %arg0, %c0_i32, %c0_i32_0, %c0_i32_1 : i32, i32, i32, i32
  }
  func.func @transform_1(%arg0: i32) -> (i32, i32, i32) {
    %c0_i32 = arith.constant 0 : i32
    %c0_i32_0 = arith.constant 0 : i32
    %c0_i32_1 = arith.constant 0 : i32
    %c0_i32_2 = arith.constant 0 : i32
    return %c0_i32, %c0_i32_0, %c0_i32_1 : i32, i32, i32
  }
  func.func @transform_2(%arg0: i32) -> (i32, i32) {
    %c0_i32 = arith.constant 0 : i32
    %c0_i32_0 = arith.constant 0 : i32
    %c0_i32_1 = arith.constant 0 : i32
    return %c0_i32, %c0_i32_0 : i32, i32
  }
  func.func @transform_3(%arg0: i32) -> (i32, i32, i32) {
    %c0_i32 = arith.constant 0 : i32
    %c0_i32_0 = arith.constant 0 : i32
    %c0_i32_1 = arith.constant 0 : i32
    return %arg0, %c0_i32, %c0_i32_0 : i32, i32, i32
  }
}

module attributes {stable_mosaic.version = 11 : i64} {
  func.func @_s2d_conv_silu_conv_ln_kernel(%arg0: i32, %arg1: memref<1x9x9x32xf32, #tpu.memory_space<vmem>>, %arg2: memref<4x32x16xf32, #tpu.memory_space<vmem>>, %arg3: memref<1x16xf32, #tpu.memory_space<vmem>>, %arg4: memref<16x8xf32, #tpu.memory_space<vmem>>, %arg5: memref<1x8xf32, #tpu.memory_space<vmem>>, %arg6: memref<1x8xf32, #tpu.memory_space<vmem>>, %arg7: memref<1x8xf32, #tpu.memory_space<vmem>>, %arg8: memref<1x64x8xf32, #tpu.memory_space<vmem>>) attributes {dimension_semantics = [#tpu.dimension_semantics<parallel>], iteration_bounds = array<i64: 2>, scalar_prefetch = 0 : i64, scratch_operands = 0 : i64, tpu.core_type = #tpu.core_type<tc>, window_params = [{transform_indices = @transform_0, window_bounds = array<i64: 1, 9, 9, 32>}, {pipeline_mode = #tpu.pipeline_mode<synchronous>, transform_indices = @transform_1, window_bounds = array<i64: 4, 32, 16>}, {pipeline_mode = #tpu.pipeline_mode<synchronous>, transform_indices = @transform_2, window_bounds = array<i64: 1, 16>}, {pipeline_mode = #tpu.pipeline_mode<synchronous>, transform_indices = @transform_3, window_bounds = array<i64: 16, 8>}, {pipeline_mode = #tpu.pipeline_mode<synchronous>, transform_indices = @transform_4, window_bounds = array<i64: 1, 8>}, {pipeline_mode = #tpu.pipeline_mode<synchronous>, transform_indices = @transform_5, window_bounds = array<i64: 1, 8>}, {pipeline_mode = #tpu.pipeline_mode<synchronous>, transform_indices = @transform_6, window_bounds = array<i64: 1, 8>}, {transform_indices = @transform_7, window_bounds = array<i64: 1, 64, 8>}]} {
    %c0 = arith.constant 0 : index
    %c0_0 = arith.constant 0 : index
    %c0_1 = arith.constant 0 : index
    %c0_2 = arith.constant 0 : index
    %0 = vector.load %arg1[%c0, %c0_0, %c0_1, %c0_2] : memref<1x9x9x32xf32, #tpu.memory_space<vmem>>, vector<1x9x9x32xf32>
    %1 = vector.shape_cast %0 : vector<1x9x9x32xf32> to vector<9x9x32xf32>
    %cst = arith.constant 0.000000e+00 : f32
    %2 = vector.broadcast %cst : f32 to vector<64x16xf32>
    %3 = vector.extract_strided_slice %1 {offsets = [0, 0, 0], sizes = [8, 8, 32], strides = [1, 1, 1]} : vector<9x9x32xf32> to vector<8x8x32xf32>
    %4 = vector.shape_cast %3 : vector<8x8x32xf32> to vector<64x32xf32>
    %c0_3 = arith.constant 0 : index
    %c0_4 = arith.constant 0 : index
    %c0_5 = arith.constant 0 : index
    %5 = vector.load %arg2[%c0_3, %c0_4, %c0_5] : memref<4x32x16xf32, #tpu.memory_space<vmem>>, vector<1x32x16xf32>
    %6 = vector.shape_cast %5 : vector<1x32x16xf32> to vector<32x16xf32>
    %cst_6 = arith.constant dense<0.000000e+00> : vector<64x16xf32>
    %7 = tpu.matmul %4, %6, %cst_6 {dimension_numbers = #tpu.dot_dimension_numbers<[1], [0], [0], [1], [0, 0, 1, 1], [], []>} : vector<64x32xf32>, vector<32x16xf32>, vector<64x16xf32> -> vector<64x16xf32>
    %8 = arith.addf %2, %7 : vector<64x16xf32>
    %9 = vector.extract_strided_slice %1 {offsets = [0, 1, 0], sizes = [8, 8, 32], strides = [1, 1, 1]} : vector<9x9x32xf32> to vector<8x8x32xf32>
    %10 = vector.shape_cast %9 : vector<8x8x32xf32> to vector<64x32xf32>
    %c1 = arith.constant 1 : index
    %c0_7 = arith.constant 0 : index
    %c0_8 = arith.constant 0 : index
    %11 = vector.load %arg2[%c1, %c0_7, %c0_8] : memref<4x32x16xf32, #tpu.memory_space<vmem>>, vector<1x32x16xf32>
    %12 = vector.shape_cast %11 : vector<1x32x16xf32> to vector<32x16xf32>
    %cst_9 = arith.constant dense<0.000000e+00> : vector<64x16xf32>
    %13 = tpu.matmul %10, %12, %cst_9 {dimension_numbers = #tpu.dot_dimension_numbers<[1], [0], [0], [1], [0, 0, 1, 1], [], []>} : vector<64x32xf32>, vector<32x16xf32>, vector<64x16xf32> -> vector<64x16xf32>
    %14 = arith.addf %8, %13 : vector<64x16xf32>
    %15 = vector.extract_strided_slice %1 {offsets = [1, 0, 0], sizes = [8, 8, 32], strides = [1, 1, 1]} : vector<9x9x32xf32> to vector<8x8x32xf32>
    %16 = vector.shape_cast %15 : vector<8x8x32xf32> to vector<64x32xf32>
    %c2 = arith.constant 2 : index
    %c0_10 = arith.constant 0 : index
    %c0_11 = arith.constant 0 : index
    %17 = vector.load %arg2[%c2, %c0_10, %c0_11] : memref<4x32x16xf32, #tpu.memory_space<vmem>>, vector<1x32x16xf32>
    %18 = vector.shape_cast %17 : vector<1x32x16xf32> to vector<32x16xf32>
    %cst_12 = arith.constant dense<0.000000e+00> : vector<64x16xf32>
    %19 = tpu.matmul %16, %18, %cst_12 {dimension_numbers = #tpu.dot_dimension_numbers<[1], [0], [0], [1], [0, 0, 1, 1], [], []>} : vector<64x32xf32>, vector<32x16xf32>, vector<64x16xf32> -> vector<64x16xf32>
    %20 = arith.addf %14, %19 : vector<64x16xf32>
    %21 = vector.extract_strided_slice %1 {offsets = [1, 1, 0], sizes = [8, 8, 32], strides = [1, 1, 1]} : vector<9x9x32xf32> to vector<8x8x32xf32>
    %22 = vector.shape_cast %21 : vector<8x8x32xf32> to vector<64x32xf32>
    %c3 = arith.constant 3 : index
    %c0_13 = arith.constant 0 : index
    %c0_14 = arith.constant 0 : index
    %23 = vector.load %arg2[%c3, %c0_13, %c0_14] : memref<4x32x16xf32, #tpu.memory_space<vmem>>, vector<1x32x16xf32>
    %24 = vector.shape_cast %23 : vector<1x32x16xf32> to vector<32x16xf32>
    %cst_15 = arith.constant dense<0.000000e+00> : vector<64x16xf32>
    %25 = tpu.matmul %22, %24, %cst_15 {dimension_numbers = #tpu.dot_dimension_numbers<[1], [0], [0], [1], [0, 0, 1, 1], [], []>} : vector<64x32xf32>, vector<32x16xf32>, vector<64x16xf32> -> vector<64x16xf32>
    %26 = arith.addf %20, %25 : vector<64x16xf32>
    %c0_16 = arith.constant 0 : index
    %c0_17 = arith.constant 0 : index
    %27 = vector.load %arg3[%c0_16, %c0_17] : memref<1x16xf32, #tpu.memory_space<vmem>>, vector<1x16xf32>
    %28 = vector.broadcast %27 : vector<1x16xf32> to vector<64x16xf32>
    %29 = arith.addf %26, %28 : vector<64x16xf32>
    %30 = arith.negf %29 : vector<64x16xf32>
    %31 = math.exp %30 : vector<64x16xf32>
    %cst_18 = arith.constant 1.000000e+00 : f32
    %32 = vector.broadcast %cst_18 : f32 to vector<64x16xf32>
    %33 = arith.addf %32, %31 : vector<64x16xf32>
    %34 = arith.divf %32, %33 : vector<64x16xf32>
    %35 = arith.mulf %29, %34 : vector<64x16xf32>
    %c0_19 = arith.constant 0 : index
    %c0_20 = arith.constant 0 : index
    %36 = vector.load %arg4[%c0_19, %c0_20] : memref<16x8xf32, #tpu.memory_space<vmem>>, vector<16x8xf32>
    %cst_21 = arith.constant dense<0.000000e+00> : vector<64x8xf32>
    %37 = tpu.matmul %35, %36, %cst_21 {dimension_numbers = #tpu.dot_dimension_numbers<[1], [0], [0], [1], [0, 0, 1, 1], [], []>} : vector<64x16xf32>, vector<16x8xf32>, vector<64x8xf32> -> vector<64x8xf32>
    %c0_22 = arith.constant 0 : index
    %c0_23 = arith.constant 0 : index
    %38 = vector.load %arg5[%c0_22, %c0_23] : memref<1x8xf32, #tpu.memory_space<vmem>>, vector<1x8xf32>
    %39 = vector.broadcast %38 : vector<1x8xf32> to vector<64x8xf32>
    %40 = arith.addf %37, %39 : vector<64x8xf32>
    %cst_24 = arith.constant dense<0.000000e+00> : vector<64xf32>
    %41 = vector.multi_reduction <add>, %40, %cst_24 [1] : vector<64x8xf32> to vector<64xf32>
    %42 = vector.shape_cast %41 : vector<64xf32> to vector<64x1xf32>
    %cst_25 = arith.constant 8.000000e+00 : f32
    %43 = vector.broadcast %cst_25 : f32 to vector<64x1xf32>
    %44 = arith.divf %42, %43 : vector<64x1xf32>
    %45 = vector.broadcast %44 : vector<64x1xf32> to vector<64x8xf32>
    %46 = arith.subf %40, %45 : vector<64x8xf32>
    %47 = arith.mulf %46, %46 : vector<64x8xf32>
    %cst_26 = arith.constant dense<0.000000e+00> : vector<64xf32>
    %48 = vector.multi_reduction <add>, %47, %cst_26 [1] : vector<64x8xf32> to vector<64xf32>
    %49 = vector.shape_cast %48 : vector<64xf32> to vector<64x1xf32>
    %cst_27 = arith.constant 8.000000e+00 : f32
    %50 = vector.broadcast %cst_27 : f32 to vector<64x1xf32>
    %51 = arith.divf %49, %50 : vector<64x1xf32>
    %52 = vector.broadcast %44 : vector<64x1xf32> to vector<64x8xf32>
    %53 = arith.subf %40, %52 : vector<64x8xf32>
    %cst_28 = arith.constant 9.99999997E-7 : f32
    %54 = vector.broadcast %cst_28 : f32 to vector<64x1xf32>
    %55 = arith.addf %51, %54 : vector<64x1xf32>
    %56 = math.rsqrt %55 : vector<64x1xf32>
    %57 = vector.broadcast %56 : vector<64x1xf32> to vector<64x8xf32>
    %58 = arith.mulf %53, %57 : vector<64x8xf32>
    %c0_29 = arith.constant 0 : index
    %c0_30 = arith.constant 0 : index
    %59 = vector.load %arg6[%c0_29, %c0_30] : memref<1x8xf32, #tpu.memory_space<vmem>>, vector<1x8xf32>
    %60 = vector.broadcast %59 : vector<1x8xf32> to vector<64x8xf32>
    %61 = arith.mulf %58, %60 : vector<64x8xf32>
    %c0_31 = arith.constant 0 : index
    %c0_32 = arith.constant 0 : index
    %62 = vector.load %arg7[%c0_31, %c0_32] : memref<1x8xf32, #tpu.memory_space<vmem>>, vector<1x8xf32>
    %63 = vector.broadcast %62 : vector<1x8xf32> to vector<64x8xf32>
    %64 = arith.addf %61, %63 : vector<64x8xf32>
    %c0_33 = arith.constant 0 : index
    %c0_34 = arith.constant 0 : index
    %c0_35 = arith.constant 0 : index
    %65 = vector.load %arg8[%c0_33, %c0_34, %c0_35] : memref<1x64x8xf32, #tpu.memory_space<vmem>>, vector<1x64x8xf32>
    %66 = vector.shape_cast %65 : vector<1x64x8xf32> to vector<64x8xf32>
    %67 = vector.shape_cast %64 : vector<64x8xf32> to vector<1x64x8xf32>
    tpu.vector_store %arg8[%c0_33, %c0_34, %c0_35], %67 {strides = array<i32>} : memref<1x64x8xf32, #tpu.memory_space<vmem>>, vector<1x64x8xf32>,
    return
  }
  func.func @transform_0(%arg0: i32) -> (i32, i32, i32, i32) {
    %c0_i32 = arith.constant 0 : i32
    %c0_i32_0 = arith.constant 0 : i32
    %c0_i32_1 = arith.constant 0 : i32
    %c0_i32_2 = arith.constant 0 : i32
    return %arg0, %c0_i32, %c0_i32_0, %c0_i32_1 : i32, i32, i32, i32
  }
  func.func @transform_1(%arg0: i32) -> (i32, i32, i32) {
    %c0_i32 = arith.constant 0 : i32
    %c0_i32_0 = arith.constant 0 : i32
    %c0_i32_1 = arith.constant 0 : i32
    %c0_i32_2 = arith.constant 0 : i32
    return %c0_i32, %c0_i32_0, %c0_i32_1 : i32, i32, i32
  }
  func.func @transform_2(%arg0: i32) -> (i32, i32) {
    %c0_i32 = arith.constant 0 : i32
    %c0_i32_0 = arith.constant 0 : i32
    %c0_i32_1 = arith.constant 0 : i32
    return %c0_i32, %c0_i32_0 : i32, i32
  }
  func.func @transform_3(%arg0: i32) -> (i32, i32) {
    %c0_i32 = arith.constant 0 : i32
    %c0_i32_0 = arith.constant 0 : i32
    %c0_i32_1 = arith.constant 0 : i32
    return %c0_i32, %c0_i32_0 : i32, i32
  }
  func.func @transform_4(%arg0: i32) -> (i32, i32) {
    %c0_i32 = arith.constant 0 : i32
    %c0_i32_0 = arith.constant 0 : i32
    %c0_i32_1 = arith.constant 0 : i32
    return %c0_i32, %c0_i32_0 : i32, i32
  }
  func.func @transform_5(%arg0: i32) -> (i32, i32) {
    %c0_i32 = arith.constant 0 : i32
    %c0_i32_0 = arith.constant 0 : i32
    %c0_i32_1 = arith.constant 0 : i32
    return %c0_i32, %c0_i32_0 : i32, i32
  }
  func.func @transform_6(%arg0: i32) -> (i32, i32) {
    %c0_i32 = arith.constant 0 : i32
    %c0_i32_0 = arith.constant 0 : i32
    %c0_i32_1 = arith.constant 0 : i32
    return %c0_i32, %c0_i32_0 : i32, i32
  }
  func.func @transform_7(%arg0: i32) -> (i32, i32, i32) {
    %c0_i32 = arith.constant 0 : i32
    %c0_i32_0 = arith.constant 0 : i32
    %c0_i32_1 = arith.constant 0 : i32
    return %arg0, %c0_i32, %c0_i32_0 : i32, i32, i32
  }
}

</mosaic_0001>

<bundles_post_ra>
// kernel: control_encoder_latent.2
= control target key start
LH: loop header
LB: loop body
LE: loop exit
PB: predicated region body
PF: predicated region fallthrough
CT: control target
= control target key end

     0   :  { %s4586_s12 = smov 0   ;;  %s6458_s0 = inlined_call_operand.vmem [shape: f32[2,18,18,4], index: 0, kind: input, shape index: {}]   ;;  %s6459_s1 = inlined_call_operand.vmem [shape: f32[9,4,8], index: 1, kind: input, shape index: {}]   ;;  %s6460_s2 = inlined_call_operand.vmem [shape: f32[1,8], index: 2, kind: input, shape index: {}]   ;;  %s6461_s3 = inlined_call_operand.vmem [shape: f32[2,256,8], index: 3, kind: output, shape index: {}]  }
   0x1 LB: > { %s3323_s13 = sadd.s32 4294967295, %s4564_s12   ;;  %p3327_p0 = scmp.ge.s32.totalorder %s4564_s12, 1  ;;  %s4564_s12 = sphi %s4586_s12, %s13_s12  }
   0x2   : > { %p137_p1 = scmp.lt.s32.totalorder %s4564_s12, 3 }
   0x4   : > { %p138_p2 = pnand %p3327_p0, %p137_p1 }
   0x6   : > { %141 = sbr.rel (%p138_p2) target bundleno = 547 (0x223), region = 32 }
   0xb   : > { %v3331_v0 = vld [vmem:[%s6459_s1 + $0x4] sm:$0xf]  ;;  %vm422_vm0 = vcmask 1043456   ;;  %p161_p3 = scmp.lt.s32.totalorder %s3323_s13, 1  ;;  %v225_v1 = vld [vmem:[%s6459_s1] sm:$0xf] }
   0xc   : > { %4419 = vmatprep.subr.msk.mxu1 %vm422_vm0, %v3331_v0  ;;  %3969 = vmatprep.subr.msk.mxu0 %vm422_vm0, %v3331_v0  ;;  %v3398_v2 = vld [vmem:[%s6459_s1 + $0x8] sm:$0xf]  ;;  %vm274_vm1 = vcmask 1046528   ;;  %vm357_vm2 = vcmask 31744   ;;  %v4658_v21 = vld [vmem:[%s6459_s1 + $0xc] sm:$0xf] }
   0xd   : > { %4420 = vmatpush3.msk.msra.mxu1 %vm422_vm0, %v3331_v0  ;;  %3970 = vmatpush3.msk.msra.mxu0 %vm422_vm0, %v3331_v0  ;;  %s6755_s13 = smov (!%p161_p3, %s3323_s13), 1  ;;  %v4676_v28 = vld [vmem:[%s6459_s1 + $0x10] sm:$0xf]  ;;  %vm943_vm3 = vcmask 1045504   ;;  %vm3235_vm4 = vcmask 64512  }
   0xe   : > { %4019 = vmatprep.subr.msk.mxu1 %vm422_vm0, %v225_v1  ;;  %4069 = vmatprep.subr.msk.mxu0 %vm422_vm0, %v3398_v2  ;;  %s4421_s20 = smul.u32 432, %s6755_s13  ;;  %s3671_s11 = sshll.u32 %s6755_s13, 8 }
   0xf   : > { %s6275_s15 = scalar_lea.vmem %s6461_s3, %s3671_s11 }
  0x10   : > { %s4615_s23 = scalar_lea.vmem %s6458_s0, %s4421_s20 }
  0x11   : > { %v4618_v3 = vld [vmem:[%s4615_s23] sm:$0xff]  ;;  %v4621_v4 = vld [vmem:[%s4615_s23 + $0x8] sm:$0xff]  ;;  %v4633_v10 = vld [vmem:[%s4615_s23 + $0x10] sm:$0x3] }
  0x12   : > { %v4624_v5 = vld [vmem:[%s4615_s23 + $0xc0] sm:$0xff]  ;;  %v275_v6 = vrot.slane %v4618_v3, 1  ;;  %v276_v7 = vrot.slane %v4621_v4, 1  ;;  %v4629_v8 = vld [vmem:[%s4615_s23 + $0xc8] sm:$0xff]  ;;  %v278_v12 = vrot.slane %v4633_v10, 1  ;;  %v4641_v14 = vld [vmem:[%s4615_s23 + $0x18] sm:$0xff] }
  0x13   : > { %v315_v9 = vrot.slane %v4624_v5, 1  ;;  %v316_v11 = vrot.slane %v4629_v8, 1  ;;  %v4638_v13 = vld [vmem:[%s4615_s23 + $0xd0] sm:$0x3]  ;;  %v4646_v17 = vld [vmem:[%s4615_s23 + $0x20] sm:$0xff]  ;;  %v280_v18 = vrot.slane %v4641_v14, 1 }
  0x14   : > { %v277_v15 = vsel %vm274_vm1, %v275_v6, %v276_v7  ;;  %v318_v16 = vrot.slane %v4638_v13, 1  ;;  %v4650_v19 = vld [vmem:[%s4615_s23 + $0xd8] sm:$0xff]  ;;  %v4653_v20 = vld [vmem:[%s4615_s23 + $0xe0] sm:$0xff]  ;;  %v279_v23 = vsel %vm274_vm1, %v276_v7, %v278_v12  ;;  %v281_v24 = vrot.slane %v4646_v17, 1  ;;  %v4668_v26 = vld [vmem:[%s4615_s23 + $0x28] sm:$0x3] }
  0x15   : > { %3971 = vmatprep.mubr.msk.f32.mxu0 %vm357_vm2, %v277_v15  ;;  %v4662_v22 = vsel %vm274_vm1, %v315_v9, %v316_v11  ;;  %v320_v25 = vrot.slane %v4650_v19, 1  ;;  %v4671_v27 = vld [vmem:[%s4615_s23 + $0xe8] sm:$0x3]  ;;  %v321_v30 = vrot.slane %v4653_v20, 1  ;;  %v283_v31 = vrot.slane %v4668_v26, 1  ;;  %v4688_v33 = vld [vmem:[%s4615_s23 + $0x30] sm:$0xff] }
  0x16   : > { %6544 = vst [vmem:[#allocation2_spill] sm:$0xff] %v4662_v22  ;;  %3995 = vmatprep.mubr.msk.f32.mxu1 %vm357_vm2, %v4662_v22  ;;  %3972 = vmatmul.mubr.msk.f32.vlgmr.msra.gmra.mxu0 %vm357_vm2, %v279_v23  ;;  %v4682_v29 = vsel %vm274_vm1, %v316_v11, %v318_v16  ;;  %v323_v32 = vrot.slane %v4671_v27, 1  ;;  %v4691_v34 = vld [vmem:[%s4615_s23 + $0x38] sm:$0xff]  ;;  %v4694_v35 = vld [vmem:[%s4615_s23 + $0xf0] sm:$0xff]  ;;  %v4700_v36 = vsel %vm274_vm1, %v280_v18, %v281_v24  ;;  %v285_v37 = vrot.slane %v4688_v33, 1  ;;  %v4728_v47 = vld [vmem:[%s4615_s23 + $0x48] sm:$0xff] }
  0x17   : > { %6545 = vst [vmem:[#allocation3_spill] sm:$0xff] %v4682_v29  ;;  %3996 = vmatmul.mubr.msk.f32.vlgmr.msra.gmra.mxu1 %vm357_vm2, %v4682_v29  ;;  %4070 = vmatpush3.msk.msra.mxu0 %vm422_vm0, %v3398_v2  ;;  %6546 = vst [vmem:[#allocation4_spill] sm:$0xff] %v4700_v36  ;;  %v286_v38 = vrot.slane %v4691_v34, 1  ;;  %v4705_v39 = vld [vmem:[%s4615_s23 + $0xf8] sm:$0xff]  ;;  %v325_v40 = vrot.slane %v4694_v35, 1  ;;  %v4715_v42 = vsel %vm274_vm1, %v320_v25, %v321_v30  ;;  %v4731_v48 = vld [vmem:[%s4615_s23 + $0x50] sm:$0xff] }
  0x18   : > { %v4709_v41 = vld [vmem:[%s4615_s23 + $0x40] sm:$0x3]  ;;  %4020 = vmatpush3.msk.msra.mxu1 %vm422_vm0, %v225_v1  ;;  %3974 = vmatprep.mubr.msk.f32.mxu0 %vm357_vm2, %v4700_v36  ;;  %6547 = vst [vmem:[#allocation5_spill] sm:$0xff] %v4715_v42  ;;  %v4718_v43 = vsel %vm274_vm1, %v281_v24, %v283_v31  ;;  %v4721_v44 = vsel %vm274_vm1, %v321_v30, %v323_v32  ;;  %v326_v45 = vrot.slane %v4705_v39, 1  ;;  %v290_v52 = vrot.slane %v4728_v47, 1  ;;  %v4742_v53 = vld [vmem:[%s4615_s23 + $0x108] sm:$0xff] }
  0x19   : > { %6548 = vst [vmem:[#allocation6_spill] sm:$0xff] %v4718_v43  ;;  %6549 = vst [vmem:[#allocation7_spill] sm:$0xff] %v4721_v44  ;;  %v4725_v46 = vld [vmem:[%s4615_s23 + $0x100] sm:$0x3]  ;;  %3998 = vmatprep.mubr.msk.f32.mxu1 %vm357_vm2, %v4715_v42  ;;  %v4736_v49 = vsel %vm274_vm1, %v285_v37, %v286_v38  ;;  %v288_v50 = vrot.slane %v4709_v41, 1  ;;  %v4745_v54 = vld [vmem:[%s4615_s23 + $0x110] sm:$0xff]  ;;  %4119 = vmatprep.subr.msk.mxu1 %vm422_vm0, %v4658_v21 }
  0x1a   : > { %6550 = vst [vmem:[#allocation8_spill] sm:$0xff] %v4736_v49  ;;  %v328_v51 = vrot.slane %v4725_v46, 1  ;;  %v4748_v55 = vld [vmem:[%s4615_s23 + $0x60] sm:$0xff]  ;;  %3975 = vmatmul.mubr.msk.f32.gmra.mxu0 %vm357_vm2, %v4718_v43  ;;  %v4755_v56 = vsel %vm274_vm1, %v325_v40, %v326_v45  ;;  %v291_v57 = vrot.slane %v4731_v48, 1  ;;  %v330_v58 = vrot.slane %v4742_v53, 1  ;;  %v4764_v61 = vld [vmem:[%s4615_s23 + $0x68] sm:$0xff]  ;;  %4169 = vmatprep.subr.msk.mxu0 %vm422_vm0, %v4676_v28 }
  0x1b   : > { %6551 = vst [vmem:[#allocation9_spill] sm:$0xff] %v4755_v56  ;;  %v331_v59 = vrot.slane %v4745_v54, 1  ;;  %v4761_v60 = vld [vmem:[%s4615_s23 + $0x58] sm:$0x3]  ;;  %3999 = vmatmul.mubr.msk.f32.gmra.mxu1 %vm357_vm2, %v4721_v44  ;;  %3977 = vmatprep.mubr.msk.f32.mxu0 %vm357_vm2, %v4736_v49  ;;  %v4773_v62 = vsel %vm274_vm1, %v286_v38, %v288_v50  ;;  %v295_v1 = vrot.slane %v4748_v55, 1  ;;  %v4781_v2 = vld [vmem:[%s4615_s23 + $0x120] sm:$0xff] }
  0x1c   : > { %6552 = vst [vmem:[#allocation10_spill] sm:$0xff] %v4773_v62  ;;  %v293_v63 = vrot.slane %v4761_v60, 1  ;;  %v4777_v0 = vld [vmem:[%s4615_s23 + $0x118] sm:$0x3]  ;;  %v4784_v6 = vld [vmem:[%s4615_s23 + $0x128] sm:$0xff]  ;;  %4001 = vmatprep.mubr.msk.f32.mxu1 %vm357_vm2, %v4755_v56  ;;  %v4789_v7 = vsel %vm274_vm1, %v326_v45, %v328_v51  ;;  %v4792_v9 = vsel %vm274_vm1, %v290_v52, %v291_v57  ;;  %v296_v12 = vrot.slane %v4764_v61, 1 }
  0x1d   : > { %6553 = vst [vmem:[#allocation11_spill] sm:$0xff] %v4789_v7  ;;  %6554 = vst [vmem:[#allocation12_spill] sm:$0xff] %v4792_v9  ;;  %v333_v11 = vrot.slane %v4777_v0, 1  ;;  %v4797_v15 = vld [vmem:[%s4615_s23 + $0x70] sm:$0x3]  ;;  %v4803_v18 = vsel %vm274_vm1, %v330_v58, %v331_v59  ;;  %v335_v23 = vrot.slane %v4781_v2, 1 }
  0x1e   : > { %v4800_v16 = vld [vmem:[%s4615_s23 + $0x130] sm:$0x3]  ;;  %6555 = vst [vmem:[#allocation13_spill] sm:$0xff] %v4803_v18  ;;  %v336_v24 = vrot.slane %v4784_v6, 1  ;;  %v4808_v25 = vld [vmem:[%s4615_s23 + $0x78] sm:$0xff]  ;;  %v4811_v30 = vld [vmem:[%s4615_s23 + $0x80] sm:$0xff]  ;;  %3978 = vmatmul.mubr.msk.f32.gmra.mxu0 %vm357_vm2, %v4773_v62  ;;  %v4826_v37 = vsel %vm274_vm1, %v291_v57, %v293_v63  ;;  %v4836_v50 = vsel %vm274_vm1, %v295_v1, %v296_v12 }
  0x1f   : > { %v4816_v31 = vld [vmem:[%s4615_s23 + $0x138] sm:$0xff]  ;;  %v4819_v32 = vld [vmem:[%s4615_s23 + $0x140] sm:$0xff]  ;;  %4002 = vmatmul.mubr.msk.f32.gmra.mxu1 %vm357_vm2, %v4789_v7  ;;  %3980 = vmatprep.mubr.msk.f32.mxu0 %vm357_vm2, %v4792_v9  ;;  %6556 = vst [vmem:[#allocation14_spill] sm:$0xff] %v4826_v37  ;;  %v298_v38 = vrot.slane %v4797_v15, 1  ;;  %v338_v40 = vrot.slane %v4800_v16, 1  ;;  %v4833_v45 = vsel %vm274_vm1, %v331_v59, %v333_v11  ;;  %6558 = vst [vmem:[#allocation16_spill] sm:$0xff] %v4836_v50 }
  0x20   : > { %4004 = vmatprep.mubr.msk.f32.mxu1 %vm357_vm2, %v4803_v18  ;;  %6557 = vst [vmem:[#allocation15_spill] sm:$0xff] %v4833_v45  ;;  %v300_v51 = vrot.slane %v4808_v25, 1  ;;  %v301_v52 = vrot.slane %v4811_v30, 1  ;;  %v4841_v57 = vld [vmem:[%s4615_s23 + $0x88] sm:$0x3]  ;;  %v4847_v63 = vsel %vm274_vm1, %v335_v23, %v336_v24  ;;  %v340_v7 = vrot.slane %v4816_v31, 1 }
  0x21   : > { %v4844_v58 = vld [vmem:[%s4615_s23 + $0x148] sm:$0x3]  ;;  %6559 = vst [vmem:[#allocation17_spill] sm:$0xff] %v4847_v63  ;;  %v341_v18 = vrot.slane %v4819_v32, 1  ;;  %v4852_v59 = vld [vmem:[%s4615_s23 + $0x90] sm:$0xff]  ;;  %v4855_v1 = vld [vmem:[%s4615_s23 + $0x98] sm:$0xff]  ;;  %v4870_v23 = vsel %vm274_vm1, %v296_v12, %v298_v38  ;;  %v4877_v29 = vsel %vm274_vm1, %v336_v24, %v338_v40 }
  0x22   : > { %3981 = vmatmul.mubr.msk.f32.gmra.mxu0 %vm357_vm2, %v4826_v37  ;;  %v4860_v11 = vld [vmem:[%s4615_s23 + $0x150] sm:$0xff]  ;;  %v4863_v56 = vld [vmem:[%s4615_s23 + $0x158] sm:$0xff]  ;;  %6561 = vst [vmem:[#allocation19_spill] sm:$0xff] %v4870_v23  ;;  %v303_v44 = vrot.slane %v4841_v57, 1  ;;  %v343_v42 = vrot.slane %v4844_v58, 1  ;;  %6562 = vst [vmem:[#allocation20_spill] sm:$0xff] %v4877_v29 }
  0x23   : > { %6560 = vst [vmem:[#allocation18_spill] sm:$0xff] %v4863_v56  ;;  %4005 = vmatmul.mubr.msk.f32.gmra.mxu1 %vm357_vm2, %v4833_v45  ;;  %3983 = vmatprep.mubr.msk.f32.mxu0 %vm357_vm2, %v4836_v50  ;;  %v4880_v45 = vsel %vm274_vm1, %v300_v51, %v301_v52  ;;  %v305_v22 = vrot.slane %v4852_v59, 1  ;;  %v306_v12 = vrot.slane %v4855_v1, 1  ;;  %v4885_v38 = vld [vmem:[%s4615_s23 + $0xa0] sm:$0x3]  ;;  %v4888_v50 = vsel %vm274_vm1, %v340_v7, %v341_v18  ;;  %v4896_v24 = vld [vmem:[%s4615_s23 + $0xa8] sm:$0xff] }
  0x24   : > { %4007 = vmatprep.mubr.msk.f32.mxu1 %vm357_vm2, %v4847_v63  ;;  %6563 = vst [vmem:[#allocation21_spill] sm:$0xff] %v4880_v45  ;;  %6564 = vst [vmem:[#allocation22_spill] sm:$0xff] %v4888_v50  ;;  %v345_v37 = vrot.slane %v4860_v11, 1  ;;  %v346_v9 = vrot.slane %v4863_v56, 1  ;;  %v4893_v63 = vld [vmem:[%s4615_s23 + $0x160] sm:$0x3]  ;;  %v4914_v7 = vsel %vm274_vm1, %v301_v52, %v303_v44  ;;  %v4917_v49 = vsel %vm274_vm1, %v341_v18, %v343_v42 }
  0x25   : > { %v4899_v40 = vld [vmem:[%s4615_s23 + $0xb0] sm:$0xff]  ;;  %v4904_v51 = vld [vmem:[%s4615_s23 + $0x168] sm:$0xff]  ;;  %6566 = vst [vmem:[#allocation24_spill] sm:$0xff] %v4914_v7  ;;  %6567 = vst [vmem:[#allocation25_spill] sm:$0xff] %v4917_v49  ;;  %v308_v43 = vrot.slane %v4885_v38, 1  ;;  %v348_v36 = vrot.slane %v4893_v63, 1 }
  0x26   : > { %3984 = vmatmul.mubr.msk.f32.gmra.mxu0 %vm357_vm2, %v4870_v23  ;;  %v4907_v62 = vld [vmem:[%s4615_s23 + $0x170] sm:$0xff]  ;;  %v4923_v23 = vsel %vm274_vm1, %v305_v22, %v306_v12  ;;  %v4929_v56 = vld [vmem:[%s4615_s23 + $0xb8] sm:$0x3]  ;;  %v4932_v44 = vsel %vm274_vm1, %v345_v37, %v346_v9  ;;  %v350_v42 = vrot.slane %v4904_v51, 1 }
  0x27   : > { %6565 = vst [vmem:[#allocation23_spill] sm:$0xff] %v4907_v62  ;;  %4008 = vmatmul.mubr.msk.f32.gmra.mxu1 %vm357_vm2, %v4877_v29  ;;  %3986 = vmatprep.mubr.msk.f32.mxu0 %vm357_vm2, %v4880_v45  ;;  %6568 = vst [vmem:[#allocation26_spill] sm:$0xff] %v4923_v23  ;;  %v310_v29 = vrot.slane %v4896_v24, 1  ;;  %v311_v45 = vrot.slane %v4899_v40, 1  ;;  %v351_v18 = vrot.slane %v4907_v62, 1  ;;  %v4946_v22 = vsel %vm274_vm1, %v306_v12, %v308_v43 }
  0x28   : > { %4010 = vmatprep.mubr.msk.f32.mxu1 %vm357_vm2, %v4888_v50  ;;  %6569 = vst [vmem:[#allocation27_spill] sm:$0xff] %v4932_v44  ;;  %v4937_v52 = vld [vmem:[%s4615_s23 + $0x178] sm:$0x3]  ;;  %6570 = vst [vmem:[#allocation28_spill] sm:$0xff] %v4946_v22  ;;  %v313_v37 = vrot.slane %v4929_v56, 1  ;;  %v944_v50 = vrot.slane %v4618_v3, 2  ;;  %v4953_v62 = vsel %vm274_vm1, %v346_v9, %v348_v36 }
  0x29   : > { %6571 = vst [vmem:[#allocation29_spill] sm:$0xff] %v4953_v62  ;;  %v4961_v43 = vsel %vm274_vm1, %v350_v42, %v351_v18  ;;  %v947_v12 = vrot.slane %v4633_v10, 2  ;;  %v949_v10 = vrot.slane %v4641_v14, 2  ;;  %v950_v42 = vrot.slane %v4646_v17, 2 }
  0x2a   : > { %3987 = vmatmul.mubr.msk.f32.gmra.mxu0 %vm357_vm2, %v4914_v7  ;;  %v4956_v7 = vsel %vm274_vm1, %v310_v29, %v311_v45  ;;  %6573 = vst [vmem:[#allocation31_spill] sm:$0xff] %v4961_v43  ;;  %v4971_v29 = vsel %vm274_vm1, %v311_v45, %v313_v37  ;;  %v952_v37 = vrot.slane %v4668_v26, 2  ;;  %v957_v26 = vrot.slane %v4709_v41, 2 }
  0x2b   : > { %4011 = vmatmul.mubr.msk.f32.gmra.mxu1 %vm357_vm2, %v4917_v49  ;;  %3989 = vmatprep.mubr.msk.f32.mxu0 %vm357_vm2, %v4923_v23  ;;  %6572 = vst [vmem:[#allocation30_spill] sm:$0xff] %v4956_v7  ;;  %v353_v49 = vrot.slane %v4937_v52, 1  ;;  %v945_v23 = vrot.slane %v4621_v4, 2  ;;  %6574 = vst [vmem:[#allocation32_spill] sm:$0xff] %v4971_v29  ;;  %v962_v41 = vrot.slane %v4761_v60, 2 }
  0x2c   : > { %4013 = vmatprep.mubr.msk.f32.mxu1 %vm357_vm2, %v4932_v44 }
  0x2d   : > { %v4976_v36 = vsel %vm274_vm1, %v351_v18, %v353_v49  ;;  %v946_v9 = vsel %vm943_vm3, %v944_v50, %v945_v23  ;;  %v948_v45 = vsel %vm943_vm3, %v945_v23, %v947_v12  ;;  %v954_v49 = vrot.slane %v4688_v33, 2  ;;  %v5012_v23 = vld [vmem:[%s6459_s1 + $0x18] sm:$0xf] }
  0x2e   : > { %3990 = vmatmul.mubr.msk.f32.gmra.mxu0 %vm357_vm2, %v4946_v22  ;;  %6575 = vst [vmem:[#allocation33_spill] sm:$0xff] %v4976_v36  ;;  %v955_v50 = vrot.slane %v4691_v34, 2  ;;  %v4994_v18 = vsel %vm943_vm3, %v949_v10, %v950_v42  ;;  %v960_v12 = vrot.slane %v4731_v48, 2 }
  0x2f   : > { %4014 = vmatmul.mubr.msk.f32.gmra.mxu1 %vm357_vm2, %v4953_v62  ;;  %3992 = vmatprep.mubr.msk.f32.mxu0 %vm357_vm2, %v4956_v7 }
  0x30   : > { %4016 = vmatprep.mubr.msk.f32.mxu1 %vm357_vm2, %v4961_v43  ;;  %v5053_v60 = vsel %vm943_vm3, %v960_v12, %v962_v41  ;;  %v974_v41 = vrot.slane %v4852_v59, 2 }
  0x32   : > { %3993 = vmatmul.mubr.msk.f32.gmra.mxu0 %vm357_vm2, %v4971_v29 }
  0x33   : > { %4017 = vmatmul.mubr.msk.f32.gmra.mxu1 %vm357_vm2, %v4976_v36  ;;  %4071 = vmatprep.mubr.msk.f32.mxu0 %vm357_vm2, %v946_v9  ;;  %v4999_v9 = vld [vmem:[%s6459_s1 + $0x14] sm:$0xf] }
  0x34   : > { %4021 = vmatprep.mubr.msk.f32.mxu1 %vm357_vm2, %v4618_v3  ;;  %v5006_v3 = vsel %vm943_vm3, %v950_v42, %v952_v37  ;;  %v964_v42 = vrot.slane %v4748_v55, 2  ;;  %v967_v37 = vrot.slane %v4797_v15, 2 }
  0x36   : > { %4072 = vmatmul.mubr.msk.f32.vlgmr.msra.gmra.mxu0 %vm357_vm2, %v948_v45  ;;  %v965_v45 = vrot.slane %v4764_v61, 2 }
  0x37   : > { %4022 = vmatmul.mubr.msk.f32.vlgmr.msra.gmra.mxu1 %vm357_vm2, %v4621_v4  ;;  %4170 = vmatpush3.msk.msra.mxu0 %vm422_vm0, %v4676_v28  ;;  %v5019_v4 = vsel %vm943_vm3, %v954_v49, %v955_v50  ;;  %v959_v28 = vrot.slane %v4728_v47, 2 }
  0x38   : > { %4120 = vmatpush3.msk.msra.mxu1 %vm422_vm0, %v4658_v21  ;;  %4024 = vmatprep.mubr.msk.f32.mxu1 %vm357_vm2, %v4641_v14  ;;  %v5036_v21 = vsel %vm943_vm3, %v955_v50, %v957_v26  ;;  %v5059_v49 = vsel %vm943_vm3, %v964_v42, %v965_v45  ;;  %v969_v50 = vrot.slane %v4808_v25, 2  ;;  %v970_v26 = vrot.slane %v4811_v30, 2 }
  0x39   : > { %4074 = vmatprep.mubr.msk.f32.mxu0 %vm357_vm2, %v4994_v18  ;;  %4219 = vmatprep.subr.msk.mxu1 %vm422_vm0, %v4999_v9  ;;  %v5042_v10 = vsel %vm943_vm3, %v959_v28, %v960_v12  ;;  %v5070_v15 = vsel %vm943_vm3, %v965_v45, %v967_v37  ;;  %v972_v28 = vrot.slane %v4841_v57, 2  ;;  %v975_v42 = vrot.slane %v4855_v1, 2 }
  0x3a   : > { %4075 = vmatmul.mubr.msk.f32.gmra.mxu0 %vm357_vm2, %v5006_v3  ;;  %4269 = vmatprep.subr.msk.mxu0 %vm422_vm0, %v5012_v23  ;;  %6576 = vst [vmem:[#allocation34_spill] sm:$0xff] %v5070_v15  ;;  %v5076_v12 = vsel %vm943_vm3, %v969_v50, %v970_v26  ;;  %v977_v45 = vrot.slane %v4885_v38, 2  ;;  %v979_v50 = vrot.slane %v4896_v24, 2 }
  0x3b   : > { %4025 = vmatmul.mubr.msk.f32.gmra.mxu1 %vm357_vm2, %v4646_v17  ;;  %4077 = vmatprep.mubr.msk.f32.mxu0 %vm357_vm2, %v5019_v4  ;;  %v5087_v57 = vsel %vm943_vm3, %v970_v26, %v972_v28  ;;  %v5093_v37 = vsel %vm943_vm3, %v974_v41, %v975_v42  ;;  %v982_v26 = vrot.slane %v4929_v56, 2  ;;  %v984_v41 = vrot.slane %v4624_v5, 2 }
  0x3c   : > { %4027 = vmatprep.mubr.msk.f32.mxu1 %vm357_vm2, %v4688_v33  ;;  %6577 = vst [vmem:[#allocation35_spill] sm:$0xff] %v5087_v57  ;;  %v5104_v38 = vsel %vm943_vm3, %v975_v42, %v977_v45  ;;  %v987_v42 = vrot.slane %v4638_v13, 2 }
  0x3d   : > { %6578 = vst [vmem:[#allocation36_spill] sm:$0xff] %v5104_v38 }
  0x3e   : > { %4078 = vmatmul.mubr.msk.f32.gmra.mxu0 %vm357_vm2, %v5036_v21 }
  0x3f   : > { %4028 = vmatmul.mubr.msk.f32.gmra.mxu1 %vm357_vm2, %v4691_v34  ;;  %4080 = vmatprep.mubr.msk.f32.mxu0 %vm357_vm2, %v5042_v10 }
  0x40   : > { %4030 = vmatprep.mubr.msk.f32.mxu1 %vm357_vm2, %v4728_v47 }
  0x42   : > { %4081 = vmatmul.mubr.msk.f32.gmra.mxu0 %vm357_vm2, %v5053_v60 }
  0x43   : > { %4031 = vmatmul.mubr.msk.f32.gmra.mxu1 %vm357_vm2, %v4731_v48  ;;  %4083 = vmatprep.mubr.msk.f32.mxu0 %vm357_vm2, %v5059_v49 }
  0x44   : > { %4033 = vmatprep.mubr.msk.f32.mxu1 %vm357_vm2, %v4748_v55 }
  0x46   : > { %4084 = vmatmul.mubr.msk.f32.gmra.mxu0 %vm357_vm2, %v5070_v15  ;;  %v980_v15 = vrot.slane %v4899_v40, 2 }
  0x47   : > { %4034 = vmatmul.mubr.msk.f32.gmra.mxu1 %vm357_vm2, %v4764_v61  ;;  %4086 = vmatprep.mubr.msk.f32.mxu0 %vm357_vm2, %v5076_v12 }
  0x48   : > { %4036 = vmatprep.mubr.msk.f32.mxu1 %vm357_vm2, %v4808_v25  ;;  %v5110_v28 = vsel %vm943_vm3, %v979_v50, %v980_v15  ;;  %v5121_v56 = vsel %vm943_vm3, %v980_v15, %v982_v26  ;;  %v989_v50 = vrot.slane %v4650_v19, 2  ;;  %v992_v15 = vrot.slane %v4671_v27, 2 }
  0x49   : > { %6579 = vst [vmem:[#allocation37_spill] sm:$0xff] %v5121_v56 }
  0x4a   : > { %4087 = vmatmul.mubr.msk.f32.gmra.mxu0 %vm357_vm2, %v5087_v57  ;;  %v985_v57 = vrot.slane %v4629_v8, 2 }
  0x4b   : > { %4037 = vmatmul.mubr.msk.f32.gmra.mxu1 %vm357_vm2, %v4811_v30  ;;  %4089 = vmatprep.mubr.msk.f32.mxu0 %vm357_vm2, %v5093_v37 }
  0x4c   : > { %4039 = vmatprep.mubr.msk.f32.mxu1 %vm357_vm2, %v4852_v59  ;;  %v5127_v45 = vsel %vm943_vm3, %v984_v41, %v985_v57  ;;  %v5138_v13 = vsel %vm943_vm3, %v985_v57, %v987_v42  ;;  %v994_v41 = vrot.slane %v4694_v35, 2  ;;  %v997_v57 = vrot.slane %v4725_v46, 2 }
  0x4d   : > { %6580 = vst [vmem:[#allocation38_spill] sm:$0xff] %v5138_v13 }
  0x4e   : > { %4090 = vmatmul.mubr.msk.f32.gmra.mxu0 %vm357_vm2, %v5104_v38  ;;  %v990_v38 = vrot.slane %v4653_v20, 2 }
  0x4f   : > { %4040 = vmatmul.mubr.msk.f32.gmra.mxu1 %vm357_vm2, %v4855_v1  ;;  %4092 = vmatprep.mubr.msk.f32.mxu0 %vm357_vm2, %v5110_v28 }
  0x50   : > { %4042 = vmatprep.mubr.msk.f32.mxu1 %vm357_vm2, %v4896_v24  ;;  %v5144_v26 = vsel %vm943_vm3, %v989_v50, %v990_v38  ;;  %v5155_v27 = vsel %vm943_vm3, %v990_v38, %v992_v15  ;;  %v999_v50 = vrot.slane %v4742_v53, 2  ;;  %v1002_v38 = vrot.slane %v4777_v0, 2 }
  0x51   : > { %6581 = vst [vmem:[#allocation39_spill] sm:$0xff] %v5155_v27 }
  0x52   : > { %4093 = vmatmul.mubr.msk.f32.gmra.mxu0 %vm357_vm2, %v5121_v56  ;;  %v995_v56 = vrot.slane %v4705_v39, 2 }
  0x53   : > { %4043 = vmatmul.mubr.msk.f32.gmra.mxu1 %vm357_vm2, %v4899_v40  ;;  %4095 = vmatprep.mubr.msk.f32.mxu0 %vm357_vm2, %v5127_v45 }
  0x54   : > { %4045 = vmatprep.mubr.msk.f32.mxu1 %vm357_vm2, %v4624_v5  ;;  %v5161_v42 = vsel %vm943_vm3, %v994_v41, %v995_v56  ;;  %v5172_v46 = vsel %vm943_vm3, %v995_v56, %v997_v57  ;;  %v1004_v41 = vrot.slane %v4781_v2, 2  ;;  %v1007_v56 = vrot.slane %v4800_v16, 2 }
  0x55   : > { %6582 = vst [vmem:[#allocation40_spill] sm:$0xff] %v5172_v46 }
  0x56   : > { %4096 = vmatmul.mubr.msk.f32.gmra.mxu0 %vm357_vm2, %v5138_v13  ;;  %v1000_v13 = vrot.slane %v4745_v54, 2 }
  0x57   : > { %4046 = vmatmul.mubr.msk.f32.gmra.mxu1 %vm357_vm2, %v4629_v8  ;;  %4098 = vmatprep.mubr.msk.f32.mxu0 %vm357_vm2, %v5144_v26 }
  0x58   : > { %4048 = vmatprep.mubr.msk.f32.mxu1 %vm357_vm2, %v4650_v19  ;;  %v5178_v15 = vsel %vm943_vm3, %v999_v50, %v1000_v13  ;;  %v5189_v0 = vsel %vm943_vm3, %v1000_v13, %v1002_v38  ;;  %v1009_v50 = vrot.slane %v4816_v31, 2  ;;  %v1012_v13 = vrot.slane %v4844_v58, 2 }
  0x59   : > { %6583 = vst [vmem:[#allocation41_spill] sm:$0xff] %v5178_v15  ;;  %6584 = vst [vmem:[#allocation42_spill] sm:$0xff] %v5189_v0 }
  0x5a   : > { %4099 = vmatmul.mubr.msk.f32.gmra.mxu0 %vm357_vm2, %v5155_v27  ;;  %v1005_v27 = vrot.slane %v4784_v6, 2 }
  0x5b   : > { %4049 = vmatmul.mubr.msk.f32.gmra.mxu1 %vm357_vm2, %v4653_v20  ;;  %4101 = vmatprep.mubr.msk.f32.mxu0 %vm357_vm2, %v5161_v42 }
  0x5c   : > { %4051 = vmatprep.mubr.msk.f32.mxu1 %vm357_vm2, %v4694_v35  ;;  %v5195_v57 = vsel %vm943_vm3, %v1004_v41, %v1005_v27  ;;  %v5206_v16 = vsel %vm943_vm3, %v1005_v27, %v1007_v56  ;;  %v1014_v41 = vrot.slane %v4860_v11, 2  ;;  %v1017_v27 = vrot.slane %v4893_v63, 2 }
  0x5d   : > { %6585 = vst [vmem:[#allocation43_spill] sm:$0xff] %v5195_v57  ;;  %6586 = vst [vmem:[#allocation44_spill] sm:$0xff] %v5206_v16 }
  0x5e   : > { %4102 = vmatmul.mubr.msk.f32.gmra.mxu0 %vm357_vm2, %v5172_v46  ;;  %v1010_v46 = vrot.slane %v4819_v32, 2 }
  0x5f   : > { %4052 = vmatmul.mubr.msk.f32.gmra.mxu1 %vm357_vm2, %v4705_v39  ;;  %4104 = vmatprep.mubr.msk.f32.mxu0 %vm357_vm2, %v5178_v15 }
  0x60   : > { %4054 = vmatprep.mubr.msk.f32.mxu1 %vm357_vm2, %v4742_v53  ;;  %v5212_v38 = vsel %vm943_vm3, %v1009_v50, %v1010_v46  ;;  %v5223_v58 = vsel %vm943_vm3, %v1010_v46, %v1012_v13  ;;  %v1019_v50 = vrot.slane %v4904_v51, 2  ;;  %v1022_v46 = vrot.slane %v4937_v52, 2  ;;  %v6590_v52 = vld [vmem:[#allocation4_spill] sm:$0xff] }
  0x62   : > { %4105 = vmatmul.mubr.msk.f32.gmra.mxu0 %vm357_vm2, %v5189_v0  ;;  %v6587_v0 = vld [vmem:[#allocation18_spill] sm:$0xff] }
  0x63   : > { %4055 = vmatmul.mubr.msk.f32.gmra.mxu1 %vm357_vm2, %v4745_v54  ;;  %4107 = vmatprep.mubr.msk.f32.mxu0 %vm357_vm2, %v5195_v57  ;;  %v1015_v15 = vrot.slane %v6587_v0, 2 }
  0x64   : > { %4057 = vmatprep.mubr.msk.f32.mxu1 %vm357_vm2, %v4781_v2 }
  0x65   : > { %v5229_v56 = vsel %vm943_vm3, %v1014_v41, %v1015_v15  ;;  %v5240_v63 = vsel %vm943_vm3, %v1015_v15, %v1017_v27  ;;  %v6591_v41 = vld [vmem:[#allocation6_spill] sm:$0xff] }
  0x66   : > { %4108 = vmatmul.mubr.msk.f32.gmra.mxu0 %vm357_vm2, %v5206_v16  ;;  %v6588_v16 = vld [vmem:[#allocation23_spill] sm:$0xff]  ;;  %v5281_v27 = vld [vmem:[%s6459_s1 + $0x20] sm:$0xf] }
  0x67   : > { %4058 = vmatmul.mubr.msk.f32.gmra.mxu1 %vm357_vm2, %v4784_v6  ;;  %4110 = vmatprep.mubr.msk.f32.mxu0 %vm357_vm2, %v5212_v38  ;;  %v1020_v57 = vrot.slane %v6588_v16, 2 }
  0x68   : > { %4060 = vmatprep.mubr.msk.f32.mxu1 %vm357_vm2, %v4816_v31 }
  0x69   : > { %v5246_v13 = vsel %vm943_vm3, %v1019_v50, %v1020_v57  ;;  %v5255_v15 = vsel %vm943_vm3, %v1020_v57, %v1022_v46  ;;  %v5272_v57 = vld [vmem:[%s6459_s1 + $0x1c] sm:$0xf]  ;;  %v6596_v50 = vld [vmem:[#allocation16_spill] sm:$0xff]  ;;  %v6597_v46 = vld [vmem:[#allocation19_spill] sm:$0xff] }
  0x6a   : > { %4111 = vmatmul.mubr.msk.f32.gmra.mxu0 %vm357_vm2, %v5223_v58  ;;  %6589 = vst [vmem:[#allocation18_spill] sm:$0xff] %v5255_v15 }
  0x6b   : > { %4061 = vmatmul.mubr.msk.f32.gmra.mxu1 %vm357_vm2, %v4819_v32  ;;  %4113 = vmatprep.mubr.msk.f32.mxu0 %vm357_vm2, %v5229_v56 }
  0x6c   : > { %4063 = vmatprep.mubr.msk.f32.mxu1 %vm357_vm2, %v4860_v11 }
  0x6e   : > { %4114 = vmatmul.mubr.msk.f32.gmra.mxu0 %vm357_vm2, %v5240_v63 }
  0x6f   : > { %4064 = vmatmul.mubr.msk.f32.gmra.mxu1 %vm357_vm2, %v6587_v0  ;;  %4116 = vmatprep.mubr.msk.f32.mxu0 %vm357_vm2, %v5246_v13 }
  0x70   : > { %4066 = vmatprep.mubr.msk.f32.mxu1 %vm357_vm2, %v4904_v51 }
  0x72   : > { %4117 = vmatmul.mubr.msk.f32.gmra.mxu0 %vm357_vm2, %v5255_v15 }
  0x73   : > { %4067 = vmatmul.mubr.msk.f32.gmra.mxu1 %vm357_vm2, %v6588_v16  ;;  %4171 = vmatprep.mubr.msk.f32.mxu0 %vm357_vm2, %v6590_v52  ;;  %v6598_v52 = vld [vmem:[#allocation21_spill] sm:$0xff] }
  0x74   : > { %4121 = vmatprep.mubr.msk.f32.mxu1 %vm357_vm2, %v4641_v14  ;;  %v6592_v14 = vld [vmem:[#allocation8_spill] sm:$0xff] }
  0x76   : > { %4172 = vmatmul.mubr.msk.f32.vlgmr.msra.gmra.mxu0 %vm357_vm2, %v6591_v41  ;;  %v6599_v41 = vld [vmem:[#allocation24_spill] sm:$0xff] }
  0x77   : > { %4122 = vmatmul.mubr.msk.f32.vlgmr.msra.gmra.mxu1 %vm357_vm2, %v4646_v17  ;;  %4270 = vmatpush3.msk.msra.mxu0 %vm422_vm0, %v5012_v23  ;;  %v6593_v17 = vld [vmem:[#allocation10_spill] sm:$0xff]  ;;  %v6594_v23 = vld [vmem:[#allocation12_spill] sm:$0xff] }
  0x78   : > { %4220 = vmatpush3.msk.msra.mxu1 %vm422_vm0, %v4999_v9  ;;  %4124 = vmatprep.mubr.msk.f32.mxu1 %vm357_vm2, %v4688_v33  ;;  %v6595_v9 = vld [vmem:[#allocation14_spill] sm:$0xff] }
  0x79   : > { %4174 = vmatprep.mubr.msk.f32.mxu0 %vm357_vm2, %v6592_v14  ;;  %4319 = vmatprep.subr.msk.mxu1 %vm422_vm0, %v5272_v57 }
  0x7a   : > { %4175 = vmatmul.mubr.msk.f32.gmra.mxu0 %vm357_vm2, %v6593_v17  ;;  %4369 = vmatprep.subr.msk.mxu0 %vm422_vm0, %v5281_v27 }
  0x7b   : > { %4125 = vmatmul.mubr.msk.f32.gmra.mxu1 %vm357_vm2, %v4691_v34  ;;  %4177 = vmatprep.mubr.msk.f32.mxu0 %vm357_vm2, %v6594_v23 }
  0x7c   : > { %4127 = vmatprep.mubr.msk.f32.mxu1 %vm357_vm2, %v4728_v47 }
  0x7e   : > { %4178 = vmatmul.mubr.msk.f32.gmra.mxu0 %vm357_vm2, %v6595_v9 }
  0x7f   : > { %4128 = vmatmul.mubr.msk.f32.gmra.mxu1 %vm357_vm2, %v4731_v48  ;;  %4180 = vmatprep.mubr.msk.f32.mxu0 %vm357_vm2, %v6596_v50  ;;  %v6600_v50 = vld [vmem:[#allocation26_spill] sm:$0xff] }
  0x80   : > { %4130 = vmatprep.mubr.msk.f32.mxu1 %vm357_vm2, %v4748_v55 }
  0x82   : > { %4181 = vmatmul.mubr.msk.f32.gmra.mxu0 %vm357_vm2, %v6597_v46 }
  0x83   : > { %4131 = vmatmul.mubr.msk.f32.gmra.mxu1 %vm357_vm2, %v4764_v61  ;;  %4183 = vmatprep.mubr.msk.f32.mxu0 %vm357_vm2, %v6598_v52  ;;  %v5398_v52 = vld [vmem:[%s4615_s23 + $0x190] sm:$0x3] }
  0x84   : > { %4133 = vmatprep.mubr.msk.f32.mxu1 %vm357_vm2, %v4808_v25 }
  0x86   : > { %4184 = vmatmul.mubr.msk.f32.gmra.mxu0 %vm357_vm2, %v6599_v41  ;;  %v5385_v41 = vld [vmem:[%s4615_s23 + $0x188] sm:$0xff] }
  0x87   : > { %4134 = vmatmul.mubr.msk.f32.gmra.mxu1 %vm357_vm2, %v4811_v30  ;;  %4186 = vmatprep.mubr.msk.f32.mxu0 %vm357_vm2, %v6600_v50  ;;  %v6601_v50 = vld [vmem:[#allocation2_spill] sm:$0xff] }
  0x88   : > { %4136 = vmatprep.mubr.msk.f32.mxu1 %vm357_vm2, %v4852_v59 }
  0x8a   : > { %4187 = vmatmul.mubr.msk.f32.gmra.mxu0 %vm357_vm2, %v4946_v22  ;;  %v6602_v22 = vld [vmem:[#allocation3_spill] sm:$0xff] }
  0x8b   : > { %4137 = vmatmul.mubr.msk.f32.gmra.mxu1 %vm357_vm2, %v4855_v1  ;;  %4189 = vmatprep.mubr.msk.f32.mxu0 %vm357_vm2, %v4956_v7  ;;  %v6603_v7 = vld [vmem:[#allocation5_spill] sm:$0xff] }
  0x8c   : > { %4139 = vmatprep.mubr.msk.f32.mxu1 %vm357_vm2, %v4896_v24 }
  0x8e   : > { %4190 = vmatmul.mubr.msk.f32.gmra.mxu0 %vm357_vm2, %v4971_v29  ;;  %v6604_v29 = vld [vmem:[#allocation7_spill] sm:$0xff] }
  0x8f   : > { %4140 = vmatmul.mubr.msk.f32.gmra.mxu1 %vm357_vm2, %v4899_v40  ;;  %4192 = vmatprep.mubr.msk.f32.mxu0 %vm357_vm2, %v6601_v50  ;;  %v6605_v50 = vld [vmem:[#allocation9_spill] sm:$0xff] }
  0x90   : > { %4142 = vmatprep.mubr.msk.f32.mxu1 %vm357_vm2, %v4624_v5 }
  0x92   : > { %4193 = vmatmul.mubr.msk.f32.gmra.mxu0 %vm357_vm2, %v6602_v22  ;;  %v6606_v22 = vld [vmem:[#allocation11_spill] sm:$0xff] }
  0x93   : > { %4143 = vmatmul.mubr.msk.f32.gmra.mxu1 %vm357_vm2, %v4629_v8  ;;  %4195 = vmatprep.mubr.msk.f32.mxu0 %vm357_vm2, %v6603_v7  ;;  %v6607_v7 = vld [vmem:[#allocation13_spill] sm:$0xff] }
  0x94   : > { %4145 = vmatprep.mubr.msk.f32.mxu1 %vm357_vm2, %v4650_v19 }
  0x96   : > { %4196 = vmatmul.mubr.msk.f32.gmra.mxu0 %vm357_vm2, %v6604_v29  ;;  %v6608_v29 = vld [vmem:[#allocation15_spill] sm:$0xff] }
  0x97   : > { %4146 = vmatmul.mubr.msk.f32.gmra.mxu1 %vm357_vm2, %v4653_v20  ;;  %4198 = vmatprep.mubr.msk.f32.mxu0 %vm357_vm2, %v6605_v50  ;;  %v6609_v50 = vld [vmem:[#allocation17_spill] sm:$0xff] }
  0x98   : > { %4148 = vmatprep.mubr.msk.f32.mxu1 %vm357_vm2, %v4694_v35 }
  0x9a   : > { %4199 = vmatmul.mubr.msk.f32.gmra.mxu0 %vm357_vm2, %v6606_v22  ;;  %v6610_v22 = vld [vmem:[#allocation20_spill] sm:$0xff] }
  0x9b   : > { %4149 = vmatmul.mubr.msk.f32.gmra.mxu1 %vm357_vm2, %v4705_v39  ;;  %4201 = vmatprep.mubr.msk.f32.mxu0 %vm357_vm2, %v6607_v7  ;;  %v6611_v7 = vld [vmem:[#allocation22_spill] sm:$0xff] }
  0x9c   : > { %4151 = vmatprep.mubr.msk.f32.mxu1 %vm357_vm2, %v4742_v53 }
  0x9e   : > { %4202 = vmatmul.mubr.msk.f32.gmra.mxu0 %vm357_vm2, %v6608_v29  ;;  %v5382_v29 = vld [vmem:[%s4615_s23 + $0x180] sm:$0xff] }
  0x9f   : > { %4152 = vmatmul.mubr.msk.f32.gmra.mxu1 %vm357_vm2, %v4745_v54  ;;  %4204 = vmatprep.mubr.msk.f32.mxu0 %vm357_vm2, %v6609_v50  ;;  %v6612_v50 = vld [vmem:[#allocation25_spill] sm:$0xff] }
  0xa0   : > { %4154 = vmatprep.mubr.msk.f32.mxu1 %vm357_vm2, %v4781_v2 }
  0xa2   : > { %4205 = vmatmul.mubr.msk.f32.gmra.mxu0 %vm357_vm2, %v6610_v22  ;;  %v1620_v22 = vrot.slane %v5385_v41, 1 }
  0xa3   : > { %4155 = vmatmul.mubr.msk.f32.gmra.mxu1 %vm357_vm2, %v4784_v6  ;;  %4207 = vmatprep.mubr.msk.f32.mxu0 %vm357_vm2, %v6611_v7  ;;  %v1619_v7 = vrot.slane %v5382_v29, 1 }
  0xa4   : > { %4157 = vmatprep.mubr.msk.f32.mxu1 %vm357_vm2, %v4816_v31 }
  0xa6   : > { %4208 = vmatmul.mubr.msk.f32.gmra.mxu0 %vm357_vm2, %v6612_v50  ;;  %v5410_v50 = vsel %vm274_vm1, %v1619_v7, %v1620_v22 }
  0xa7   : > { %4158 = vmatmul.mubr.msk.f32.gmra.mxu1 %vm357_vm2, %v4819_v32  ;;  %4210 = vmatprep.mubr.msk.f32.mxu0 %vm357_vm2, %v4932_v44  ;;  %v1622_v44 = vrot.slane %v5398_v52, 1  ;;  %6613 = vst [vmem:[#allocation23_spill] sm:$0xff] %v5410_v50 }
  0xa8   : > { %4160 = vmatprep.mubr.msk.f32.mxu1 %vm357_vm2, %v4860_v11 }
  0xaa   : > { %4211 = vmatmul.mubr.msk.f32.gmra.mxu0 %vm357_vm2, %v4953_v62  ;;  %v5419_v62 = vsel %vm274_vm1, %v1620_v22, %v1622_v44  ;;  %v6625_v22 = vld [vmem:[#allocation44_spill] sm:$0xff] }
  0xab   : > { %4161 = vmatmul.mubr.msk.f32.gmra.mxu1 %vm357_vm2, %v6587_v0  ;;  %4213 = vmatprep.mubr.msk.f32.mxu0 %vm357_vm2, %v4961_v43  ;;  %6614 = vst [vmem:[#allocation4_spill] sm:$0xff] %v5419_v62 }
  0xac   : > { %4163 = vmatprep.mubr.msk.f32.mxu1 %vm357_vm2, %v4904_v51 }
  0xae   : > { %4214 = vmatmul.mubr.msk.f32.gmra.mxu0 %vm357_vm2, %v4976_v36  ;;  %v5596_v36 = vld [vmem:[%s4615_s23 + $0x198] sm:$0xff] }
  0xaf   : > { %4164 = vmatmul.mubr.msk.f32.gmra.mxu1 %vm357_vm2, %v6588_v16  ;;  %4216 = vmatprep.mubr.msk.f32.mxu0 %vm357_vm2, %v5410_v50 }
  0xb0   : > { %4166 = vmatprep.mubr.msk.f32.mxu1 %vm357_vm2, %v5382_v29 }
  0xb2   : > { %4217 = vmatmul.mubr.msk.f32.gmra.mxu0 %vm357_vm2, %v5419_v62 }
  0xb3   : > { %4167 = vmatmul.mubr.msk.f32.gmra.mxu1 %vm357_vm2, %v5385_v41  ;;  %4271 = vmatprep.mubr.msk.f32.mxu0 %vm357_vm2, %v4688_v33  ;;  %v6615_v33 = vld [vmem:[#allocation34_spill] sm:$0xff] }
  0xb4   : > { %4221 = vmatprep.mubr.msk.f32.mxu1 %vm357_vm2, %v4994_v18 }
  0xb6   : > { %4272 = vmatmul.mubr.msk.f32.vlgmr.msra.gmra.mxu0 %vm357_vm2, %v4691_v34  ;;  %v6616_v34 = vld [vmem:[#allocation35_spill] sm:$0xff] }
  0xb7   : > { %4222 = vmatmul.mubr.msk.f32.vlgmr.msra.gmra.mxu1 %vm357_vm2, %v5006_v3  ;;  %4370 = vmatpush3.msk.msra.mxu0 %vm422_vm0, %v5281_v27 }
  0xb8   : > { %4320 = vmatpush3.msk.msra.mxu1 %vm422_vm0, %v5272_v57  ;;  %4224 = vmatprep.mubr.msk.f32.mxu1 %vm357_vm2, %v5019_v4  ;;  %v1890_v57 = vrot.slane %v5382_v29, 2 }
  0xb9   : > { %4274 = vmatprep.mubr.msk.f32.mxu0 %vm357_vm2, %v4728_v47  ;;  %v6617_v47 = vld [vmem:[#allocation36_spill] sm:$0xff] }
  0xba   : > { %4275 = vmatmul.mubr.msk.f32.gmra.mxu0 %vm357_vm2, %v4731_v48  ;;  %v6618_v48 = vld [vmem:[#allocation37_spill] sm:$0xff] }
  0xbb   : > { %4225 = vmatmul.mubr.msk.f32.gmra.mxu1 %vm357_vm2, %v5036_v21  ;;  %4277 = vmatprep.mubr.msk.f32.mxu0 %vm357_vm2, %v4748_v55  ;;  %v6619_v55 = vld [vmem:[#allocation38_spill] sm:$0xff] }
  0xbc   : > { %4227 = vmatprep.mubr.msk.f32.mxu1 %vm357_vm2, %v5042_v10 }
  0xbe   : > { %4278 = vmatmul.mubr.msk.f32.gmra.mxu0 %vm357_vm2, %v4764_v61 }
  0xbf   : > { %4228 = vmatmul.mubr.msk.f32.gmra.mxu1 %vm357_vm2, %v5053_v60  ;;  %4280 = vmatprep.mubr.msk.f32.mxu0 %vm357_vm2, %v4808_v25  ;;  %v6621_v25 = vld [vmem:[#allocation40_spill] sm:$0xff] }
  0xc0   : > { %4230 = vmatprep.mubr.msk.f32.mxu1 %vm357_vm2, %v5059_v49 }
  0xc2   : > { %4281 = vmatmul.mubr.msk.f32.gmra.mxu0 %vm357_vm2, %v4811_v30  ;;  %v6622_v30 = vld [vmem:[#allocation41_spill] sm:$0xff] }
  0xc3   : > { %4231 = vmatmul.mubr.msk.f32.gmra.mxu1 %vm357_vm2, %v6615_v33  ;;  %4283 = vmatprep.mubr.msk.f32.mxu0 %vm357_vm2, %v4852_v59 }
  0xc4   : > { %4233 = vmatprep.mubr.msk.f32.mxu1 %vm357_vm2, %v5076_v12 }
  0xc6   : > { %4284 = vmatmul.mubr.msk.f32.gmra.mxu0 %vm357_vm2, %v4855_v1 }
  0xc7   : > { %4234 = vmatmul.mubr.msk.f32.gmra.mxu1 %vm357_vm2, %v6616_v34  ;;  %4286 = vmatprep.mubr.msk.f32.mxu0 %vm357_vm2, %v4896_v24  ;;  %v6623_v24 = vld [vmem:[#allocation42_spill] sm:$0xff] }
  0xc8   : > { %4236 = vmatprep.mubr.msk.f32.mxu1 %vm357_vm2, %v5093_v37 }
  0xca   : > { %4287 = vmatmul.mubr.msk.f32.gmra.mxu0 %vm357_vm2, %v4899_v40  ;;  %v6624_v40 = vld [vmem:[#allocation43_spill] sm:$0xff] }
  0xcb   : > { %4237 = vmatmul.mubr.msk.f32.gmra.mxu1 %vm357_vm2, %v6617_v47  ;;  %4289 = vmatprep.mubr.msk.f32.mxu0 %vm357_vm2, %v4624_v5 }
  0xcc   : > { %4239 = vmatprep.mubr.msk.f32.mxu1 %vm357_vm2, %v5110_v28 }
  0xce   : > { %4290 = vmatmul.mubr.msk.f32.gmra.mxu0 %vm357_vm2, %v4629_v8 }
  0xcf   : > { %4240 = vmatmul.mubr.msk.f32.gmra.mxu1 %vm357_vm2, %v6618_v48  ;;  %4292 = vmatprep.mubr.msk.f32.mxu0 %vm357_vm2, %v4650_v19  ;;  %v6620_v19 = vld [vmem:[#allocation39_spill] sm:$0xff] }
  0xd0   : > { %4242 = vmatprep.mubr.msk.f32.mxu1 %vm357_vm2, %v5127_v45 }
  0xd2   : > { %4293 = vmatmul.mubr.msk.f32.gmra.mxu0 %vm357_vm2, %v4653_v20 }
  0xd3   : > { %4243 = vmatmul.mubr.msk.f32.gmra.mxu1 %vm357_vm2, %v6619_v55  ;;  %4295 = vmatprep.mubr.msk.f32.mxu0 %vm357_vm2, %v4694_v35 }
  0xd4   : > { %4245 = vmatprep.mubr.msk.f32.mxu1 %vm357_vm2, %v5144_v26 }
  0xd6   : > { %v5499_v5 = vpop.f32.mrf.mxu0  ;;  %4296 = vmatmul.mubr.msk.f32.gmra.mxu0 %vm357_vm2, %v4705_v39 }
  0xd7   : > { %v5503_v8 = vpop.f32.mrf.mxu1  ;;  %4246 = vmatmul.mubr.msk.f32.gmra.mxu1 %vm357_vm2, %v6620_v19  ;;  %4298 = vmatprep.mubr.msk.f32.mxu0 %vm357_vm2, %v4742_v53 }
  0xd8   : > { %v5509_v20 = vpop.f32.mrf.mxu0  ;;  %4248 = vmatprep.mubr.msk.f32.mxu1 %vm357_vm2, %v5161_v42 }
  0xd9   : > { %v5513_v35 = vpop.f32.mrf.mxu1 }
  0xda   : > { %v5515_v61 = vpop.f32.mrf.mxu0  ;;  %4299 = vmatmul.mubr.msk.f32.gmra.mxu0 %vm357_vm2, %v4745_v54 }
  0xdb   : > { %v5519_v39 = vpop.f32.mrf.mxu1  ;;  %4249 = vmatmul.mubr.msk.f32.gmra.mxu1 %vm357_vm2, %v6621_v25  ;;  %4301 = vmatprep.mubr.msk.f32.mxu0 %vm357_vm2, %v4781_v2 }
  0xdc   : > { %v5525_v53 = vpop.f32.mrf.mxu0  ;;  %4251 = vmatprep.mubr.msk.f32.mxu1 %vm357_vm2, %v6622_v30 }
  0xdd   : > { %v5529_v59 = vpop.f32.mrf.mxu1 }
  0xde   : > { %v5531_v1 = vpop.f32.mrf.mxu0  ;;  %4302 = vmatmul.mubr.msk.f32.gmra.mxu0 %vm357_vm2, %v4784_v6 }
  0xdf   : > { %v5535_v54 = vpop.f32.mrf.mxu1  ;;  %4252 = vmatmul.mubr.msk.f32.gmra.mxu1 %vm357_vm2, %v6623_v24  ;;  %4304 = vmatprep.mubr.msk.f32.mxu0 %vm357_vm2, %v4816_v31 }
  0xe0   : > { %v5541_v2 = vpop.f32.mrf.mxu0  ;;  %4254 = vmatprep.mubr.msk.f32.mxu1 %vm357_vm2, %v6624_v40 }
  0xe1   : > { %v5545_v7 = vpop.f32.mrf.mxu1 }
  0xe2   : > { %v5547_v44 = vpop.f32.mrf.mxu0  ;;  %4305 = vmatmul.mubr.msk.f32.gmra.mxu0 %vm357_vm2, %v4819_v32 }
  0xe3   : > { %v5551_v6 = vpop.f32.mrf.mxu1  ;;  %4255 = vmatmul.mubr.msk.f32.gmra.mxu1 %vm357_vm2, %v6625_v22  ;;  %4307 = vmatprep.mubr.msk.f32.mxu0 %vm357_vm2, %v4860_v11 }
  0xe4   : > { %v5557_v31 = vpop.f32.mrf.mxu0  ;;  %4257 = vmatprep.mubr.msk.f32.mxu1 %vm357_vm2, %v5212_v38 }
  0xe5   : > { %v5561_v18 = vpop.f32.mrf.mxu1 }
  0xe6   : > { %v5563_v3 = vpop.f32.mrf.mxu0  ;;  %4308 = vmatmul.mubr.msk.f32.gmra.mxu0 %vm357_vm2, %v6587_v0  ;;  %v1891_v0 = vrot.slane %v5385_v41, 2 }
  0xe7   : > { %v5567_v32 = vpop.f32.mrf.mxu1  ;;  %4258 = vmatmul.mubr.msk.f32.gmra.mxu1 %vm357_vm2, %v5223_v58  ;;  %4310 = vmatprep.mubr.msk.f32.mxu0 %vm357_vm2, %v4904_v51 }
  0xe8   : > { %6626 = vst [vmem:[#allocation6_spill] sm:$0xff] %v5567_v32  ;;  %v5573_v11 = vpop.f32.mrf.mxu0  ;;  %4260 = vmatprep.mubr.msk.f32.mxu1 %vm357_vm2, %v5229_v56  ;;  %v5615_v32 = vld [vmem:[%s4615_s23 + $0x1a0] sm:$0xff] }
  0xe9   : > { %v5578_v27 = vpop.f32.mrf.mxu1 }
  0xea   : > { %6627 = vst [vmem:[#allocation8_spill] sm:$0xff] %v5578_v27  ;;  %v5581_v62 = vpop.f32.mrf.mxu0  ;;  %4311 = vmatmul.mubr.msk.f32.gmra.mxu0 %vm357_vm2, %v6588_v16  ;;  %v1893_v27 = vrot.slane %v5398_v52, 2  ;;  %v5602_v16 = vsel %vm943_vm3, %v1890_v57, %v1891_v0 }
  0xeb   : > { %v5585_v50 = vpop.f32.mrf.mxu1  ;;  %4261 = vmatmul.mubr.msk.f32.gmra.mxu1 %vm357_vm2, %v5240_v63  ;;  %4313 = vmatprep.mubr.msk.f32.mxu0 %vm357_vm2, %v5382_v29  ;;  %6630 = vst [vmem:[#allocation14_spill] sm:$0xff] %v5602_v16 }
  0xec   : > { %6628 = vst [vmem:[#allocation10_spill] sm:$0xff] %v5585_v50  ;;  %v5591_v51 = vpop.f32.mrf.mxu0  ;;  %4263 = vmatprep.mubr.msk.f32.mxu1 %vm357_vm2, %v5246_v13  ;;  %v5622_v57 = vsel %vm943_vm3, %v1891_v0, %v1893_v27 }
  0xed   : > { %v5599_v43 = vpop.f32.mrf.mxu1  ;;  %6632 = vst [vmem:[#allocation34_spill] sm:$0xff] %v5622_v57 }
  0xee   : > { %6629 = vst [vmem:[#allocation12_spill] sm:$0xff] %v5599_v43  ;;  %v5604_v50 = vpop.f32.mrf.mxu0  ;;  %4314 = vmatmul.mubr.msk.f32.gmra.mxu0 %vm357_vm2, %v5385_v41 }
  0xef   : > { %v5608_v29 = vpop.f32.mrf.mxu1  ;;  %4264 = vmatmul.mubr.msk.f32.gmra.mxu1 %vm357_vm2, %v5255_v15  ;;  %4316 = vmatprep.mubr.msk.f32.mxu0 %vm357_vm2, %v5596_v36 }
  0xf0   : > { %6631 = vst [vmem:[#allocation19_spill] sm:$0xff] %v5608_v29  ;;  %v5617_v52 = vpop.f32.mrf.mxu0  ;;  %4266 = vmatprep.mubr.msk.f32.mxu1 %vm357_vm2, %v5602_v16 }
  0xf1   : > { %v5624_v43 = vpop.f32.mrf.mxu1 }
  0xf2   : > { %6633 = vst [vmem:[#allocation35_spill] sm:$0xff] %v5624_v43  ;;  %v5626_v41 = vpop.f32.mrf.mxu0  ;;  %4317 = vmatmul.mubr.msk.f32.gmra.mxu0 %vm357_vm2, %v5615_v32 }
  0xf3   : > { %v5630_v29 = vpop.f32.mrf.mxu1  ;;  %4267 = vmatmul.mubr.msk.f32.gmra.mxu1 %vm357_vm2, %v5622_v57  ;;  %4371 = vmatprep.mubr.msk.f32.mxu0 %vm357_vm2, %v5019_v4 }
  0xf4   : > { %6634 = vst [vmem:[#allocation36_spill] sm:$0xff] %v5630_v29  ;;  %v5636_v15 = vpop.f32.mrf.mxu0  ;;  %4321 = vmatprep.mubr.msk.f32.mxu1 %vm357_vm2, %v6592_v14 }
  0xf5   : > { %v5640_v27 = vpop.f32.mrf.mxu1 }
  0xf6   : > { %6635 = vst [vmem:[#allocation37_spill] sm:$0xff] %v5640_v27  ;;  %v4073_v0 = vpop.f32.mrf.mxu0  ;;  %4372 = vmatmul.mubr.msk.f32.vlgmr.msra.gmra.mxu0 %vm357_vm2, %v5036_v21 }
  0xf7   : > { %v4023_v43 = vpop.f32.mrf.mxu1  ;;  %4322 = vmatmul.mubr.msk.f32.vlgmr.msra.gmra.mxu1 %vm357_vm2, %v6593_v17  ;;  %4374 = vmatprep.mubr.msk.f32.mxu0 %vm357_vm2, %v5042_v10 }
  0xf8   : > { %v790_v4 = vadd.f32 %v4023_v43, %v5499_v5  ;;  %v1159_v29 = vpop.f32.mrf.mxu0  ;;  %4324 = vmatprep.mubr.msk.f32.mxu1 %vm357_vm2, %v6594_v23  ;;  %v6636_v23 = vld [vmem:[#allocation16_spill] sm:$0xff] }
  0xf9   : > { %v784_v14 = vpop.f32.mrf.mxu1 }
  0xfa   : > { %v5651_v57 = vadd.f32 %v4073_v0, %v790_v4  ;;  %v785_v27 = vadd.f32 %v784_v14, %v5509_v20  ;;  %v4076_v16 = vpop.f32.mrf.mxu0  ;;  %4375 = vmatmul.mubr.msk.f32.gmra.mxu0 %vm357_vm2, %v5053_v60  ;;  %v6638_v14 = vld [vmem:[#allocation24_spill] sm:$0xff] }
  0xfb   : > { %v4026_v21 = vpop.f32.mrf.mxu1  ;;  %4325 = vmatmul.mubr.msk.f32.gmra.mxu1 %vm357_vm2, %v6595_v9  ;;  %4377 = vmatprep.mubr.msk.f32.mxu0 %vm357_vm2, %v5059_v49 }
  0xfc   : > { %v5660_v43 = vadd.f32 %v1159_v29, %v785_v27  ;;  %v800_v10 = vadd.f32 %v4026_v21, %v5515_v61  ;;  %v1169_v17 = vpop.f32.mrf.mxu0  ;;  %4327 = vmatprep.mubr.msk.f32.mxu1 %vm357_vm2, %v6636_v23 }
  0xfd   : > { %v794_v5 = vpop.f32.mrf.mxu1 }
  0xfe   : > { %v5665_v20 = vadd.f32 %v4076_v16, %v800_v10  ;;  %v795_v60 = vadd.f32 %v794_v5, %v5525_v53  ;;  %v4079_v0 = vpop.f32.mrf.mxu0  ;;  %4378 = vmatmul.mubr.msk.f32.gmra.mxu0 %vm357_vm2, %v6615_v33  ;;  %v6637_v16 = vld [vmem:[#allocation21_spill] sm:$0xff]  ;;  %v6639_v10 = vld [vmem:[#allocation26_spill] sm:$0xff] }
  0xff   : > { %v4029_v9 = vpop.f32.mrf.mxu1  ;;  %4328 = vmatmul.mubr.msk.f32.gmra.mxu1 %vm357_vm2, %v6597_v46  ;;  %4380 = vmatprep.mubr.msk.f32.mxu0 %vm357_vm2, %v5076_v12 }
 0x100   : > { %v5674_v49 = vadd.f32 %v1169_v17, %v795_v60  ;;  %v810_v61 = vadd.f32 %v4029_v9, %v5531_v1  ;;  %v1179_v29 = vpop.f32.mrf.mxu0  ;;  %4330 = vmatprep.mubr.msk.f32.mxu1 %vm357_vm2, %v6637_v16  ;;  %v6640_v60 = vld [vmem:[#allocation28_spill] sm:$0xff]  ;;  %v6641_v9 = vld [vmem:[#allocation30_spill] sm:$0xff] }
 0x101   : > { %v804_v53 = vpop.f32.mrf.mxu1 }
 0x102   : > { %v5679_v27 = vadd.f32 %v4079_v0, %v810_v61  ;;  %v805_v33 = vadd.f32 %v804_v53, %v5541_v2  ;;  %v4082_v4 = vpop.f32.mrf.mxu0  ;;  %4381 = vmatmul.mubr.msk.f32.gmra.mxu0 %vm357_vm2, %v6616_v34  ;;  %v6642_v53 = vld [vmem:[#allocation32_spill] sm:$0xff] }
 0x103   : > { %v4032_v46 = vpop.f32.mrf.mxu1  ;;  %4331 = vmatmul.mubr.msk.f32.gmra.mxu1 %vm357_vm2, %v6638_v14  ;;  %4383 = vmatprep.mubr.msk.f32.mxu0 %vm357_vm2, %v5093_v37 }
 0x104   : > { %v5688_v12 = vadd.f32 %v1179_v29, %v805_v33  ;;  %v820_v1 = vadd.f32 %v4032_v46, %v5547_v44  ;;  %v1189_v21 = vpop.f32.mrf.mxu0  ;;  %4333 = vmatprep.mubr.msk.f32.mxu1 %vm357_vm2, %v6639_v10 }
 0x105   : > { %v814_v2 = vpop.f32.mrf.mxu1 }
 0x106   : > { %v5693_v17 = vadd.f32 %v4082_v4, %v820_v1  ;;  %v815_v34 = vadd.f32 %v814_v2, %v5557_v31  ;;  %v4085_v23 = vpop.f32.mrf.mxu0  ;;  %4384 = vmatmul.mubr.msk.f32.gmra.mxu0 %vm357_vm2, %v6617_v47  ;;  %v6643_v4 = vld [vmem:[#allocation2_spill] sm:$0xff]  ;;  %v6645_v2 = vld [vmem:[#allocation5_spill] sm:$0xff] }
 0x107   : > { %v4035_v5 = vpop.f32.mrf.mxu1  ;;  %4334 = vmatmul.mubr.msk.f32.gmra.mxu1 %vm357_vm2, %v6640_v60  ;;  %4386 = vmatprep.mubr.msk.f32.mxu0 %vm357_vm2, %v5110_v28  ;;  %v6646_v60 = vld [vmem:[#allocation7_spill] sm:$0xff] }
 0x108   : > { %v5702_v37 = vadd.f32 %v1189_v21, %v815_v34  ;;  %v830_v44 = vadd.f32 %v4035_v5, %v5563_v3  ;;  %v1199_v0 = vpop.f32.mrf.mxu0  ;;  %4336 = vmatprep.mubr.msk.f32.mxu1 %vm357_vm2, %v6641_v9  ;;  %v6644_v21 = vld [vmem:[#allocation3_spill] sm:$0xff] }
 0x109   : > { %v824_v31 = vpop.f32.mrf.mxu1 }
 0x10a   : > { %v5707_v61 = vadd.f32 %v4085_v23, %v830_v44  ;;  %v825_v47 = vadd.f32 %v824_v31, %v5573_v11  ;;  %v4088_v29 = vpop.f32.mrf.mxu0  ;;  %4387 = vmatmul.mubr.msk.f32.gmra.mxu0 %vm357_vm2, %v6618_v48 }
 0x10b   : > { %v4038_v16 = vpop.f32.mrf.mxu1  ;;  %4337 = vmatmul.mubr.msk.f32.gmra.mxu1 %vm357_vm2, %v6642_v53  ;;  %4389 = vmatprep.mubr.msk.f32.mxu0 %vm357_vm2, %v5127_v45  ;;  %v6649_v53 = vld [vmem:[#allocation13_spill] sm:$0xff] }
 0x10c   : > { %v5716_v28 = vadd.f32 %v1199_v0, %v825_v47  ;;  %v840_v3 = vadd.f32 %v4038_v16, %v5581_v62  ;;  %v1209_v33 = vpop.f32.mrf.mxu0  ;;  %4339 = vmatprep.mubr.msk.f32.mxu1 %vm357_vm2, %v6643_v4  ;;  %v6647_v0 = vld [vmem:[#allocation9_spill] sm:$0xff] }
 0x10d   : > { %v834_v11 = vpop.f32.mrf.mxu1 }
 0x10e   : > { %v5721_v46 = vadd.f32 %v4088_v29, %v840_v3  ;;  %v835_v48 = vadd.f32 %v834_v11, %v5591_v51  ;;  %v4091_v14 = vpop.f32.mrf.mxu0  ;;  %4390 = vmatmul.mubr.msk.f32.gmra.mxu0 %vm357_vm2, %v6619_v55  ;;  %v6648_v29 = vld [vmem:[#allocation11_spill] sm:$0xff] }
 0x10f   : > { %v4041_v1 = vpop.f32.mrf.mxu1  ;;  %4340 = vmatmul.mubr.msk.f32.gmra.mxu1 %vm357_vm2, %v6644_v21  ;;  %4392 = vmatprep.mubr.msk.f32.mxu0 %vm357_vm2, %v5144_v26  ;;  %v6650_v11 = vld [vmem:[#allocation15_spill] sm:$0xff] }
 0x110   : > { %v5730_v62 = vadd.f32 %v1209_v33, %v835_v48  ;;  %v850_v45 = vadd.f32 %v4041_v1, %v5604_v50  ;;  %v1219_v10 = vpop.f32.mrf.mxu0  ;;  %4342 = vmatprep.mubr.msk.f32.mxu1 %vm357_vm2, %v6645_v2 }
 0x111   : > { %v844_v51 = vpop.f32.mrf.mxu1 }
 0x112   : > { %v5735_v34 = vadd.f32 %v4091_v14, %v850_v45  ;;  %v845_v55 = vadd.f32 %v844_v51, %v5617_v52  ;;  %v4094_v23 = vpop.f32.mrf.mxu0  ;;  %4393 = vmatmul.mubr.msk.f32.gmra.mxu0 %vm357_vm2, %v6620_v19  ;;  %v6651_v14 = vld [vmem:[#allocation17_spill] sm:$0xff]  ;;  %v6653_v51 = vld [vmem:[#allocation22_spill] sm:$0xff] }
 0x113   : > { %v4044_v5 = vpop.f32.mrf.mxu1  ;;  %4343 = vmatmul.mubr.msk.f32.gmra.mxu1 %vm357_vm2, %v6646_v60  ;;  %4395 = vmatprep.mubr.msk.f32.mxu0 %vm357_vm2, %v5161_v42  ;;  %v6654_v60 = vld [vmem:[#allocation25_spill] sm:$0xff] }
 0x114   : > { %v5744_v26 = vadd.f32 %v1219_v10, %v845_v55  ;;  %v860_v50 = vadd.f32 %v4044_v5, %v5626_v41  ;;  %v1229_v44 = vpop.f32.mrf.mxu0  ;;  %4345 = vmatprep.mubr.msk.f32.mxu1 %vm357_vm2, %v6647_v0  ;;  %v6652_v10 = vld [vmem:[#allocation20_spill] sm:$0xff] }
 0x115   : > { %v854_v52 = vpop.f32.mrf.mxu1 }
 0x116   : > { %v5749_v9 = vadd.f32 %v4094_v23, %v860_v50  ;;  %v855_v19 = vadd.f32 %v854_v52, %v5636_v15  ;;  %v4097_v31 = vpop.f32.mrf.mxu0  ;;  %4396 = vmatmul.mubr.msk.f32.gmra.mxu0 %vm357_vm2, %v6621_v25 }
 0x117   : > { %v4047_v47 = vpop.f32.mrf.mxu1  ;;  %4346 = vmatmul.mubr.msk.f32.gmra.mxu1 %vm357_vm2, %v6648_v29  ;;  %4398 = vmatprep.mubr.msk.f32.mxu0 %vm357_vm2, %v6622_v30  ;;  %v6657_v29 = vld [vmem:[#allocation6_spill] sm:$0xff] }
 0x118   : > { %v5758_v42 = vadd.f32 %v1229_v44, %v855_v19  ;;  %v870_v41 = vadd.f32 %v4047_v47, %v5503_v8  ;;  %v1239_v16 = vpop.f32.mrf.mxu0  ;;  %4348 = vmatprep.mubr.msk.f32.mxu1 %vm357_vm2, %v6649_v53  ;;  %v6655_v44 = vld [vmem:[#allocation27_spill] sm:$0xff]  ;;  %v2430_v53 = vrot.slane %v5596_v36, 1 }
 0x119   : > { %v864_v15 = vpop.f32.mrf.mxu1 }
 0x11a   : > { %v5763_v3 = vadd.f32 %v4097_v31, %v870_v41  ;;  %v865_v25 = vadd.f32 %v864_v15, %v5513_v35  ;;  %v4100_v33 = vpop.f32.mrf.mxu0  ;;  %4399 = vmatmul.mubr.msk.f32.gmra.mxu0 %vm357_vm2, %v6623_v24  ;;  %v2702_v31 = vrot.slane %v5615_v32, 2  ;;  %v2431_v15 = vrot.slane %v5615_v32, 1  ;;  %v6663_v32 = vld [vmem:[#allocation10_spill] sm:$0xff] }
 0x11b   : > { %v4050_v4 = vpop.f32.mrf.mxu1  ;;  %4349 = vmatmul.mubr.msk.f32.gmra.mxu1 %vm357_vm2, %v6650_v11  ;;  %4401 = vmatprep.mubr.msk.f32.mxu0 %vm357_vm2, %v6624_v40 }
 0x11c   : > { %v5772_v8 = vadd.f32 %v1239_v16, %v865_v25  ;;  %v880_v30 = vadd.f32 %v4050_v4, %v5519_v39  ;;  %v1249_v48 = vpop.f32.mrf.mxu0  ;;  %4351 = vmatprep.mubr.msk.f32.mxu1 %vm357_vm2, %v6651_v14  ;;  %v6658_v16 = vld [vmem:[#allocation31_spill] sm:$0xff]  ;;  %v6661_v14 = vld [vmem:[#allocation33_spill] sm:$0xff] }
 0x11d   : > { %v874_v35 = vpop.f32.mrf.mxu1 }
 0x11e   : > { %v5777_v1 = vadd.f32 %v4100_v33, %v880_v30  ;;  %v875_v24 = vadd.f32 %v874_v35, %v5529_v59  ;;  %v4103_v21 = vpop.f32.mrf.mxu0  ;;  %4402 = vmatmul.mubr.msk.f32.gmra.mxu0 %vm357_vm2, %v6625_v22  ;;  %v6660_v30 = vld [vmem:[#allocation18_spill] sm:$0xff] }
 0x11f   : > { %v4053_v45 = vpop.f32.mrf.mxu1  ;;  %4352 = vmatmul.mubr.msk.f32.gmra.mxu1 %vm357_vm2, %v6652_v10  ;;  %4404 = vmatprep.mubr.msk.f32.mxu0 %vm357_vm2, %v5212_v38  ;;  %v6662_v35 = vld [vmem:[#allocation14_spill] sm:$0xff]  ;;  %v6664_v10 = vld [vmem:[#allocation23_spill] sm:$0xff] }
 0x120   : > { %v5786_v39 = vadd.f32 %v1249_v48, %v875_v24  ;;  %v890_v40 = vadd.f32 %v4053_v45, %v5535_v54  ;;  %v1259_v2 = vpop.f32.mrf.mxu0  ;;  %4354 = vmatprep.mubr.msk.f32.mxu1 %vm357_vm2, %v6653_v51 }
 0x121   : > { %v884_v59 = vpop.f32.mrf.mxu1 }
 0x122   : > { %v5791_v55 = vadd.f32 %v4103_v21, %v890_v40  ;;  %v885_v22 = vadd.f32 %v884_v59, %v5545_v7  ;;  %v4106_v23 = vpop.f32.mrf.mxu0  ;;  %4405 = vmatmul.mubr.msk.f32.gmra.mxu0 %vm357_vm2, %v5223_v58  ;;  %v2432_v59 = vsel %vm274_vm1, %v2430_v53, %v2431_v15 }
 0x123   : > { %v4056_v5 = vpop.f32.mrf.mxu1  ;;  %4355 = vmatmul.mubr.msk.f32.gmra.mxu1 %vm357_vm2, %v6654_v60  ;;  %4407 = vmatprep.mubr.msk.f32.mxu0 %vm357_vm2, %v5229_v56  ;;  %v6656_v56 = vld [vmem:[#allocation29_spill] sm:$0xff] }
 0x124   : > { %v5800_v38 = vadd.f32 %v1259_v2, %v885_v22  ;;  %v900_v54 = vadd.f32 %v4056_v5, %v5551_v6  ;;  %v1269_v50 = vpop.f32.mrf.mxu0  ;;  %4357 = vmatprep.mubr.msk.f32.mxu1 %vm357_vm2, %v6655_v44  ;;  %v2701_v6 = vrot.slane %v5596_v36, 2  ;;  %v6667_v44 = vld [vmem:[#allocation4_spill] sm:$0xff] }
 0x125   : > { %v894_v7 = vpop.f32.mrf.mxu1 }
 0x126   : > { %v5805_v0 = vadd.f32 %v4106_v23, %v900_v54  ;;  %v895_v58 = vadd.f32 %v894_v7, %v5561_v18  ;;  %v4109_v52 = vpop.f32.mrf.mxu0  ;;  %4408 = vmatmul.mubr.msk.f32.gmra.mxu0 %vm357_vm2, %v5240_v63  ;;  %v224_v63 = vld [vmem:[%s4615_s23 + $0x1a8] sm:$0x3]  ;;  %v2703_v40 = vsel %vm943_vm3, %v2701_v6, %v2702_v31  ;;  %v6665_v23 = vld [vmem:[#allocation12_spill] sm:$0xff]  ;;  %v6666_v54 = vld [vmem:[#allocation34_spill] sm:$0xff] }
 0x127   : > { %v4059_v19 = vpop.f32.mrf.mxu1  ;;  %4358 = vmatmul.mubr.msk.f32.gmra.mxu1 %vm357_vm2, %v6656_v56  ;;  %4410 = vmatprep.mubr.msk.f32.mxu0 %vm357_vm2, %v5246_v13  ;;  %v6659_v13 = vld [vmem:[#allocation8_spill] sm:$0xff]  ;;  %v2704_v24 = vrot.slane %v224_v63, 2  ;;  %v2433_v2 = vrot.slane %v224_v63, 1 }
 0x128   : > { %v5816_v47 = vadd.f32 %v1269_v50, %v895_v58  ;;  %v910_v41 = vadd.f32 %v4059_v19, %v6657_v29  ;;  %v1279_v18 = vpop.f32.mrf.mxu0  ;;  %4360 = vmatprep.mubr.msk.f32.mxu1 %vm357_vm2, %v6658_v16 }
 0x129   : > { %v904_v25 = vpop.f32.mrf.mxu1  ;;  %v2705_v7 = vsel %vm943_vm3, %v2702_v31, %v2704_v24  ;;  %v2434_v6 = vsel %vm274_vm1, %v2431_v15, %v2433_v2  ;;  %v6671_v15 = vld [vmem:[#allocation37_spill] sm:$0xff] }
 0x12a   : > { %v5824_v33 = vadd.f32 %v4109_v52, %v910_v41  ;;  %v905_v4 = vadd.f32 %v904_v25, %v6659_v13  ;;  %v4112_v11 = vpop.f32.mrf.mxu0  ;;  %4411 = vmatmul.mubr.msk.f32.gmra.mxu0 %vm357_vm2, %v6660_v30  ;;  %v6668_v52 = vld [vmem:[#allocation19_spill] sm:$0xff]  ;;  %v6670_v25 = vld [vmem:[#allocation36_spill] sm:$0xff] }
 0x12b   : > { %v4062_v48 = vpop.f32.mrf.mxu1  ;;  %4361 = vmatmul.mubr.msk.f32.gmra.mxu1 %vm357_vm2, %v6661_v14  ;;  %4413 = vmatprep.mubr.msk.f32.mxu0 %vm357_vm2, %v6662_v35 }
 0x12c   : > { %v5833_v36 = vadd.f32 %v1279_v18, %v905_v4  ;;  %v920_v21 = vadd.f32 %v4062_v48, %v6663_v32  ;;  %v1289_v45 = vpop.f32.mrf.mxu0  ;;  %4363 = vmatprep.mubr.msk.f32.mxu1 %vm357_vm2, %v6664_v10  ;;  %v6669_v18 = vld [vmem:[#allocation35_spill] sm:$0xff] }
 0x12d   : > { %v914_v51 = vpop.f32.mrf.mxu1 }
 0x12e   : > { %v5840_v22 = vadd.f32 %v4112_v11, %v920_v21  ;;  %v915_v5 = vadd.f32 %v914_v51, %v6665_v23  ;;  %v4115_v60 = vpop.f32.mrf.mxu0  ;;  %4414 = vmatmul.mubr.msk.f32.gmra.mxu0 %vm357_vm2, %v6666_v54 }
 0x12f   : > { %v4065_v50 = vpop.f32.mrf.mxu1  ;;  %4364 = vmatmul.mubr.msk.f32.gmra.mxu1 %vm357_vm2, %v6667_v44  ;;  %4416 = vmatprep.mubr.msk.f32.mxu0 %vm357_vm2, %v2703_v40 }
 0x130   : > { %v5849_v58 = vadd.f32 %v1289_v45, %v915_v5  ;;  %v930_v19 = vadd.f32 %v4065_v50, %v6668_v52  ;;  %v1299_v56 = vpop.f32.mrf.mxu0  ;;  %4366 = vmatprep.mubr.msk.f32.mxu1 %vm357_vm2, %v2432_v59 }
 0x131   : > { %v924_v29 = vpop.f32.mrf.mxu1 }
 0x132   : > { %v5854_v41 = vadd.f32 %v4115_v60, %v930_v19  ;;  %v925_v16 = vadd.f32 %v924_v29, %v6669_v18  ;;  %v4118_v63 = vpop.f32.mrf.mxu0  ;;  %4417 = vmatmul.mubr.msk.f32.gmra.mxu0 %vm357_vm2, %v2705_v7 }
 0x133   : > { %v4068_v53 = vpop.f32.mrf.mxu1  ;;  %4367 = vmatmul.mubr.msk.f32.gmra.mxu1 %vm357_vm2, %v2434_v6 }
 0x134   : > { %v5859_v31 = vadd.f32 %v1299_v56, %v925_v16  ;;  %v940_v13 = vadd.f32 %v4068_v53, %v6670_v25  ;;  %v1309_v4 = vpop.f32.mrf.mxu0 }
 0x135   : > { %v934_v11 = vpop.f32.mrf.mxu1 }
 0x136   : > { %v5862_v30 = vadd.f32 %v4118_v63, %v940_v13  ;;  %v935_v48 = vadd.f32 %v934_v11, %v6671_v15  ;;  %v4173_v14 = vpop.f32.mrf.mxu0 }
 0x137   : > { %v4123_v35 = vpop.f32.mrf.mxu1 }
 0x138   : > { %v5865_v24 = vadd.f32 %v1309_v4, %v935_v48  ;;  %v1587_v32 = vadd.f32 %v4123_v35, %v5651_v57  ;;  %v1699_v21 = vpop.f32.mrf.mxu0 }
 0x139   : > { %v1427_v45 = vpop.f32.mrf.mxu1 }
 0x13a   : > { %v5868_v10 = vadd.f32 %v4173_v14, %v1587_v32  ;;  %v1586_v40 = vadd.f32 %v1427_v45, %v5660_v43  ;;  %v4176_v2 = vpop.f32.mrf.mxu0 }
 0x13b   : > { %v4126_v51 = vpop.f32.mrf.mxu1 }
 0x13c   : > { %v5871_v59 = vadd.f32 %v1699_v21, %v1586_v40  ;;  %v1589_v23 = vadd.f32 %v4126_v51, %v5665_v20  ;;  %v1709_v5 = vpop.f32.mrf.mxu0 }
 0x13d   : > { %v1437_v60 = vpop.f32.mrf.mxu1 }
 0x13e   : > { %v5874_v54 = vadd.f32 %v4176_v2, %v1589_v23  ;;  %v1588_v50 = vadd.f32 %v1437_v60, %v5674_v49  ;;  %v4179_v44 = vpop.f32.mrf.mxu0 }
 0x13f   : > { %v4129_v57 = vpop.f32.mrf.mxu1 }
 0x140   : > { %v5877_v7 = vadd.f32 %v1709_v5, %v1588_v50  ;;  %v1591_v52 = vadd.f32 %v4129_v57, %v5679_v27  ;;  %v1719_v19 = vpop.f32.mrf.mxu0 }
 0x141   : > { %v1447_v43 = vpop.f32.mrf.mxu1 }
 0x142   : > { %v5880_v56 = vadd.f32 %v4179_v44, %v1591_v52  ;;  %v1590_v6 = vadd.f32 %v1447_v43, %v5688_v12  ;;  %v4182_v29 = vpop.f32.mrf.mxu0 }
 0x143   : > { %v4132_v20 = vpop.f32.mrf.mxu1 }
 0x144   : > { %v5883_v18 = vadd.f32 %v1719_v19, %v1590_v6  ;;  %v1593_v16 = vadd.f32 %v4132_v20, %v5693_v17  ;;  %v1729_v63 = vpop.f32.mrf.mxu0 }
 0x145   : > { %v1457_v49 = vpop.f32.mrf.mxu1 }
 0x146   : > { %v5886_v53 = vadd.f32 %v4182_v29, %v1593_v16  ;;  %v1592_v25 = vadd.f32 %v1457_v49, %v5702_v37  ;;  %v4185_v13 = vpop.f32.mrf.mxu0 }
 0x147   : > { %v4135_v27 = vpop.f32.mrf.mxu1 }
 0x148   : > { %v5889_v4 = vadd.f32 %v1729_v63, %v1592_v25  ;;  %v1595_v11 = vadd.f32 %v4135_v27, %v5707_v61  ;;  %v1739_v15 = vpop.f32.mrf.mxu0 }
 0x149   : > { %v1467_v12 = vpop.f32.mrf.mxu1 }
 0x14a   : > { %v5892_v48 = vadd.f32 %v4185_v13, %v1595_v11  ;;  %v1594_v14 = vadd.f32 %v1467_v12, %v5716_v28  ;;  %v4188_v35 = vpop.f32.mrf.mxu0 }
 0x14b   : > { %v4138_v17 = vpop.f32.mrf.mxu1 }
 0x14c   : > { %v5895_v32 = vadd.f32 %v1739_v15, %v1594_v14  ;;  %v1597_v21 = vadd.f32 %v4138_v17, %v5721_v46  ;;  %v1749_v45 = vpop.f32.mrf.mxu0 }
 0x14d   : > { %v1477_v37 = vpop.f32.mrf.mxu1 }
 0x14e   : > { %v5898_v40 = vadd.f32 %v4188_v35, %v1597_v21  ;;  %v1596_v2 = vadd.f32 %v1477_v37, %v5730_v62  ;;  %v4191_v51 = vpop.f32.mrf.mxu0 }
 0x14f   : > { %v4141_v61 = vpop.f32.mrf.mxu1 }
 0x150   : > { %v5901_v23 = vadd.f32 %v1749_v45, %v1596_v2  ;;  %v1599_v5 = vadd.f32 %v4141_v61, %v5735_v34  ;;  %v1759_v60 = vpop.f32.mrf.mxu0 }
 0x151   : > { %v1487_v28 = vpop.f32.mrf.mxu1 }
 0x152   : > { %v5904_v50 = vadd.f32 %v4191_v51, %v1599_v5  ;;  %v1598_v44 = vadd.f32 %v1487_v28, %v5744_v26  ;;  %v4194_v57 = vpop.f32.mrf.mxu0 }
 0x153   : > { %v4144_v46 = vpop.f32.mrf.mxu1 }
 0x154   : > { %v5907_v52 = vadd.f32 %v1759_v60, %v1598_v44  ;;  %v1601_v19 = vadd.f32 %v4144_v46, %v5749_v9  ;;  %v1769_v43 = vpop.f32.mrf.mxu0 }
 0x155   : > { %v1497_v62 = vpop.f32.mrf.mxu1 }
 0x156   : > { %v5910_v6 = vadd.f32 %v4194_v57, %v1601_v19  ;;  %v1600_v29 = vadd.f32 %v1497_v62, %v5758_v42  ;;  %v4197_v20 = vpop.f32.mrf.mxu0 }
 0x157   : > { %v4147_v34 = vpop.f32.mrf.mxu1 }
 0x158   : > { %v5913_v16 = vadd.f32 %v1769_v43, %v1600_v29  ;;  %v1603_v63 = vadd.f32 %v4147_v34, %v5763_v3  ;;  %v1779_v49 = vpop.f32.mrf.mxu0 }
 0x159   : > { %v1507_v26 = vpop.f32.mrf.mxu1 }
 0x15a   : > { %v5916_v25 = vadd.f32 %v4197_v20, %v1603_v63  ;;  %v1602_v13 = vadd.f32 %v1507_v26, %v5772_v8  ;;  %v4200_v27 = vpop.f32.mrf.mxu0 }
 0x15b   : > { %v4150_v9 = vpop.f32.mrf.mxu1 }
 0x15c   : > { %v5919_v11 = vadd.f32 %v1779_v49, %v1602_v13  ;;  %v1605_v15 = vadd.f32 %v4150_v9, %v5777_v1  ;;  %v1789_v12 = vpop.f32.mrf.mxu0 }
 0x15d   : > { %v1517_v42 = vpop.f32.mrf.mxu1 }
 0x15e   : > { %v5922_v14 = vadd.f32 %v4200_v27, %v1605_v15  ;;  %v1604_v35 = vadd.f32 %v1517_v42, %v5786_v39  ;;  %v4203_v17 = vpop.f32.mrf.mxu0 }
 0x15f   : > { %v4153_v3 = vpop.f32.mrf.mxu1 }
 0x160   : > { %v5925_v21 = vadd.f32 %v1789_v12, %v1604_v35  ;;  %v1607_v45 = vadd.f32 %v4153_v3, %v5791_v55  ;;  %v1799_v37 = vpop.f32.mrf.mxu0 }
 0x161   : > { %v1527_v8 = vpop.f32.mrf.mxu1 }
 0x162   : > { %6672 = vst [vmem:[#allocation38_spill] sm:$0xff] %v5925_v21  ;;  %v5928_v2 = vadd.f32 %v4203_v17, %v1607_v45  ;;  %v1606_v51 = vadd.f32 %v1527_v8, %v5800_v38  ;;  %v4206_v61 = vpop.f32.mrf.mxu0 }
 0x163   : > { %v4156_v1 = vpop.f32.mrf.mxu1 }
 0x164   : > { %6673 = vst [vmem:[#allocation39_spill] sm:$0xff] %v5928_v2  ;;  %v5931_v5 = vadd.f32 %v1799_v37, %v1606_v51  ;;  %v1609_v60 = vadd.f32 %v4156_v1, %v5805_v0  ;;  %v1809_v28 = vpop.f32.mrf.mxu0 }
 0x165   : > { %v1537_v39 = vpop.f32.mrf.mxu1 }
 0x166   : > { %6674 = vst [vmem:[#allocation40_spill] sm:$0xff] %v5931_v5  ;;  %v5934_v44 = vadd.f32 %v4206_v61, %v1609_v60  ;;  %v1608_v57 = vadd.f32 %v1537_v39, %v5816_v47  ;;  %v4209_v46 = vpop.f32.mrf.mxu0 }
 0x167   : > { %v4159_v55 = vpop.f32.mrf.mxu1 }
 0x168   : > { %6675 = vst [vmem:[#allocation41_spill] sm:$0xff] %v5934_v44  ;;  %v5937_v19 = vadd.f32 %v1809_v28, %v1608_v57  ;;  %v1611_v43 = vadd.f32 %v4159_v55, %v5824_v33  ;;  %v1819_v62 = vpop.f32.mrf.mxu0 }
 0x169   : > { %v1547_v38 = vpop.f32.mrf.mxu1 }
 0x16a   : > { %6676 = vst [vmem:[#allocation42_spill] sm:$0xff] %v5937_v19  ;;  %v5940_v29 = vadd.f32 %v4209_v46, %v1611_v43  ;;  %v1610_v20 = vadd.f32 %v1547_v38, %v5833_v36  ;;  %v4212_v34 = vpop.f32.mrf.mxu0 }
 0x16b   : > { %v4162_v0 = vpop.f32.mrf.mxu1 }
 0x16c   : > { %6677 = vst [vmem:[#allocation43_spill] sm:$0xff] %v5940_v29  ;;  %v5943_v63 = vadd.f32 %v1819_v62, %v1610_v20  ;;  %v1613_v49 = vadd.f32 %v4162_v0, %v5840_v22  ;;  %v1829_v26 = vpop.f32.mrf.mxu0 }
 0x16d   : > { %v1557_v47 = vpop.f32.mrf.mxu1 }
 0x16e   : > { %6678 = vst [vmem:[#allocation44_spill] sm:$0xff] %v5943_v63  ;;  %v5946_v13 = vadd.f32 %v4212_v34, %v1613_v49  ;;  %v1612_v27 = vadd.f32 %v1557_v47, %v5849_v58  ;;  %v4215_v9 = vpop.f32.mrf.mxu0 }
 0x16f   : > { %v4165_v33 = vpop.f32.mrf.mxu1 }
 0x170   : > { %6679 = vst [vmem:[#allocation16_spill] sm:$0xff] %v5946_v13  ;;  %v5949_v15 = vadd.f32 %v1829_v26, %v1612_v27  ;;  %v1615_v12 = vadd.f32 %v4165_v33, %v5854_v41  ;;  %v1839_v42 = vpop.f32.mrf.mxu0 }
 0x171   : > { %v1567_v36 = vpop.f32.mrf.mxu1 }
 0x172   : > { %6680 = vst [vmem:[#allocation21_spill] sm:$0xff] %v5949_v15  ;;  %v5952_v35 = vadd.f32 %v4215_v9, %v1615_v12  ;;  %v1614_v17 = vadd.f32 %v1567_v36, %v5859_v31  ;;  %v4218_v3 = vpop.f32.mrf.mxu0 }
 0x173   : > { %v4168_v22 = vpop.f32.mrf.mxu1 }
 0x174   : > { %6681 = vst [vmem:[#allocation24_spill] sm:$0xff] %v5952_v35  ;;  %v5955_v45 = vadd.f32 %v1839_v42, %v1614_v17  ;;  %v1617_v37 = vadd.f32 %v4168_v22, %v5862_v30  ;;  %v1849_v8 = vpop.f32.mrf.mxu0 }
 0x175   : > { %v1577_v58 = vpop.f32.mrf.mxu1 }
 0x176   : > { %6682 = vst [vmem:[#allocation26_spill] sm:$0xff] %v5955_v45  ;;  %v5958_v51 = vadd.f32 %v4218_v3, %v1617_v37  ;;  %v1616_v61 = vadd.f32 %v1577_v58, %v5865_v24  ;;  %v5961_v1 = vpop.f32.mrf.mxu0 }
 0x177   : > { %v4223_v41 = vpop.f32.mrf.mxu1 }
 0x178   : > { %6683 = vst [vmem:[#allocation28_spill] sm:$0xff] %v5958_v51  ;;  %v5963_v60 = vadd.f32 %v1849_v8, %v1616_v61  ;;  %v5965_v28 = vpop.f32.mrf.mxu0 }
 0x179   : > { %v1970_v31 = vpop.f32.mrf.mxu1 }
 0x17a   : > { %v5967_v39 = vpop.f32.mrf.mxu0 }
 0x17b   : > { %v4226_v57 = vpop.f32.mrf.mxu1 }
 0x17c   : > { %v5969_v46 = vpop.f32.mrf.mxu0 }
 0x17d   : > { %v1980_v30 = vpop.f32.mrf.mxu1 }
 0x17e   : > { %v5971_v55 = vpop.f32.mrf.mxu0 }
 0x17f   : > { %v4229_v43 = vpop.f32.mrf.mxu1 }
 0x180   : > { %v5973_v62 = vpop.f32.mrf.mxu0 }
 0x181   : > { %v1990_v24 = vpop.f32.mrf.mxu1 }
 0x182   : > { %v5975_v38 = vpop.f32.mrf.mxu0 }
 0x183   : > { %v4232_v20 = vpop.f32.mrf.mxu1 }
 0x184   : > { %v5977_v34 = vpop.f32.mrf.mxu0 }
 0x185   : > { %v2000_v0 = vpop.f32.mrf.mxu1 }
 0x186   : > { %v5979_v49 = vpop.f32.mrf.mxu0 }
 0x187   : > { %v5981_v26 = vpop.f32.mrf.mxu1 }
 0x188   : > { %v5983_v47 = vpop.f32.mrf.mxu0 }
 0x189   : > { %v5985_v27 = vpop.f32.mrf.mxu1 }
 0x18a   : > { %v5987_v9 = vpop.f32.mrf.mxu0 }
 0x18b   : > { %v4238_v33 = vpop.f32.mrf.mxu1 }
 0x18c   : > { %v5989_v12 = vpop.f32.mrf.mxu0 }
 0x18d   : > { %v2020_v42 = vpop.f32.mrf.mxu1 }
 0x18e   : > { %v5991_v36 = vpop.f32.mrf.mxu0 }
 0x18f   : > { %v5993_v17 = vpop.f32.mrf.mxu1 }
 0x190   : > { %v5995_v3 = vpop.f32.mrf.mxu0 }
 0x191   : > { %v5997_v22 = vpop.f32.mrf.mxu1 }
 0x192   : > { %v5999_v37 = vpop.f32.mrf.mxu0 }
 0x193   : > { %6684 = vst [vmem:[#allocation30_spill] sm:$0xff] %v5999_v37  ;;  %v6001_v8 = vpop.f32.mrf.mxu1 }
 0x194   : > { %v6003_v58 = vpop.f32.mrf.mxu0 }
 0x195   : > { %6685 = vst [vmem:[#allocation32_spill] sm:$0xff] %v6003_v58  ;;  %v6005_v61 = vpop.f32.mrf.mxu1 }
 0x196   : > { %v6007_v51 = vpop.f32.mrf.mxu0 }
 0x197   : > { %6686 = vst [vmem:[#allocation2_spill] sm:$0xff] %v6007_v51  ;;  %v6009_v45 = vpop.f32.mrf.mxu1 }
 0x198   : > { %v6011_v35 = vpop.f32.mrf.mxu0 }
 0x199   : > { %6687 = vst [vmem:[#allocation3_spill] sm:$0xff] %v6011_v35  ;;  %v6013_v15 = vpop.f32.mrf.mxu1 }
 0x19a   : > { %v6015_v13 = vpop.f32.mrf.mxu0 }
 0x19b   : > { %6688 = vst [vmem:[#allocation5_spill] sm:$0xff] %v6015_v13  ;;  %v6017_v63 = vpop.f32.mrf.mxu1 }
 0x19c   : > { %6689 = vst [vmem:[#allocation7_spill] sm:$0xff] %v6017_v63  ;;  %v6019_v29 = vpop.f32.mrf.mxu0 }
 0x19d   : > { %6690 = vst [vmem:[#allocation9_spill] sm:$0xff] %v6019_v29  ;;  %v6021_v19 = vpop.f32.mrf.mxu1 }
 0x19e   : > { %6691 = vst [vmem:[#allocation11_spill] sm:$0xff] %v6021_v19  ;;  %v6023_v44 = vpop.f32.mrf.mxu0 }
 0x19f   : > { %6692 = vst [vmem:[#allocation13_spill] sm:$0xff] %v6023_v44  ;;  %v6025_v5 = vpop.f32.mrf.mxu1 }
 0x1a0   : > { %6693 = vst [vmem:[#allocation15_spill] sm:$0xff] %v6025_v5  ;;  %v6027_v2 = vpop.f32.mrf.mxu0 }
 0x1a1   : > { %6694 = vst [vmem:[#allocation17_spill] sm:$0xff] %v6027_v2  ;;  %v6029_v51 = vpop.f32.mrf.mxu1 }
 0x1a2   : > { %6695 = vst [vmem:[#allocation20_spill] sm:$0xff] %v6029_v51  ;;  %v6031_v21 = vpop.f32.mrf.mxu0 }
 0x1a3   : > { %6696 = vst [vmem:[#allocation22_spill] sm:$0xff] %v6031_v21  ;;  %v6033_v35 = vpop.f32.mrf.mxu1 }
 0x1a4   : > { %6697 = vst [vmem:[#allocation25_spill] sm:$0xff] %v6033_v35  ;;  %v6035_v58 = vpop.f32.mrf.mxu0 }
 0x1a5   : > { %6698 = vst [vmem:[#allocation27_spill] sm:$0xff] %v6035_v58  ;;  %v6037_v13 = vpop.f32.mrf.mxu1 }
 0x1a6   : > { %6699 = vst [vmem:[#allocation29_spill] sm:$0xff] %v6037_v13  ;;  %v6039_v37 = vpop.f32.mrf.mxu0 }
 0x1a7   : > { %6700 = vst [vmem:[#allocation6_spill] sm:$0xff] %v6039_v37  ;;  %v6041_v29 = vpop.f32.mrf.mxu1 }
 0x1a8   : > { %6701 = vst [vmem:[#allocation31_spill] sm:$0xff] %v6041_v29  ;;  %v6043_v19 = vpop.f32.mrf.mxu0 }
 0x1a9   : > { %6702 = vst [vmem:[#allocation8_spill] sm:$0xff] %v6043_v19  ;;  %v6045_v44 = vpop.f32.mrf.mxu1  ;;  %v2130_v19 = vadd.f32 %v4223_v41, %v5868_v10  ;;  %v2133_v41 = vadd.f32 %v1990_v24, %v5883_v18  ;;  %v2139_v18 = vadd.f32 %v2020_v42, %v5901_v23  ;;  %v2141_v23 = vadd.f32 %v5997_v22, %v5907_v52 }
 0x1aa   : > { %6703 = vst [vmem:[#allocation18_spill] sm:$0xff] %v6045_v44  ;;  %v6047_v5 = vpop.f32.mrf.mxu0 }
 0x1ab   : > { %6704 = vst [vmem:[#allocation33_spill] sm:$0xff] %v6047_v5  ;;  %v6049_v2 = vpop.f32.mrf.mxu1  ;;  %v2129_v5 = vadd.f32 %v1970_v31, %v5871_v59  ;;  %v2136_v59 = vadd.f32 %v4232_v20, %v5886_v53  ;;  %v6090_v53 = vld [vmem:[%s6460_s2] ss:$0 sm:$0xff] }
 0x1ac   : > { %6705 = vst [vmem:[#allocation14_spill] sm:$0xff] %v6049_v2  ;;  %v6051_v51 = vpop.f32.mrf.mxu0 }
 0x1ad   : > { %6706 = vst [vmem:[#allocation10_spill] sm:$0xff] %v6051_v51  ;;  %v6053_v21 = vpop.f32.mrf.mxu1  ;;  %v2132_v51 = vadd.f32 %v4226_v57, %v5874_v54  ;;  %v2397_v10 = vadd.f32 %v5965_v28, %v2129_v5  ;;  %v2135_v57 = vadd.f32 %v2000_v0, %v5889_v4  ;;  %v2140_v5 = vadd.f32 %v4238_v33, %v5898_v40 }
 0x1ae   : > { %6707 = vst [vmem:[#allocation23_spill] sm:$0xff] %v6053_v21  ;;  %v6055_v35 = vpop.f32.mrf.mxu0  ;;  %v2142_v40 = vadd.f32 %v5993_v17, %v5904_v50  ;;  %v6112_v50 = vadd.f32 %v5989_v12, %v2139_v18  ;;  %v6719_v18 = vld [vmem:[#allocation3_spill] sm:$0xff] }
 0x1af   : > { %6708 = vst [vmem:[#allocation12_spill] sm:$0xff] %v6055_v35  ;;  %v6057_v58 = vpop.f32.mrf.mxu1  ;;  %v2398_v35 = vadd.f32 %v5961_v1, %v2130_v19  ;;  %v2400_v54 = vadd.f32 %v5967_v39, %v2132_v51  ;;  %v2403_v39 = vadd.f32 %v5977_v34, %v2135_v57 }
 0x1b0   : > { %6709 = vst [vmem:[#allocation34_spill] sm:$0xff] %v6057_v58  ;;  %v6059_v13 = vpop.f32.mrf.mxu0  ;;  %v2131_v58 = vadd.f32 %v1980_v30, %v5877_v7 }
 0x1b1   : > { %6710 = vst [vmem:[#allocation4_spill] sm:$0xff] %v6059_v13  ;;  %v6061_v37 = vpop.f32.mrf.mxu1  ;;  %v2134_v13 = vadd.f32 %v4229_v43, %v5880_v56  ;;  %v2138_v56 = vadd.f32 %v5981_v26, %v5892_v48  ;;  %v6122_v26 = vadd.f32 %v5995_v3, %v2141_v23  ;;  %v2145_v3 = vadd.f32 %v6013_v15, %v5919_v11  ;;  %v6716_v11 = vld [vmem:[#allocation38_spill] sm:$0xff]  ;;  %v6717_v15 = vld [vmem:[#allocation11_spill] sm:$0xff]  ;;  %v6721_v23 = vld [vmem:[#allocation9_spill] sm:$0xff] }
 0x1b2   : > { %6711 = vst [vmem:[#allocation19_spill] sm:$0xff] %v6061_v37  ;;  %v6064_v29 = vpop.f32.mrf.mxu0 }
 0x1b3   : > { %6712 = vst [vmem:[#allocation35_spill] sm:$0xff] %v6064_v29  ;;  %v6067_v44 = vpop.f32.mrf.mxu1 }
 0x1b4   : > { %v2388_v2 = vpop.f32.mrf.mxu0 }
 0x1b5   : > { %v2120_v21 = vpop.f32.mrf.mxu1 }
 0x1b6   : > { %v2159_v37 = vadd.f32 %v2120_v21, %v5963_v60  ;;  %v4373_v63 = vpop.f32.mrf.mxu0  ;;  %v2137_v21 = vadd.f32 %v5985_v27, %v5895_v32  ;;  %v2401_v60 = vadd.f32 %v5973_v62, %v2133_v41  ;;  %v2404_v32 = vadd.f32 %v5975_v38, %v2136_v59  ;;  %v6714_v41 = vld [vmem:[#allocation30_spill] sm:$0xff] }
 0x1b7   : > { %v4323_v31 = vpop.f32.mrf.mxu1  ;;  %v6109_v62 = vadd.f32 %v5987_v9, %v2140_v5  ;;  %v2143_v27 = vadd.f32 %v6005_v61, %v5913_v16 }
 0x1b8   : > { %v6079_v29 = vadd.f32 %v2388_v2, %v2159_v37  ;;  %v2670_v19 = vadd.f32 %v4323_v31, %v2398_v35  ;;  %v2781_v7 = vpop.f32.mrf.mxu0  ;;  %v2399_v2 = vadd.f32 %v5969_v46, %v2131_v58  ;;  %v2402_v35 = vadd.f32 %v5971_v55, %v2134_v13 }
 0x1b9   : > { %v2510_v4 = vpop.f32.mrf.mxu1  ;;  %v2406_v55 = vadd.f32 %v5979_v49, %v2138_v56  ;;  %v6106_v43 = vadd.f32 %v5983_v47, %v2137_v21  ;;  %v6119_v49 = vadd.f32 %v5991_v36, %v2142_v40  ;;  %v2144_v47 = vadd.f32 %v6001_v8, %v5910_v6  ;;  %v6713_v6 = vld [vmem:[#allocation7_spill] sm:$0xff]  ;;  %v6718_v21 = vld [vmem:[#allocation2_spill] sm:$0xff] }
 0x1ba   : > { %v2941_v51 = vadd.f32 %v4373_v63, %v2670_v19  ;;  %v2669_v1 = vadd.f32 %v2510_v4, %v2397_v10  ;;  %v4376_v48 = vpop.f32.mrf.mxu0  ;;  %v2146_v36 = vadd.f32 %v6009_v45, %v5916_v25  ;;  %v2148_v22 = vadd.f32 %v6713_v6, %v5922_v14  ;;  %v6715_v25 = vld [vmem:[#allocation32_spill] sm:$0xff]  ;;  %v6729_v6 = vld [vmem:[#allocation29_spill] sm:$0xff] }
 0x1bb   : > { %v4326_v28 = vpop.f32.mrf.mxu1  ;;  %v6143_v59 = vadd.f32 %v6714_v41, %v2144_v47  ;;  %v6146_v45 = vadd.f32 %v6715_v25, %v2143_v27  ;;  %v2147_v31 = vadd.f32 %v6717_v15, %v6716_v11  ;;  %v6155_v4 = vadd.f32 %v6719_v18, %v2145_v3  ;;  %v6728_v3 = vld [vmem:[#allocation42_spill] sm:$0xff]  ;;  %v6732_v11 = vld [vmem:[#allocation13_spill] sm:$0xff] }
 0x1bc   : > { %v6102_v46 = vadd.f32 %v6090_v53, %v2941_v51  ;;  %v2940_v13 = vadd.f32 %v2781_v7, %v2669_v1  ;;  %v2672_v63 = vadd.f32 %v4326_v28, %v2400_v54  ;;  %v2791_v30 = vpop.f32.mrf.mxu0  ;;  %v6152_v5 = vadd.f32 %v6718_v21, %v2146_v36 }
 0x1bd   : > { %v2520_v52 = vpop.f32.mrf.mxu1  ;;  %v6167_v28 = vadd.f32 %v6721_v23, %v2147_v31  ;;  %v6733_v31 = vld [vmem:[#allocation17_spill] sm:$0xff]  ;;  %v6737_v23 = vld [vmem:[#allocation27_spill] sm:$0xff] }
 0x1be   : > { %v3638_v24 = vmul.f32 -1.442695, %v6102_v46  ;;  %v6116_v38 = vadd.f32 %v6090_v53, %v2940_v13  ;;  %v2943_v20 = vadd.f32 %v4376_v48, %v2672_v63  ;;  %v2671_v34 = vadd.f32 %v2520_v52, %v2399_v2  ;;  %v4379_v0 = vpop.f32.mrf.mxu0  ;;  %v6720_v2 = vld [vmem:[#allocation5_spill] sm:$0xff]  ;;  %v6722_v13 = vld [vmem:[#allocation39_spill] sm:$0xff]  ;;  %v6724_v52 = vld [vmem:[#allocation40_spill] sm:$0xff] }
 0x1bf   : > { %v4329_v9 = vpop.f32.mrf.mxu1  ;;  %v6723_v63 = vld [vmem:[#allocation15_spill] sm:$0xff] }
 0x1c0   : > { %4430 = vpow2.f32 %v3638_v24  ;;  %v3637_v33 = vmul.f32 -1.442695, %v6116_v38  ;;  %v6130_v12 = vadd.f32 %v6090_v53, %v2943_v20  ;;  %v2942_v42 = vadd.f32 %v2791_v30, %v2671_v34  ;;  %v2801_v17 = vpop.f32.mrf.mxu0  ;;  %v6725_v24 = vld [vmem:[#allocation20_spill] sm:$0xff] }
 0x1c1   : > { %v2674_v37 = vadd.f32 %v4329_v9, %v2402_v35  ;;  %v2530_v16 = vpop.f32.mrf.mxu1  ;;  %v6158_v35 = vadd.f32 %v6720_v2, %v2148_v22  ;;  %v2150_v30 = vadd.f32 %v6723_v63, %v6722_v13  ;;  %v2149_v20 = vadd.f32 %v6725_v24, %v6724_v52  ;;  %v6738_v63 = vld [vmem:[#allocation6_spill] sm:$0xff] }
 0x1c2   : > { %4432 = vpow2.f32 %v3637_v33  ;;  %v3640_v8 = vmul.f32 -1.442695, %v6130_v12  ;;  %v6140_v58 = vadd.f32 %v6090_v53, %v2942_v42  ;;  %v2673_v61 = vadd.f32 %v2530_v16, %v2401_v60  ;;  %v4382_v10 = vpop.f32.mrf.mxu0  ;;  %v6726_v42 = vld [vmem:[#allocation41_spill] sm:$0xff]  ;;  %v6731_v16 = vld [vmem:[#allocation31_spill] sm:$0xff] }
 0x1c3   : > { %v2945_v14 = vadd.f32 %v4379_v0, %v2674_v37  ;;  %v4332_v54 = vpop.f32.mrf.mxu1  ;;  %v2151_v22 = vadd.f32 %v6729_v6, %v6728_v3  ;;  %v6730_v37 = vld [vmem:[#allocation43_spill] sm:$0xff]  ;;  %v6189_v15 = vadd.f32 %v6732_v11, %v2150_v30 }
 0x1c4   : > { %4434 = vpow2.f32 %v3640_v8  ;;  %v3639_v57 = vmul.f32 -1.442695, %v6140_v58  ;;  %v2944_v19 = vadd.f32 %v2801_v17, %v2673_v61  ;;  %v2676_v7 = vadd.f32 %v4332_v54, %v2404_v32  ;;  %v2811_v56 = vpop.f32.mrf.mxu0  ;;  %v6727_v17 = vld [vmem:[#allocation25_spill] sm:$0xff]  ;;  %v6734_v54 = vld [vmem:[#allocation44_spill] sm:$0xff] }
 0x1c5   : > { %v6161_v51 = vadd.f32 %v6090_v53, %v2945_v14  ;;  %v2540_v1 = vpop.f32.mrf.mxu1  ;;  %v2152_v36 = vadd.f32 %v6727_v17, %v6726_v42  ;;  %v2154_v8 = vadd.f32 %v6731_v16, %v6730_v37  ;;  %v6192_v14 = vadd.f32 %v6733_v31, %v2149_v20  ;;  %v6741_v42 = vld [vmem:[#allocation14_spill] sm:$0xff] }
 0x1c6   : > { %4436 = vpow2.f32 %v3639_v57  ;;  %v6164_v48 = vadd.f32 %v6090_v53, %v2944_v19  ;;  %v2947_v60 = vadd.f32 %v4382_v10, %v2676_v7  ;;  %v2675_v32 = vadd.f32 %v2540_v1, %v2403_v39  ;;  %v4385_v40 = vpop.f32.mrf.mxu0  ;;  %v6735_v57 = vld [vmem:[#allocation18_spill] sm:$0xff] }
 0x1c7   : > { %v3642_v34 = vmul.f32 -1.442695, %v6161_v51  ;;  %v4335_v0 = vpop.f32.mrf.mxu1  ;;  %v2153_v19 = vadd.f32 %v6735_v57, %v6734_v54  ;;  %v6206_v13 = vadd.f32 %v6737_v23, %v2151_v22  ;;  %v6209_v30 = vadd.f32 %v6738_v63, %v2154_v8 }
 0x1c8   : > { %v3641_v47 = vmul.f32 -1.442695, %v6164_v48  ;;  %v6176_v27 = vadd.f32 %v6090_v53, %v2947_v60  ;;  %v2946_v9 = vadd.f32 %v2811_v56, %v2675_v32  ;;  %v2678_v39 = vadd.f32 %v4335_v0, %v2406_v55  ;;  %v2821_v33 = vpop.f32.mrf.mxu0  ;;  %v6736_v32 = vld [vmem:[#allocation22_spill] sm:$0xff] }
 0x1c9   : > { %4438 = vpow2.f32 %v3642_v34  ;;  %v2550_v61 = vpop.f32.mrf.mxu1 }
 0x1ca   : > { %4440 = vpow2.f32 %v3641_v47  ;;  %v3644_v10 = vmul.f32 -1.442695, %v6176_v27  ;;  %v6186_v41 = vadd.f32 %v6090_v53, %v2946_v9  ;;  %v2949_v25 = vadd.f32 %v4385_v40, %v2678_v39  ;;  %v4388_v55 = vpop.f32.mrf.mxu0  ;;  %v6739_v47 = vld [vmem:[#allocation8_spill] sm:$0xff] }
 0x1cb   : > { %v2677_v7 = vadd.f32 %v2550_v61, %v6106_v43  ;;  %v4338_v56 = vpop.f32.mrf.mxu1  ;;  %v6203_v40 = vadd.f32 %v6736_v32, %v2152_v36  ;;  %v6213_v9 = vadd.f32 %v6739_v47, %v2153_v19  ;;  %v6740_v39 = vld [vmem:[#allocation16_spill] sm:$0xff]  ;;  %v6742_v61 = vld [vmem:[#allocation21_spill] sm:$0xff] }
 0x1cc   : > { %4442 = vpow2.f32 %v3644_v10  ;;  %v3643_v21 = vmul.f32 -1.442695, %v6186_v41  ;;  %v6199_v18 = vadd.f32 %v6090_v53, %v2949_v25  ;;  %v2680_v2 = vadd.f32 %v4338_v56, %v6109_v62  ;;  %v2831_v1 = vpop.f32.mrf.mxu0  ;;  %v6743_v10 = vld [vmem:[#allocation23_spill] sm:$0xff]  ;;  %v6744_v56 = vld [vmem:[#allocation33_spill] sm:$0xff] }
 0x1cd   : > { %v4431_v60 = vpop.eup %4430  ;;  %v2948_v43 = vadd.f32 %v2821_v33, %v2677_v7  ;;  %v2560_v52 = vpop.f32.mrf.mxu1  ;;  %v2156_v17 = vadd.f32 %v6741_v42, %v6740_v39  ;;  %v2155_v25 = vadd.f32 %v6743_v10, %v6742_v61 }
 0x1ce   : > { %v3108_v24 = vadd.f32 1.0, %v4431_v60  ;;  %4444 = vpow2.f32 %v3643_v21  ;;  %v3646_v20 = vmul.f32 -1.442695, %v6199_v18  ;;  %v2951_v34 = vadd.f32 %v4388_v55, %v2680_v2  ;;  %v4391_v0 = vpop.f32.mrf.mxu0 }
 0x1cf   : > { %v4433_v62 = vpop.eup %4432  ;;  %v6218_v36 = vadd.f32 %v6090_v53, %v2948_v43  ;;  %v2679_v3 = vadd.f32 %v2560_v52, %v6112_v50  ;;  %v4341_v33 = vpop.f32.mrf.mxu1  ;;  %v6230_v21 = vadd.f32 %v6744_v56, %v2156_v17  ;;  %v6745_v43 = vld [vmem:[#allocation10_spill] sm:$0xff] }
 0x1d0   : > { %4446 = vrcp.f32 %v3108_v24  ;;  %v3107_v6 = vadd.f32 1.0, %v4433_v62  ;;  %v6222_v22 = vadd.f32 %v6090_v53, %v2951_v34  ;;  %v2682_v37 = vadd.f32 %v4341_v33, %v6119_v49  ;;  %v2841_v16 = vpop.f32.mrf.mxu0  ;;  %v6747_v17 = vld [vmem:[#allocation34_spill] sm:$0xff] }
 0x1d1   : > { %v4435_v8 = vpop.eup %4434  ;;  %4448 = vpow2.f32 %v3646_v20  ;;  %v3645_v55 = vmul.f32 -1.442695, %v6218_v36  ;;  %v2950_v11 = vadd.f32 %v2831_v1, %v2679_v3  ;;  %v2570_v31 = vpop.f32.mrf.mxu1  ;;  %v6241_v52 = vadd.f32 %v6745_v43, %v2155_v25  ;;  %v6748_v25 = vld [vmem:[#allocation26_spill] sm:$0xff] }
 0x1d2   : > { %4450 = vrcp.f32 %v3107_v6  ;;  %v3110_v50 = vadd.f32 1.0, %v4435_v8  ;;  %v3648_v54 = vmul.f32 -1.442695, %v6222_v22  ;;  %v2953_v57 = vadd.f32 %v4391_v0, %v2682_v37  ;;  %v4394_v19 = vpop.f32.mrf.mxu0 }
 0x1d3   : > { %v4437_v7 = vpop.eup %4436  ;;  %4452 = vpow2.f32 %v3645_v55  ;;  %v6233_v49 = vadd.f32 %v6090_v53, %v2950_v11  ;;  %v2681_v2 = vadd.f32 %v2570_v31, %v6122_v26  ;;  %v4344_v60 = vpop.f32.mrf.mxu1  ;;  %v6749_v55 = vld [vmem:[#allocation19_spill] sm:$0xff] }
 0x1d4   : > { %4454 = vrcp.f32 %v3110_v50  ;;  %v3109_v1 = vadd.f32 1.0, %v4437_v7  ;;  %v6237_v32 = vadd.f32 %v6090_v53, %v2953_v57  ;;  %v2684_v23 = vadd.f32 %v4344_v60, %v6143_v59  ;;  %v2851_v63 = vpop.f32.mrf.mxu0  ;;  %v6746_v59 = vld [vmem:[#allocation24_spill] sm:$0xff] }
 0x1d5   : > { %4456 = vpow2.f32 %v3648_v54  ;;  %v3647_v24 = vmul.f32 -1.442695, %v6233_v49  ;;  %v2952_v20 = vadd.f32 %v2841_v16, %v2681_v2  ;;  %v2580_v34 = vpop.f32.mrf.mxu1  ;;  %v2158_v3 = vadd.f32 %v6747_v17, %v6746_v59  ;;  %v6750_v60 = vld [vmem:[#allocation12_spill] sm:$0xff] }
 0x1d6   : > { %v4439_v0 = vpop.eup %4438  ;;  %4458 = vrcp.f32 %v3109_v1  ;;  %v3650_v26 = vmul.f32 -1.442695, %v6237_v32  ;;  %v2955_v62 = vadd.f32 %v4394_v19, %v2684_v23  ;;  %v2683_v47 = vadd.f32 %v2580_v34, %v6146_v45  ;;  %v4397_v39 = vpop.f32.mrf.mxu0 }
 0x1d7   : > { %v4441_v42 = vpop.eup %4440  ;;  %v3112_v33 = vadd.f32 1.0, %v4439_v0  ;;  %4460 = vpow2.f32 %v3647_v24  ;;  %v6249_v6 = vadd.f32 %v6090_v53, %v2952_v20  ;;  %v4347_v37 = vpop.f32.mrf.mxu1  ;;  %v2157_v11 = vadd.f32 %v6749_v55, %v6748_v25 }
 0x1d8   : > { %v3111_v16 = vadd.f32 1.0, %v4441_v42  ;;  %4462 = vpow2.f32 %v3650_v26  ;;  %v6252_v8 = vadd.f32 %v6090_v53, %v2955_v62  ;;  %v2954_v61 = vadd.f32 %v2851_v63, %v2683_v47  ;;  %v2861_v10 = vpop.f32.mrf.mxu0  ;;  %v6751_v26 = vld [vmem:[#allocation4_spill] sm:$0xff] }
 0x1d9   : > { %v4443_v45 = vpop.eup %4442  ;;  %4464 = vrcp.f32 %v3112_v33  ;;  %v3649_v31 = vmul.f32 -1.442695, %v6249_v6  ;;  %v2686_v50 = vadd.f32 %v4347_v37, %v6152_v5  ;;  %v2590_v54 = vpop.f32.mrf.mxu1  ;;  %v6264_v1 = vadd.f32 %v6750_v60, %v2158_v3 }
 0x1da   : > { %4466 = vrcp.f32 %v3111_v16  ;;  %v3114_v57 = vadd.f32 1.0, %v4443_v45  ;;  %v3652_v19 = vmul.f32 -1.442695, %v6252_v8  ;;  %v6261_v7 = vadd.f32 %v6090_v53, %v2954_v61  ;;  %v4400_v56 = vpop.f32.mrf.mxu0 }
 0x1db   : > { %v4445_v2 = vpop.eup %4444  ;;  %4468 = vpow2.f32 %v3649_v31  ;;  %v2957_v23 = vadd.f32 %v4397_v39, %v2686_v50  ;;  %v2685_v63 = vadd.f32 %v2590_v54, %v6155_v4  ;;  %v4350_v43 = vpop.f32.mrf.mxu1  ;;  %v6270_v62 = vadd.f32 %v6751_v26, %v2157_v11  ;;  %v6752_v50 = vld [vmem:[#allocation28_spill] sm:$0xff] }
 0x1dc   : > { %4470 = vrcp.f32 %v3114_v57  ;;  %v3113_v5 = vadd.f32 1.0, %v4445_v2  ;;  %v3651_v24 = vmul.f32 -1.442695, %v6261_v7  ;;  %v2688_v20 = vadd.f32 %v4350_v43, %v6158_v35  ;;  %v2871_v34 = vpop.f32.mrf.mxu0 }
 0x1dd   : > { %v4447_v0 = vpop.eup %4446  ;;  %4472 = vpow2.f32 %v3652_v19  ;;  %v6278_v4 = vadd.f32 %v6090_v53, %v2957_v23  ;;  %v2956_v47 = vadd.f32 %v2861_v10, %v2685_v63  ;;  %v2600_v39 = vpop.f32.mrf.mxu1  ;;  %v6295_v54 = vadd.f32 %v6067_v44, %v6752_v50 }
 0x1de   : > { %v4449_v42 = vpop.eup %4448  ;;  %v3204_v35 = vmul.f32 %v4447_v0, %v6102_v46  ;;  %4474 = vrcp.f32 %v3113_v5  ;;  %v2959_v59 = vadd.f32 %v4400_v56, %v2688_v20  ;;  %v2687_v17 = vadd.f32 %v2600_v39, %v6167_v28  ;;  %v4403_v3 = vpop.f32.mrf.mxu0 }
 0x1df   : > { %v4451_v33 = vpop.eup %4450  ;;  %v3116_v37 = vadd.f32 1.0, %v4449_v42  ;;  %4476 = vpow2.f32 %v3651_v24  ;;  %v3654_v16 = vmul.f32 -1.442695, %v6278_v4  ;;  %v6284_v61 = vadd.f32 %v6090_v53, %v2956_v47  ;;  %v4353_v45 = vpop.f32.mrf.mxu1 }
 0x1e0   : > { %v4453_v10 = vpop.eup %4452  ;;  %3237 = vst.msk [vmem:[%s6275_s15 + $0x8] sm:$0xff] %vm3235_vm4, %v3204_v35  ;;  %v3203_v46 = vmul.f32 %v4451_v33, %v6116_v38  ;;  %v6290_v25 = vadd.f32 %v6090_v53, %v2959_v59  ;;  %v2958_v28 = vadd.f32 %v2871_v34, %v2687_v17  ;;  %v2690_v55 = vadd.f32 %v4353_v45, %v6189_v15  ;;  %v2881_v11 = vpop.f32.mrf.mxu0 }
 0x1e1   : > { %v4455_v31 = vpop.eup %4454  ;;  %4478 = vrcp.f32 %v3116_v37  ;;  %v3115_v57 = vadd.f32 1.0, %v4453_v10  ;;  %v3653_v19 = vmul.f32 -1.442695, %v6284_v61  ;;  %v2610_v56 = vpop.f32.mrf.mxu1 }
 0x1e2   : > { %v4457_v2 = vpop.eup %4456  ;;  %3236 = vst.msk [vmem:[%s6275_s15] sm:$0xff] %vm3235_vm4, %v3203_v46  ;;  %v3206_v38 = vmul.f32 %v4455_v31, %v6130_v12  ;;  %4480 = vpow2.f32 %v3654_v16  ;;  %v3656_v15 = vmul.f32 -1.442695, %v6290_v25  ;;  %v6303_v60 = vadd.f32 %v6090_v53, %v2958_v28  ;;  %v4406_v23 = vpop.f32.mrf.mxu0 }
 0x1e3   : > { %v4459_v44 = vpop.eup %4458  ;;  %4482 = vrcp.f32 %v3115_v57  ;;  %v3118_v63 = vadd.f32 1.0, %v4457_v2  ;;  %v2961_v43 = vadd.f32 %v4403_v3, %v2690_v55  ;;  %v2689_v5 = vadd.f32 %v2610_v56, %v6192_v14  ;;  %v4356_v24 = vpop.f32.mrf.mxu1 }
 0x1e4   : > { %v4461_v20 = vpop.eup %4460  ;;  %3239 = vst.msk [vmem:[%s6275_s15 + $0x18] sm:$0xff] %vm3235_vm4, %v3206_v38  ;;  %v3205_v12 = vmul.f32 %v4459_v44, %v6140_v58  ;;  %4484 = vpow2.f32 %v3653_v19  ;;  %v3655_v34 = vmul.f32 -1.442695, %v6303_v60  ;;  %v2692_v0 = vadd.f32 %v4356_v24, %v6203_v40  ;;  %v2891_v26 = vpop.f32.mrf.mxu0 }
 0x1e5   : > { %v4463_v47 = vpop.eup %4462  ;;  %4486 = vrcp.f32 %v3118_v63  ;;  %v3117_v39 = vadd.f32 1.0, %v4461_v20  ;;  %v6312_v42 = vadd.f32 %v6090_v53, %v2961_v43  ;;  %v2960_v14 = vadd.f32 %v2881_v11, %v2689_v5  ;;  %v2620_v35 = vpop.f32.mrf.mxu1 }
 0x1e6   : > { %v4465_v59 = vpop.eup %4464  ;;  %3238 = vst.msk [vmem:[%s6275_s15 + $0x10] sm:$0xff] %vm3235_vm4, %v3205_v12  ;;  %v3120_v17 = vadd.f32 1.0, %v4463_v47  ;;  %4488 = vpow2.f32 %v3656_v15  ;;  %v2963_v58 = vadd.f32 %v4406_v23, %v2692_v0  ;;  %v2691_v3 = vadd.f32 %v2620_v35, %v6206_v13  ;;  %v4409_v33 = vpop.f32.mrf.mxu0 }
 0x1e7   : > { %v4467_v40 = vpop.eup %4466  ;;  %v3208_v37 = vmul.f32 %v4465_v59, %v6161_v51  ;;  %4490 = vrcp.f32 %v3117_v39  ;;  %v3658_v16 = vmul.f32 -1.442695, %v6312_v42  ;;  %v6320_v45 = vadd.f32 %v6090_v53, %v2960_v14  ;;  %v4359_v10 = vpop.f32.mrf.mxu1  ;;  %v6753_v39 = vld [vmem:[#allocation35_spill] sm:$0xff] }
 0x1e8   : > { %v4469_v46 = vpop.eup %4468  ;;  %v3207_v28 = vmul.f32 %v4467_v40, %v6164_v48  ;;  %4492 = vrcp.f32 %v3120_v17  ;;  %v6324_v55 = vadd.f32 %v6090_v53, %v2963_v58  ;;  %v2962_v13 = vadd.f32 %v2891_v26, %v2691_v3  ;;  %v2901_v11 = vpop.f32.mrf.mxu0 }
 0x1e9   : > { %v4471_v31 = vpop.eup %4470  ;;  %3241 = vst.msk [vmem:[%s6275_s15 + $0x28] sm:$0xff] %vm3235_vm4, %v3208_v37  ;;  %v3119_v51 = vadd.f32 1.0, %v4469_v46  ;;  %4494 = vpow2.f32 %v3655_v34  ;;  %v3657_v50 = vmul.f32 -1.442695, %v6320_v45  ;;  %v2694_v57 = vadd.f32 %v4359_v10, %v6209_v30  ;;  %v2630_v19 = vpop.f32.mrf.mxu1 }
 0x1ea   : > { %v4473_v56 = vpop.eup %4472  ;;  %3240 = vst.msk [vmem:[%s6275_s15 + $0x20] sm:$0xff] %vm3235_vm4, %v3207_v28  ;;  %v3210_v48 = vmul.f32 %v4471_v31, %v6176_v27  ;;  %4496 = vpow2.f32 %v3658_v16  ;;  %v3660_v2 = vmul.f32 -1.442695, %v6324_v55  ;;  %v6335_v38 = vadd.f32 %v6090_v53, %v2962_v13  ;;  %v4412_v15 = vpop.f32.mrf.mxu0 }
 0x1eb   : > { %v4475_v23 = vpop.eup %4474  ;;  %4498 = vrcp.f32 %v3119_v51  ;;  %v3122_v44 = vadd.f32 1.0, %v4473_v56  ;;  %v2965_v63 = vadd.f32 %v4409_v33, %v2694_v57  ;;  %v2693_v30 = vadd.f32 %v2630_v19, %v6213_v9  ;;  %v4362_v43 = vpop.f32.mrf.mxu1 }
 0x1ec   : > { %v4477_v5 = vpop.eup %4476  ;;  %3243 = vst.msk [vmem:[%s6275_s15 + $0x38] sm:$0xff] %vm3235_vm4, %v3210_v48  ;;  %v3209_v27 = vmul.f32 %v4475_v23, %v6186_v41  ;;  %4500 = vpow2.f32 %v3657_v50  ;;  %v3659_v24 = vmul.f32 -1.442695, %v6335_v38  ;;  %v2696_v20 = vadd.f32 %v4362_v43, %v6230_v21  ;;  %v2911_v12 = vpop.f32.mrf.mxu0 }
 0x1ed   : > { %4502 = vrcp.f32 %v3122_v44  ;;  %v3121_v34 = vadd.f32 1.0, %v4477_v5  ;;  %v6344_v0 = vadd.f32 %v6090_v53, %v2965_v63  ;;  %v2964_v26 = vadd.f32 %v2901_v11, %v2693_v30  ;;  %v2640_v9 = vpop.f32.mrf.mxu1 }
 0x1ee   : > { %v4479_v47 = vpop.eup %4478  ;;  %v2428_v14 = vadd.f32 %v6753_v39, %v6295_v54  ;;  %3242 = vst.msk [vmem:[%s6275_s15 + $0x30] sm:$0xff] %vm3235_vm4, %v3209_v27  ;;  %4504 = vpow2.f32 %v3660_v2  ;;  %v2967_v41 = vadd.f32 %v4412_v15, %v2696_v20  ;;  %v2695_v35 = vadd.f32 %v2640_v9, %v6241_v52  ;;  %v4415_v21 = vpop.f32.mrf.mxu0 }
 0x1ef   : > { %v4481_v59 = vpop.eup %4480  ;;  %v3212_v17 = vmul.f32 %v4479_v47, %v6199_v18  ;;  %4506 = vrcp.f32 %v3121_v34  ;;  %v3662_v58 = vmul.f32 -1.442695, %v6344_v0  ;;  %v6354_v3 = vadd.f32 %v6090_v53, %v2964_v26  ;;  %v4365_v33 = vpop.f32.mrf.mxu1 }
 0x1f0   : > { %v4483_v40 = vpop.eup %4482  ;;  %v3124_v54 = vadd.f32 1.0, %v4481_v59  ;;  %4508 = vpow2.f32 %v3659_v24  ;;  %v6357_v37 = vadd.f32 %v6090_v53, %v2967_v41  ;;  %v2966_v16 = vadd.f32 %v2911_v12, %v2695_v35  ;;  %v2921_v52 = vpop.f32.mrf.mxu0 }
 0x1f1   : > { %v4485_v10 = vpop.eup %4484  ;;  %3245 = vst.msk [vmem:[%s6275_s15 + $0x48] sm:$0xff] %vm3235_vm4, %v3212_v17  ;;  %v3211_v18 = vmul.f32 %v4483_v40, %v6218_v36  ;;  %4510 = vpow2.f32 %v3662_v58  ;;  %v3661_v46 = vmul.f32 -1.442695, %v6354_v3  ;;  %v2698_v28 = vadd.f32 %v4365_v33, %v6264_v1  ;;  %v2650_v13 = vpop.f32.mrf.mxu1 }
 0x1f2   : > { %v4487_v11 = vpop.eup %4486  ;;  %4512 = vrcp.f32 %v3124_v54  ;;  %v3123_v31 = vadd.f32 1.0, %v4485_v10  ;;  %v3664_v51 = vmul.f32 -1.442695, %v6357_v37  ;;  %v6366_v50 = vadd.f32 %v6090_v53, %v2966_v16  ;;  %v4418_v48 = vpop.f32.mrf.mxu0 }
 0x1f3   : > { %v4489_v57 = vpop.eup %4488  ;;  %3244 = vst.msk [vmem:[%s6275_s15 + $0x40] sm:$0xff] %vm3235_vm4, %v3211_v18  ;;  %v3214_v36 = vmul.f32 %v4487_v11, %v6222_v22  ;;  %4514 = vpow2.f32 %v3661_v46  ;;  %v2969_v19 = vadd.f32 %v4415_v21, %v2698_v28  ;;  %v2697_v56 = vadd.f32 %v2650_v13, %v6270_v62  ;;  %v4368_v1 = vpop.f32.mrf.mxu1 }
 0x1f4   : > { %v4491_v2 = vpop.eup %4490  ;;  %4516 = vrcp.f32 %v3123_v31  ;;  %v3126_v15 = vadd.f32 1.0, %v4489_v57  ;;  %v3663_v23 = vmul.f32 -1.442695, %v6366_v50  ;;  %v2700_v44 = vadd.f32 %v4368_v1, %v2428_v14  ;;  %v2931_v9 = vpop.f32.mrf.mxu0 }
 0x1f5   : > { %v4493_v63 = vpop.eup %4492  ;;  %3247 = vst.msk [vmem:[%s6275_s15 + $0x58] sm:$0xff] %vm3235_vm4, %v3214_v36  ;;  %v3213_v30 = vmul.f32 %v4491_v2, %v6233_v49  ;;  %4518 = vpow2.f32 %v3664_v51  ;;  %v6377_v22 = vadd.f32 %v6090_v53, %v2969_v19  ;;  %v2968_v62 = vadd.f32 %v2921_v52, %v2697_v56  ;;  %v2660_v43 = vpop.f32.mrf.mxu1 }
 0x1f6   : > { %v4495_v5 = vpop.eup %4494  ;;  %v3216_v27 = vmul.f32 %v4493_v63, %v6237_v32  ;;  %4520 = vrcp.f32 %v3126_v15  ;;  %v2971_v24 = vadd.f32 %v4418_v48, %v2700_v44  ;;  %v2699_v20 = vadd.f32 %v2660_v43, %v6079_v29 }
 0x1f7   : > { %v4497_v12 = vpop.eup %4496  ;;  %3246 = vst.msk [vmem:[%s6275_s15 + $0x50] sm:$0xff] %vm3235_vm4, %v3213_v30  ;;  %v3125_v34 = vadd.f32 1.0, %v4495_v5  ;;  %4522 = vpow2.f32 %v3663_v23  ;;  %v3666_v49 = vmul.f32 -1.442695, %v6377_v22  ;;  %v6385_v26 = vadd.f32 %v6090_v53, %v2968_v62 }
 0x1f8   : > { %v4499_v47 = vpop.eup %4498  ;;  %3249 = vst.msk [vmem:[%s6275_s15 + $0x68] sm:$0xff] %vm3235_vm4, %v3216_v27  ;;  %v3128_v32 = vadd.f32 1.0, %v4497_v12  ;;  %v6390_v39 = vadd.f32 %v6090_v53, %v2971_v24  ;;  %v2970_v29 = vadd.f32 %v2931_v9, %v2699_v20 }
 0x1f9   : > { %v4501_v14 = vpop.eup %4500  ;;  %v3215_v41 = vmul.f32 %v4499_v47, %v6249_v6  ;;  %4524 = vrcp.f32 %v3125_v34  ;;  %v3665_v35 = vmul.f32 -1.442695, %v6385_v26 }
 0x1fa   : > { %v4503_v21 = vpop.eup %4502  ;;  %4526 = vrcp.f32 %v3128_v32  ;;  %v3127_v59 = vadd.f32 1.0, %v4501_v14  ;;  %v6395_v17 = vadd.f32 %v6090_v53, %v2970_v29  ;;  %v3668_v40 = vmul.f32 -1.442695, %v6390_v39 }
 0x1fb   : > { %v4505_v58 = vpop.eup %4504  ;;  %3248 = vst.msk [vmem:[%s6275_s15 + $0x60] sm:$0xff] %vm3235_vm4, %v3215_v41  ;;  %v3218_v33 = vmul.f32 %v4503_v21, %v6252_v8  ;;  %4528 = vpow2.f32 %v3666_v49 }
 0x1fc   : > { %v4507_v6 = vpop.eup %4506  ;;  %4530 = vrcp.f32 %v3127_v59  ;;  %v3130_v54 = vadd.f32 1.0, %v4505_v58  ;;  %v3667_v18 = vmul.f32 -1.442695, %v6395_v17 }
 0x1fd   : > { %v4509_v16 = vpop.eup %4508  ;;  %3251 = vst.msk [vmem:[%s6275_s15 + $0x78] sm:$0xff] %vm3235_vm4, %v3218_v33  ;;  %v3217_v52 = vmul.f32 %v4507_v6, %v6261_v7  ;;  %4532 = vpow2.f32 %v3665_v35 }
 0x1fe   : > { %v4511_v53 = vpop.eup %4510  ;;  %4534 = vrcp.f32 %v3130_v54  ;;  %v3129_v10 = vadd.f32 1.0, %v4509_v16 }
 0x1ff   : > { %v4513_v46 = vpop.eup %4512  ;;  %3250 = vst.msk [vmem:[%s6275_s15 + $0x70] sm:$0xff] %vm3235_vm4, %v3217_v52  ;;  %v3132_v8 = vadd.f32 1.0, %v4511_v53  ;;  %4536 = vpow2.f32 %v3668_v40 }
 0x200   : > { %v4515_v28 = vpop.eup %4514  ;;  %v3220_v13 = vmul.f32 %v4513_v46, %v6278_v4  ;;  %4538 = vrcp.f32 %v3129_v10 }
 0x201   : > { %v4517_v11 = vpop.eup %4516  ;;  %4540 = vrcp.f32 %v3132_v8  ;;  %v3131_v7 = vadd.f32 1.0, %v4515_v28 }
 0x202   : > { %v4519_v31 = vpop.eup %4518  ;;  %3253 = vst.msk [vmem:[%s6275_s15 + $0x88] sm:$0xff] %vm3235_vm4, %v3220_v13  ;;  %v3219_v51 = vmul.f32 %v4517_v11, %v6284_v61  ;;  %4542 = vpow2.f32 %v3667_v18 }
 0x203   : > { %v4521_v57 = vpop.eup %4520  ;;  %4544 = vrcp.f32 %v3131_v7  ;;  %v3134_v36 = vadd.f32 1.0, %v4519_v31 }
 0x204   : > { %v4523_v19 = vpop.eup %4522  ;;  %3252 = vst.msk [vmem:[%s6275_s15 + $0x80] sm:$0xff] %vm3235_vm4, %v3219_v51  ;;  %v3222_v4 = vmul.f32 %v4521_v57, %v6290_v25 }
 0x205   : > { %4546 = vrcp.f32 %v3134_v36  ;;  %v3133_v56 = vadd.f32 1.0, %v4523_v19 }
 0x206   : > { %v4525_v1 = vpop.eup %4524  ;;  %3255 = vst.msk [vmem:[%s6275_s15 + $0x98] sm:$0xff] %vm3235_vm4, %v3222_v4 }
 0x207   : > { %v4527_v48 = vpop.eup %4526  ;;  %v3221_v61 = vmul.f32 %v4525_v1, %v6303_v60  ;;  %4548 = vrcp.f32 %v3133_v56 }
 0x208   : > { %v4529_v2 = vpop.eup %4528  ;;  %v3224_v15 = vmul.f32 %v4527_v48, %v6312_v42 }
 0x209   : > { %v4531_v23 = vpop.eup %4530  ;;  %3254 = vst.msk [vmem:[%s6275_s15 + $0x90] sm:$0xff] %vm3235_vm4, %v3221_v61  ;;  %v3136_v44 = vadd.f32 1.0, %v4529_v2 }
 0x20a   : > { %v4533_v63 = vpop.eup %4532  ;;  %3257 = vst.msk [vmem:[%s6275_s15 + $0xa8] sm:$0xff] %vm3235_vm4, %v3224_v15  ;;  %v3223_v25 = vmul.f32 %v4531_v23, %v6320_v45 }
 0x20b   : > { %v4535_v30 = vpop.eup %4534  ;;  %4550 = vrcp.f32 %v3136_v44  ;;  %v3135_v62 = vadd.f32 1.0, %v4533_v63 }
 0x20c   : > { %v4537_v60 = vpop.eup %4536  ;;  %3256 = vst.msk [vmem:[%s6275_s15 + $0xa0] sm:$0xff] %vm3235_vm4, %v3223_v25  ;;  %v3226_v42 = vmul.f32 %v4535_v30, %v6324_v55 }
 0x20d   : > { %v4539_v43 = vpop.eup %4538  ;;  %4552 = vrcp.f32 %v3135_v62  ;;  %v3138_v5 = vadd.f32 1.0, %v4537_v60 }
 0x20e   : > { %v4541_v27 = vpop.eup %4540  ;;  %3259 = vst.msk [vmem:[%s6275_s15 + $0xb8] sm:$0xff] %vm3235_vm4, %v3226_v42  ;;  %v3225_v45 = vmul.f32 %v4539_v43, %v6335_v38 }
 0x20f   : > { %v4543_v24 = vpop.eup %4542  ;;  %v3228_v20 = vmul.f32 %v4541_v27, %v6344_v0  ;;  %4554 = vrcp.f32 %v3138_v5 }
 0x210   : > { %v4545_v12 = vpop.eup %4544  ;;  %3258 = vst.msk [vmem:[%s6275_s15 + $0xb0] sm:$0xff] %vm3235_vm4, %v3225_v45  ;;  %v3137_v55 = vadd.f32 1.0, %v4543_v24 }
 0x211   : > { %3261 = vst.msk [vmem:[%s6275_s15 + $0xc8] sm:$0xff] %vm3235_vm4, %v3228_v20  ;;  %v3227_v34 = vmul.f32 %v4545_v12, %v6354_v3 }
 0x212   : > { %v4547_v49 = vpop.eup %4546  ;;  %4556 = vrcp.f32 %v3137_v55 }
 0x213   : > { %3260 = vst.msk [vmem:[%s6275_s15 + $0xc0] sm:$0xff] %vm3235_vm4, %v3227_v34  ;;  %v3230_v38 = vmul.f32 %v4547_v49, %v6357_v37 }
 0x214   : > { %v4549_v0 = vpop.eup %4548 }
 0x215   : > { %3263 = vst.msk [vmem:[%s6275_s15 + $0xd8] sm:$0xff] %vm3235_vm4, %v3230_v38  ;;  %v3229_v9 = vmul.f32 %v4549_v0, %v6366_v50 }
 0x217   : > { %3262 = vst.msk [vmem:[%s6275_s15 + $0xd0] sm:$0xff] %vm3235_vm4, %v3229_v9 }
 0x218   : > { %v4551_v47 = vpop.eup %4550 }
 0x219   : > { %v3232_v32 = vmul.f32 %v4551_v47, %v6377_v22 }
 0x21a   : > { %v4553_v29 = vpop.eup %4552 }
 0x21b   : > { %3265 = vst.msk [vmem:[%s6275_s15 + $0xe8] sm:$0xff] %vm3235_vm4, %v3232_v32  ;;  %v3231_v3 = vmul.f32 %v4553_v29, %v6385_v26 }
 0x21c   : > { %v4555_v14 = vpop.eup %4554 }
 0x21d   : > { %3264 = vst.msk [vmem:[%s6275_s15 + $0xe0] sm:$0xff] %vm3235_vm4, %v3231_v3  ;;  %v3234_v37 = vmul.f32 %v4555_v14, %v6390_v39 }
 0x21f   : > { %v4557_v41 = vpop.eup %4556  ;;  %3267 = vst.msk [vmem:[%s6275_s15 + $0xf8] sm:$0xff] %vm3235_vm4, %v3234_v37 }
 0x220   : > { %v3233_v50 = vmul.f32 %v4557_v41, %v6395_v17 }
 0x222   : > { %3266 = vst.msk [vmem:[%s6275_s15 + $0xf0] sm:$0xff] %vm3235_vm4, %v3233_v50 }
 0x223 PF: > { %s13_s12 = sadd.s32 1, %s4564_s12  }
 0x224   : > { %p10_p4 = scmp.ge.s32.totalorder %s13_s12, 4  }
 0x226   :  { %12 = sbr.rel (!%p10_p4) target bundleno = 1 (0x1), region = 70 }

// kernel: control_encoder_latent.3
= control target key start
LH: loop header
LB: loop body
LE: loop exit
PB: predicated region body
PF: predicated region fallthrough
CT: control target
= control target key end

     0   :  { %s1586_s24 = smov 0   ;;  %s1869_s0 = inlined_call_operand.vmem [shape: f32[2,9,9,32], index: 0, kind: input, shape index: {}]   ;;  %s1870_s1 = inlined_call_operand.vmem [shape: f32[4,32,16], index: 1, kind: input, shape index: {}]   ;;  %s1871_s2 = inlined_call_operand.vmem [shape: f32[1,16], index: 2, kind: input, shape index: {}]   ;;  %s1872_s3 = inlined_call_operand.vmem [shape: f32[16,8], index: 3, kind: input, shape index: {}]   ;;  %s1873_s4 = inlined_call_operand.vmem [shape: f32[1,8], index: 4, kind: input, shape index: {}]   ;;  %s1874_s5 = inlined_call_operand.vmem [shape: f32[1,8], index: 5, kind: input, shape index: {}]   ;;  %s1875_s6 = inlined_call_operand.vmem [shape: f32[1,8], index: 6, kind: input, shape index: {}]   ;;  %s1876_s7 = inlined_call_operand.vmem [shape: f32[2,64,8], index: 7, kind: output, shape index: {}]  }
   0x1 LB: > { %s1244_s25 = sadd.s32 4294967295, %s1544_s24   ;;  %p1248_p0 = scmp.ge.s32.totalorder %s1544_s24, 1  ;;  %s1544_s24 = sphi %s1586_s24, %s17_s24  }
   0x2   : > { %p237_p1 = scmp.lt.s32.totalorder %s1544_s24, 3 }
   0x4   : > { %p238_p2 = pnand %p1248_p0, %p237_p1 }
   0x5   : > { %p269_p3 = scmp.lt.s32.totalorder (!%p238_p2), %s1244_s25, 1 }
   0x6   : > { %241 = sbr.rel (%p238_p2) target bundleno = 803 (0x323), region = 48 }
   0xb   : > { %v1255_v0 = vld [vmem:[%s1870_s1 + $0x38] sm:$0xff]  ;;  %v1254_v1 = vld [vmem:[%s1870_s1 + $0x30] sm:$0xff]  ;;  %v1253_v2 = vld [vmem:[%s1870_s1 + $0x28] sm:$0xff]  ;;  %s1878_s25 = smov (!%p269_p3, %s1244_s25), 1  ;;  %vm317_vm0 = vcmask 1046528   ;;  %vm347_vm1 = vcmask 261120  }
   0xc   : > { %1473 = vmatprep.subr.mxu1 %v1255_v0  ;;  %1377 = vmatprep.subr.mxu0 %v1255_v0  ;;  %v1252_v3 = vld [vmem:[%s1870_s1 + $0x20] sm:$0xff]  ;;  %s1481_s11 = smul.u32 144, %s1878_s25  ;;  %v300_v4 = vld [vmem:[%s1870_s1 + $0x18] sm:$0xff]  ;;  %v299_v17 = vld [vmem:[%s1870_s1 + $0x10] sm:$0xff]  ;;  %vm915_vm2 = vcmask 130048   ;;  %vm1045_vm3 = vcmask 64512  }
   0xd   : > { %1477 = vmatpush3.msra.mxu1 %v1255_v0  ;;  %1378 = vmatpush3.msra.mxu0 %v1255_v0  ;;  %v1275_v5 = vld [vmem:[%s1870_s1 + $0x58] sm:$0xff]  ;;  %v298_v39 = vld [vmem:[%s1870_s1 + $0x8] sm:$0xff]  ;;  %v1274_v44 = vld [vmem:[%s1870_s1 + $0x50] sm:$0xff]  ;;  %s1318_s30 = sshll.u32 %s1878_s25, 6 }
   0xe   : > { %1474 = vmatprep.subr.mxu1 %v1254_v1  ;;  %1379 = vmatprep.subr.mxu0 %v1254_v1  ;;  %s1612_s14 = scalar_lea.vmem %s1869_s0, %s1481_s11  ;;  %v297_v48 = vld [vmem:[%s1870_s1] sm:$0xff]  ;;  %v1273_v50 = vld [vmem:[%s1870_s1 + $0x48] sm:$0xff]  ;;  %v1287_v51 = vld [vmem:[%s1870_s1 + $0x78] sm:$0xff]  ;;  %s1841_s12 = scalar_lea.vmem %s1876_s7, %s1318_s30 }
   0xf   : > { %1478 = vmatpush3.msra.mxu1 %v1254_v1  ;;  %1380 = vmatpush3.msra.mxu0 %v1254_v1  ;;  %v1621_v6 = vld [vmem:[%s1612_s14 + $0x40] sm:$0xff]  ;;  %v288_v7 = vld [vmem:[%s1612_s14 + $0x48] sm:$0x1]  ;;  %v1625_v8 = vld [vmem:[%s1612_s14 + $0x50] sm:$0xff] }
  0x10   : > { %1475 = vmatprep.subr.mxu1 %v1253_v2  ;;  %1381 = vmatprep.subr.mxu0 %v1253_v2  ;;  %v330_v9 = vrot.slane %v1621_v6, 1  ;;  %v331_v10 = vrot.slane %v288_v7, 1  ;;  %v290_v11 = vld [vmem:[%s1612_s14 + $0x58] sm:$0x1]  ;;  %v333_v12 = vrot.slane %v1625_v8, 1  ;;  %v279_v13 = vld [vmem:[%s1612_s14] sm:$0xff] }
  0x11   : > { %1479 = vmatpush3.msra.mxu1 %v1253_v2  ;;  %1382 = vmatpush3.msra.mxu0 %v1253_v2  ;;  %v334_v14 = vrot.slane %v290_v11, 1  ;;  %v280_v15 = vld [vmem:[%s1612_s14 + $0x8] sm:$0x1]  ;;  %v318_v16 = vrot.slane %v279_v13, 1  ;;  %v1636_v18 = vld [vmem:[%s1612_s14 + $0x10] sm:$0xff]  ;;  %v1639_v19 = vld [vmem:[%s1612_s14 + $0x60] sm:$0xff] }
  0x12   : > { %1476 = vmatprep.subr.mxu1 %v1252_v3  ;;  %1383 = vmatprep.subr.mxu0 %v1252_v3  ;;  %v1642_v20 = vsel %vm317_vm0, %v330_v9, %v331_v10  ;;  %v319_v21 = vrot.slane %v280_v15, 1  ;;  %v282_v22 = vld [vmem:[%s1612_s14 + $0x18] sm:$0x1]  ;;  %v321_v23 = vrot.slane %v1636_v18, 1  ;;  %v292_v24 = vld [vmem:[%s1612_s14 + $0x68] sm:$0x1] }
  0x13   : > { %1480 = vmatpush3.msra.mxu1 %v1252_v3  ;;  %1384 = vmatpush3.msra.mxu0 %v1252_v3  ;;  %v1650_v25 = vsel %vm317_vm0, %v333_v12, %v334_v14  ;;  %v322_v26 = vrot.slane %v282_v22, 1  ;;  %v336_v27 = vrot.slane %v1639_v19, 1  ;;  %v337_v28 = vrot.slane %v292_v24, 1  ;;  %v1654_v29 = vld [vmem:[%s1612_s14 + $0x70] sm:$0xff]  ;;  %v294_v30 = vld [vmem:[%s1612_s14 + $0x78] sm:$0x1] }
  0x14   : > { %1397 = vmatprep.subr.mxu1 %v300_v4  ;;  %1417 = vmatprep.subr.mxu0 %v1275_v5  ;;  %v320_v31 = vsel %vm317_vm0, %v318_v16, %v319_v21  ;;  %v339_v32 = vrot.slane %v1654_v29, 1  ;;  %v340_v33 = vrot.slane %v294_v30, 1  ;;  %v283_v34 = vld [vmem:[%s1612_s14 + $0x20] sm:$0xff]  ;;  %v284_v35 = vld [vmem:[%s1612_s14 + $0x28] sm:$0x1]  ;;  %v285_v36 = vld [vmem:[%s1612_s14 + $0x30] sm:$0xff] }
  0x15   : > { %1391 = vmatprep.mubr.msk.f32.mxu1 %vm347_vm1, %v1642_v20  ;;  %1385 = vmatprep.mubr.msk.f32.mxu0 %vm347_vm1, %v320_v31  ;;  %v323_v37 = vsel %vm317_vm0, %v321_v23, %v322_v26  ;;  %v1667_v38 = vsel %vm317_vm0, %v336_v27, %v337_v28  ;;  %v324_v40 = vrot.slane %v283_v34, 1  ;;  %v325_v41 = vrot.slane %v284_v35, 1  ;;  %v286_v42 = vld [vmem:[%s1612_s14 + $0x38] sm:$0x1]  ;;  %v1272_v52 = vld [vmem:[%s1870_s1 + $0x40] sm:$0xff]  ;;  %v1286_v53 = vld [vmem:[%s1870_s1 + $0x70] sm:$0xff] }
  0x16   : > { %1392 = vmatmul.mubr.msk.f32.vlgmr.msra.gmra.mxu1 %vm347_vm1, %v1650_v25  ;;  %1386 = vmatmul.mubr.msk.f32.vlgmr.msra.gmra.mxu0 %vm347_vm1, %v323_v37  ;;  %v1675_v43 = vsel %vm317_vm0, %v339_v32, %v340_v33  ;;  %v327_v45 = vrot.slane %v285_v36, 1  ;;  %v328_v46 = vrot.slane %v286_v42, 1  ;;  %v1285_v54 = vld [vmem:[%s1870_s1 + $0x68] sm:$0xff]  ;;  %v1284_v55 = vld [vmem:[%s1870_s1 + $0x60] sm:$0xff] }
  0x17   : > { %1398 = vmatpush3.msra.mxu1 %v300_v4  ;;  %1394 = vmatprep.mubr.msk.f32.mxu1 %vm347_vm1, %v1667_v38  ;;  %v326_v47 = vsel %vm317_vm0, %v324_v40, %v325_v41  ;;  %v295_v56 = vld [vmem:[%s1612_s14 + $0x80] sm:$0xff]  ;;  %v296_v57 = vld [vmem:[%s1612_s14 + $0x88] sm:$0x1] }
  0x18   : > { %1399 = vmatprep.subr.mxu1 %v299_v17  ;;  %1418 = vmatpush3.msra.mxu0 %v1275_v5  ;;  %v329_v49 = vsel %vm317_vm0, %v327_v45, %v328_v46  ;;  %v712_v58 = vrot.slane %v295_v56, 1  ;;  %v713_v59 = vrot.slane %v296_v57, 1  ;;  %v907_v61 = vld [vmem:[%s1872_s3 + $0x8] sm:$0xff]  ;;  %v906_v62 = vld [vmem:[%s1872_s3] sm:$0xff] }
  0x19   : > { %1400 = vmatpush3.msra.mxu1 %v299_v17  ;;  %1419 = vmatprep.subr.mxu0 %v1274_v44 }
  0x1a   : > { %1401 = vmatprep.subr.mxu1 %v298_v39  ;;  %1395 = vmatmul.mubr.msk.f32.gmra.mxu1 %vm347_vm1, %v1675_v43  ;;  %v714_v60 = vsel %vm317_vm0, %v712_v58, %v713_v59 }
  0x1b   : > { %1402 = vmatpush3.msra.mxu1 %v298_v39  ;;  %1388 = vmatprep.mubr.msk.f32.mxu0 %vm347_vm1, %v326_v47 }
  0x1c   : > { %1403 = vmatprep.subr.mxu1 %v297_v48  ;;  %1420 = vmatpush3.msra.mxu0 %v1274_v44 }
  0x1d   : > { %1389 = vmatmul.mubr.msk.f32.gmra.mxu0 %vm347_vm1, %v329_v49  ;;  %1404 = vmatpush3.msra.mxu1 %v297_v48 }
  0x1e   : > { %1421 = vmatprep.subr.mxu0 %v1273_v50  ;;  %1405 = vmatprep.mubr.msk.f32.mxu1 %vm347_vm1, %v279_v13 }
  0x1f   : > { %1422 = vmatpush3.msra.mxu0 %v1273_v50  ;;  %1437 = vmatprep.subr.mxu1 %v1287_v51 }
  0x20   : > { %1406 = vmatmul.mubr.msk.f32.vlgmr.msra.gmra.mxu1 %vm347_vm1, %v1636_v18  ;;  %1423 = vmatprep.subr.mxu0 %v1272_v52 }
  0x21   : > { %1438 = vmatpush3.msra.mxu1 %v1287_v51  ;;  %1424 = vmatpush3.msra.mxu0 %v1272_v52 }
  0x22   : > { %1425 = vmatprep.mubr.msk.f32.mxu0 %vm347_vm1, %v1636_v18  ;;  %1408 = vmatprep.mubr.msk.f32.mxu1 %vm347_vm1, %v283_v34 }
  0x23   : > { %1426 = vmatmul.mubr.msk.f32.vlgmr.msra.gmra.mxu0 %vm347_vm1, %v283_v34  ;;  %1439 = vmatprep.subr.mxu1 %v1286_v53 }
  0x24   : > { %1409 = vmatmul.mubr.msk.f32.gmra.mxu1 %vm347_vm1, %v285_v36  ;;  %1428 = vmatprep.mubr.msk.f32.mxu0 %vm347_vm1, %v285_v36 }
  0x25   : > { %1440 = vmatpush3.msra.mxu1 %v1286_v53  ;;  %1411 = vmatprep.mubr.msk.f32.mxu1 %vm347_vm1, %v1621_v6 }
  0x26   : > { %1441 = vmatprep.subr.mxu1 %v1285_v54  ;;  %1457 = vmatprep.subr.mxu0 %v907_v61 }
  0x27   : > { %1429 = vmatmul.mubr.msk.f32.gmra.mxu0 %vm347_vm1, %v1621_v6  ;;  %1442 = vmatpush3.msra.mxu1 %v1285_v54 }
  0x28   : > { %1412 = vmatmul.mubr.msk.f32.gmra.mxu1 %vm347_vm1, %v1625_v8  ;;  %1431 = vmatprep.mubr.msk.f32.mxu0 %vm347_vm1, %v1625_v8 }
  0x29   : > { %1414 = vmatprep.mubr.msk.f32.mxu1 %vm347_vm1, %v1639_v19  ;;  %1443 = vmatprep.subr.mxu1 %v1284_v55 }
  0x2a   : > { %1444 = vmatpush3.msra.mxu1 %v1284_v55  ;;  %1458 = vmatpush3.msra.mxu0 %v907_v61 }
  0x2b   : > { %1432 = vmatmul.mubr.msk.f32.gmra.mxu0 %vm347_vm1, %v1639_v19  ;;  %1459 = vmatprep.subr.mxu0 %v906_v62 }
  0x2c   : > { %1415 = vmatmul.mubr.msk.f32.gmra.mxu1 %vm347_vm1, %v1654_v29  ;;  %1434 = vmatprep.mubr.msk.f32.mxu0 %vm347_vm1, %v1654_v29 }
  0x2d   : > { %1445 = vmatprep.mubr.msk.f32.mxu1 %vm347_vm1, %v323_v37  ;;  %1460 = vmatpush3.msra.mxu0 %v906_v62 }
  0x2f   : > { %1435 = vmatmul.mubr.msk.f32.gmra.mxu0 %vm347_vm1, %v295_v56 }
  0x30   : > { %1446 = vmatmul.mubr.msk.f32.vlgmr.msra.gmra.mxu1 %vm347_vm1, %v326_v47 }
  0x31   : > { %1448 = vmatprep.mubr.msk.f32.mxu1 %vm347_vm1, %v329_v49 }
  0x34   : > { %1449 = vmatmul.mubr.msk.f32.gmra.mxu1 %vm347_vm1, %v1642_v20 }
  0x35   : > { %1451 = vmatprep.mubr.msk.f32.mxu1 %vm347_vm1, %v1650_v25  ;;  %v1296_v25 = vld [vmem:[%s1871_s2] ss:$0 sm:$0xff] }
  0x38   : > { %1452 = vmatmul.mubr.msk.f32.gmra.mxu1 %vm347_vm1, %v1667_v38 }
  0x39   : > { %1454 = vmatprep.mubr.msk.f32.mxu1 %vm347_vm1, %v1675_v43 }
  0x3c   : > { %1455 = vmatmul.mubr.msk.f32.gmra.mxu1 %vm347_vm1, %v714_v60 }
  0xd6   : > { %v1393_v63 = vpop.f32.mrf.mxu1  ;;  %v1387_v0 = vpop.f32.mrf.mxu0 }
  0xd8   : > { %v450_v1 = vpop.f32.mrf.mxu1  ;;  %v430_v2 = vpop.f32.mrf.mxu0 }
  0xda   : > { %v1396_v3 = vpop.f32.mrf.mxu1 }
  0xdc   : > { %v460_v4 = vpop.f32.mrf.mxu1 }
  0xdd   : > { %v1390_v5 = vpop.f32.mrf.mxu0 }
  0xdf   : > { %v440_v6 = vpop.f32.mrf.mxu0 }
  0xe0   : > { %v1407_v7 = vpop.f32.mrf.mxu1 }
  0xe1   : > { %v557_v17 = vadd.f32 %v1407_v7, %v1387_v0 }
  0xe2   : > { %v551_v8 = vpop.f32.mrf.mxu1 }
  0xe3   : > { %v1427_v9 = vpop.f32.mrf.mxu0  ;;  %v552_v19 = vadd.f32 %v551_v8, %v430_v2 }
  0xe4   : > { %v1410_v10 = vpop.f32.mrf.mxu1  ;;  %v704_v22 = vadd.f32 %v1427_v9, %v557_v17 }
  0xe5   : > { %v664_v11 = vpop.f32.mrf.mxu0  ;;  %v567_v23 = vadd.f32 %v1410_v10, %v1390_v5 }
  0xe6   : > { %v561_v12 = vpop.f32.mrf.mxu1  ;;  %v703_v26 = vadd.f32 %v664_v11, %v552_v19 }
  0xe7   : > { %v1430_v13 = vpop.f32.mrf.mxu0  ;;  %v562_v27 = vadd.f32 %v561_v12, %v440_v6 }
  0xe8   : > { %v1413_v14 = vpop.f32.mrf.mxu1  ;;  %v706_v32 = vadd.f32 %v1430_v13, %v567_v23 }
  0xe9   : > { %v674_v15 = vpop.f32.mrf.mxu0  ;;  %v577_v30 = vadd.f32 %v1413_v14, %v1393_v63 }
  0xea   : > { %v571_v16 = vpop.f32.mrf.mxu1  ;;  %v705_v37 = vadd.f32 %v674_v15, %v562_v27 }
  0xeb   : > { %v1433_v20 = vpop.f32.mrf.mxu0  ;;  %v572_v35 = vadd.f32 %v571_v16, %v450_v1 }
  0xec   : > { %v1416_v18 = vpop.f32.mrf.mxu1  ;;  %v708_v42 = vadd.f32 %v1433_v20, %v577_v30 }
  0xed   : > { %v684_v28 = vpop.f32.mrf.mxu0  ;;  %v587_v43 = vadd.f32 %v1416_v18, %v1396_v3 }
  0xee   : > { %v581_v21 = vpop.f32.mrf.mxu1  ;;  %v707_v48 = vadd.f32 %v684_v28, %v572_v35 }
  0xef   : > { %v1436_v38 = vpop.f32.mrf.mxu0  ;;  %v582_v49 = vadd.f32 %v581_v21, %v460_v4 }
  0xf0   : > { %v1447_v24 = vpop.f32.mrf.mxu1  ;;  %v710_v55 = vadd.f32 %v1436_v38, %v587_v43 }
  0xf1   : > { %v828_v29 = vadd.f32 %v1447_v24, %v704_v22  ;;  %v694_v51 = vpop.f32.mrf.mxu0 }
  0xf2   : > { %v788_v31 = vpop.f32.mrf.mxu1  ;;  %v709_v60 = vadd.f32 %v694_v51, %v582_v49 }
  0xf3   : > { %v1759_v33 = vadd.f32 %v1296_v25, %v828_v29  ;;  %v827_v34 = vadd.f32 %v788_v31, %v703_v26 }
  0xf4   : > { %v1450_v36 = vpop.f32.mrf.mxu1 }
  0xf5   : > { %v1298_v39 = vmul.f32 -1.442695, %v1759_v33  ;;  %v1762_v40 = vadd.f32 %v1296_v25, %v827_v34  ;;  %v830_v41 = vadd.f32 %v1450_v36, %v706_v32 }
  0xf6   : > { %v798_v44 = vpop.f32.mrf.mxu1 }
  0xf7   : > { %1490 = vpow2.f32 %v1298_v39  ;;  %v1297_v45 = vmul.f32 -1.442695, %v1762_v40  ;;  %v1765_v46 = vadd.f32 %v1296_v25, %v830_v41  ;;  %v829_v47 = vadd.f32 %v798_v44, %v705_v37 }
  0xf8   : > { %v1453_v50 = vpop.f32.mrf.mxu1 }
  0xf9   : > { %1492 = vpow2.f32 %v1297_v45  ;;  %v1300_v52 = vmul.f32 -1.442695, %v1765_v46  ;;  %v844_v53 = vadd.f32 %v1296_v25, %v829_v47  ;;  %v832_v54 = vadd.f32 %v1453_v50, %v708_v42 }
  0xfa   : > { %v808_v56 = vpop.f32.mrf.mxu1 }
  0xfb   : > { %1494 = vpow2.f32 %v1300_v52  ;;  %v1299_v57 = vmul.f32 -1.442695, %v844_v53  ;;  %v847_v58 = vadd.f32 %v1296_v25, %v832_v54  ;;  %v831_v59 = vadd.f32 %v808_v56, %v707_v48 }
  0xfc   : > { %v1456_v61 = vpop.f32.mrf.mxu1 }
  0xfd   : > { %1496 = vpow2.f32 %v1299_v57  ;;  %v1302_v62 = vmul.f32 -1.442695, %v847_v58  ;;  %v846_v63 = vadd.f32 %v1296_v25, %v831_v59  ;;  %v834_v0 = vadd.f32 %v1456_v61, %v710_v55 }
  0xfe   : > { %v818_v1 = vpop.f32.mrf.mxu1 }
  0xff   : > { %1498 = vpow2.f32 %v1302_v62  ;;  %v1301_v2 = vmul.f32 -1.442695, %v846_v63  ;;  %v849_v3 = vadd.f32 %v1296_v25, %v834_v0  ;;  %v833_v4 = vadd.f32 %v818_v1, %v709_v60 }
 0x101   : > { %1500 = vpow2.f32 %v1301_v2  ;;  %v1304_v5 = vmul.f32 -1.442695, %v849_v3  ;;  %v848_v6 = vadd.f32 %v1296_v25, %v833_v4 }
 0x103   : > { %1502 = vpow2.f32 %v1304_v5  ;;  %v1303_v7 = vmul.f32 -1.442695, %v848_v6 }
 0x104   : > { %v1491_v8 = vpop.eup %1490 }
 0x105   : > { %v875_v9 = vadd.f32 1.0, %v1491_v8  ;;  %1504 = vpow2.f32 %v1303_v7 }
 0x106   : > { %v1493_v10 = vpop.eup %1492 }
 0x107   : > { %v874_v11 = vadd.f32 1.0, %v1493_v10  ;;  %1506 = vrcp.f32 %v875_v9 }
 0x108   : > { %v1495_v12 = vpop.eup %1494 }
 0x109   : > { %1508 = vrcp.f32 %v874_v11  ;;  %v877_v13 = vadd.f32 1.0, %v1495_v12 }
 0x10a   : > { %v1497_v14 = vpop.eup %1496 }
 0x10b   : > { %v876_v15 = vadd.f32 1.0, %v1497_v14  ;;  %1510 = vrcp.f32 %v877_v13 }
 0x10c   : > { %v1499_v16 = vpop.eup %1498 }
 0x10d   : > { %1512 = vrcp.f32 %v876_v15  ;;  %v879_v17 = vadd.f32 1.0, %v1499_v16 }
 0x10e   : > { %v1501_v18 = vpop.eup %1500 }
 0x10f   : > { %v878_v19 = vadd.f32 1.0, %v1501_v18  ;;  %1514 = vrcp.f32 %v879_v17 }
 0x110   : > { %v1503_v20 = vpop.eup %1502 }
 0x111   : > { %1516 = vrcp.f32 %v878_v19  ;;  %v881_v21 = vadd.f32 1.0, %v1503_v20 }
 0x112   : > { %v1505_v22 = vpop.eup %1504 }
 0x113   : > { %v880_v23 = vadd.f32 1.0, %v1505_v22  ;;  %1518 = vrcp.f32 %v881_v21 }
 0x114   : > { %v1507_v24 = vpop.eup %1506 }
 0x115   : > { %1520 = vrcp.f32 %v880_v23  ;;  %v899_v27 = vmul.f32 %v1507_v24, %v1759_v33 }
 0x116   : > { %v1509_v25 = vpop.eup %1508 }
 0x117   : > { %v898_v26 = vmul.f32 %v1509_v25, %v1762_v40  ;;  %v1305_v40 = vld [vmem:[%s1873_s4] ss:$0 sm:$0xff] }
 0x118   : > { %v1511_v28 = vpop.eup %1510 }
 0x119   : > { %1461 = vmatprep.mubr.msk.f32.mxu0 %vm915_vm2, %v898_v26  ;;  %v901_v31 = vmul.f32 %v1511_v28, %v1765_v46 }
 0x11a   : > { %v1513_v29 = vpop.eup %1512  ;;  %1462 = vmatmul.mubr.msk.f32.vlgmr.msra.gmra.mxu0 %vm915_vm2, %v899_v27 }
 0x11b   : > { %v900_v30 = vmul.f32 %v1513_v29, %v844_v53 }
 0x11c   : > { %v1515_v32 = vpop.eup %1514 }
 0x11d   : > { %1464 = vmatprep.mubr.msk.f32.mxu0 %vm915_vm2, %v900_v30  ;;  %v903_v36 = vmul.f32 %v1515_v32, %v847_v58 }
 0x11e   : > { %v1517_v34 = vpop.eup %1516  ;;  %1465 = vmatmul.mubr.msk.f32.gmra.mxu0 %vm915_vm2, %v901_v31 }
 0x11f   : > { %v902_v35 = vmul.f32 %v1517_v34, %v846_v63 }
 0x120   : > { %v1519_v37 = vpop.eup %1518 }
 0x121   : > { %1467 = vmatprep.mubr.msk.f32.mxu0 %vm915_vm2, %v902_v35  ;;  %v905_v39 = vmul.f32 %v1519_v37, %v849_v3 }
 0x122   : > { %v1521_v33 = vpop.eup %1520  ;;  %1468 = vmatmul.mubr.msk.f32.gmra.mxu0 %vm915_vm2, %v903_v36 }
 0x123   : > { %v904_v38 = vmul.f32 %v1521_v33, %v848_v6 }
 0x125   : > { %1470 = vmatprep.mubr.msk.f32.mxu0 %vm915_vm2, %v904_v38 }
 0x126   : > { %1471 = vmatmul.mubr.msk.f32.gmra.mxu0 %vm915_vm2, %v905_v39 }
 0x1da   : > { %v1463_v41 = vpop.f32.mrf.mxu0 }
 0x1db   : > { %v1012_v42 = vadd.f32 %v1463_v41, %v1305_v40 }
 0x1dc   : > { %v1006_v43 = vpop.f32.mrf.mxu0 }
 0x1dd   : > { %v1007_v44 = vadd.f32 %v1305_v40, %v1006_v43  ;;  %v1049_v45 = vsel %vm1045_vm3, %v1012_v42, 0.0 }
 0x1de   : > { %1050 = vadd.xlane.f32.xlu0 %v1049_v45  ;;  %v1466_v46 = vpop.f32.mrf.mxu0 }
 0x1df   : > { %v1022_v47 = vadd.f32 %v1466_v46, %v1305_v40  ;;  %v1046_v50 = vsel %vm1045_vm3, %v1007_v44, 0.0 }
 0x1e0   : > { %v1016_v48 = vpop.f32.mrf.mxu0 }
 0x1e1   : > { %v1017_v49 = vadd.f32 %v1305_v40, %v1016_v48  ;;  %v1055_v51 = vsel %vm1045_vm3, %v1022_v47, 0.0 }
 0x1e2   : > { %1047 = vadd.xlane.f32.xlu0 %v1046_v50  ;;  %1056 = vadd.xlane.f32.xlu1 %v1055_v51  ;;  %v1469_v52 = vpop.f32.mrf.mxu0 }
 0x1e3   : > { %v1032_v54 = vadd.f32 %v1469_v52, %v1305_v40  ;;  %v1052_v56 = vsel %vm1045_vm3, %v1017_v49, 0.0 }
 0x1e4   : > { %v1026_v53 = vpop.f32.mrf.mxu0 }
 0x1e5   : > { %v1027_v55 = vadd.f32 %v1305_v40, %v1026_v53  ;;  %v1061_v62 = vsel %vm1045_vm3, %v1032_v54, 0.0 }
 0x1e6   : > { %v1472_v57 = vpop.f32.mrf.mxu0  ;;  %1053 = vadd.xlane.f32.xlu1 %v1052_v56 }
 0x1e7   : > { %v1058_v58 = vsel %vm1045_vm3, %v1027_v55, 0.0  ;;  %v1042_v60 = vadd.f32 %v1472_v57, %v1305_v40 }
 0x1e8   : > { %v1036_v59 = vpop.f32.mrf.mxu0  ;;  %1059 = vadd.xlane.f32.xlu0 %v1058_v58 }
 0x1e9   : > { %v1037_v61 = vadd.f32 %v1305_v40, %v1036_v59  ;;  %v1067_v0 = vsel %vm1045_vm3, %v1042_v60, 0.0 }
 0x1ea   : > { %1062 = vadd.xlane.f32.xlu1 %v1061_v62 }
 0x1eb   : > { %v1064_v63 = vsel %vm1045_vm3, %v1037_v61, 0.0 }
 0x1ec   : > { %1065 = vadd.xlane.f32.xlu0 %v1064_v63 }
 0x1ee   : > { %1068 = vadd.xlane.f32.xlu1 %v1067_v0  ;;  %v1314_v0 = vld [vmem:[%s1874_s5] ss:$0 sm:$0xff] }
 0x267   : > { %v1051_v1 = vpop.xlane.xlu0 %1050 }
 0x268   : > { %v1072_v2 = vmul.f32 0.125, %v1051_v1 }
 0x26a   : > { %v1790_v3 = vsub.f32 %v1012_v42, %v1072_v2 }
 0x26b   : > { %v1048_v4 = vpop.xlane.xlu0 %1047  ;;  %v1057_v5 = vpop.xlane.xlu1 %1056 }
 0x26c   : > { %v1071_v6 = vmul.f32 0.125, %v1048_v4  ;;  %v1074_v7 = vmul.f32 0.125, %v1057_v5  ;;  %v1088_v8 = vmul.f32 %v1790_v3, %v1790_v3  ;;  %v1315_v5 = vld [vmem:[%s1875_s6] ss:$0 sm:$0xff] }
 0x26e   : > { %v1794_v9 = vsub.f32 %v1007_v44, %v1071_v6  ;;  %v1796_v10 = vsub.f32 %v1022_v47, %v1074_v7  ;;  %v1098_v11 = vsel %vm1045_vm3, %v1088_v8, 0.0 }
 0x26f   : > { %1099 = vadd.xlane.f32.xlu1 %v1098_v11  ;;  %v1054_v12 = vpop.xlane.xlu1 %1053 }
 0x270   : > { %v1073_v13 = vmul.f32 0.125, %v1054_v12  ;;  %v1087_v14 = vmul.f32 %v1794_v9, %v1794_v9  ;;  %v1090_v15 = vmul.f32 %v1796_v10, %v1796_v10 }
 0x271   : > { %v1060_v16 = vpop.xlane.xlu0 %1059 }
 0x272   : > { %v1803_v17 = vsub.f32 %v1017_v49, %v1073_v13  ;;  %v1075_v18 = vmul.f32 0.125, %v1060_v16  ;;  %v1095_v19 = vsel %vm1045_vm3, %v1087_v14, 0.0  ;;  %v1104_v20 = vsel %vm1045_vm3, %v1090_v15, 0.0 }
 0x273   : > { %1096 = vadd.xlane.f32.xlu0 %v1095_v19  ;;  %1105 = vadd.xlane.f32.xlu1 %v1104_v20  ;;  %v1063_v21 = vpop.xlane.xlu1 %1062 }
 0x274   : > { %v1807_v22 = vsub.f32 %v1027_v55, %v1075_v18  ;;  %v1076_v23 = vmul.f32 0.125, %v1063_v21  ;;  %v1089_v24 = vmul.f32 %v1803_v17, %v1803_v17 }
 0x275   : > { %v1066_v25 = vpop.xlane.xlu0 %1065 }
 0x276   : > { %v1811_v26 = vsub.f32 %v1032_v54, %v1076_v23  ;;  %v1077_v27 = vmul.f32 0.125, %v1066_v25  ;;  %v1101_v28 = vsel %vm1045_vm3, %v1089_v24, 0.0  ;;  %v1091_v29 = vmul.f32 %v1807_v22, %v1807_v22 }
 0x277   : > { %1102 = vadd.xlane.f32.xlu0 %v1101_v28  ;;  %v1069_v30 = vpop.xlane.xlu1 %1068 }
 0x278   : > { %v1816_v31 = vsub.f32 %v1037_v61, %v1077_v27  ;;  %v1078_v32 = vmul.f32 0.125, %v1069_v30  ;;  %v1092_v34 = vmul.f32 %v1811_v26, %v1811_v26  ;;  %v1107_v36 = vsel %vm1045_vm3, %v1091_v29, 0.0 }
 0x27a   : > { %v1820_v35 = vsub.f32 %v1042_v60, %v1078_v32  ;;  %v1110_v37 = vsel %vm1045_vm3, %v1092_v34, 0.0  ;;  %v1093_v33 = vmul.f32 %v1816_v31, %v1816_v31 }
 0x27b   : > { %1108 = vadd.xlane.f32.xlu0 %v1107_v36  ;;  %1111 = vadd.xlane.f32.xlu1 %v1110_v37 }
 0x27c   : > { %v1094_v38 = vmul.f32 %v1820_v35, %v1820_v35  ;;  %v1113_v39 = vsel %vm1045_vm3, %v1093_v33, 0.0 }
 0x27e   : > { %v1116_v40 = vsel %vm1045_vm3, %v1094_v38, 0.0 }
 0x27f   : > { %1114 = vadd.xlane.f32.xlu0 %v1113_v39  ;;  %1117 = vadd.xlane.f32.xlu1 %v1116_v40 }
 0x2f8   : > { %v1100_v41 = vpop.xlane.xlu1 %1099 }
 0x2f9   : > { %v1120_v42 = vmul.f32 0.125, %v1100_v41 }
 0x2fb   : > { %v1128_v43 = vadd.f32 1e-06, %v1120_v42 }
 0x2fc   : > { %v1097_v44 = vpop.xlane.xlu0 %1096  ;;  %v1106_v45 = vpop.xlane.xlu1 %1105 }
 0x2fd   : > { %1522 = vrsqrt.f32 %v1128_v43  ;;  %v1119_v46 = vmul.f32 0.125, %v1097_v44  ;;  %v1122_v47 = vmul.f32 0.125, %v1106_v45 }
 0x2ff   : > { %v1127_v48 = vadd.f32 1e-06, %v1119_v46  ;;  %v1130_v49 = vadd.f32 1e-06, %v1122_v47 }
 0x300   : > { %v1103_v50 = vpop.xlane.xlu0 %1102 }
 0x301   : > { %1524 = vrsqrt.f32 %v1127_v48  ;;  %v1121_v51 = vmul.f32 0.125, %v1103_v50 }
 0x302   : > { %1526 = vrsqrt.f32 %v1130_v49 }
 0x303   : > { %v1129_v52 = vadd.f32 1e-06, %v1121_v51 }
 0x304   : > { %v1109_v53 = vpop.xlane.xlu0 %1108  ;;  %v1112_v54 = vpop.xlane.xlu1 %1111 }
 0x305   : > { %1528 = vrsqrt.f32 %v1129_v52  ;;  %v1123_v55 = vmul.f32 0.125, %v1109_v53  ;;  %v1124_v56 = vmul.f32 0.125, %v1112_v54 }
 0x307   : > { %v1131_v57 = vadd.f32 1e-06, %v1123_v55  ;;  %v1132_v58 = vadd.f32 1e-06, %v1124_v56 }
 0x308   : > { %v1115_v59 = vpop.xlane.xlu0 %1114  ;;  %v1118_v60 = vpop.xlane.xlu1 %1117 }
 0x309   : > { %1530 = vrsqrt.f32 %v1131_v57  ;;  %v1125_v61 = vmul.f32 0.125, %v1115_v59  ;;  %v1126_v62 = vmul.f32 0.125, %v1118_v60 }
 0x30a   : > { %v1523_v63 = vpop.eup %1522  ;;  %1532 = vrsqrt.f32 %v1132_v58 }
 0x30b   : > { %v1144_v1 = vmul.f32 %v1523_v63, %v1790_v3  ;;  %v1133_v2 = vadd.f32 1e-06, %v1125_v61  ;;  %v1134_v4 = vadd.f32 1e-06, %v1126_v62 }
 0x30d   : > { %v1159_v6 = vmul.f32 %v1314_v0, %v1144_v1  ;;  %1534 = vrsqrt.f32 %v1133_v2 }
 0x30e   : > { %v1525_v7 = vpop.eup %1524  ;;  %1536 = vrsqrt.f32 %v1134_v4 }
 0x30f   : > { %v1527_v8 = vpop.eup %1526  ;;  %v1174_v3 = vadd.f32 %v1315_v5, %v1159_v6  ;;  %v1143_v11 = vmul.f32 %v1525_v7, %v1794_v9 }
 0x310   : > { %v1146_v12 = vmul.f32 %v1527_v8, %v1796_v10 }
 0x311   : > { %1182 = vst.msk [vmem:[%s1841_s12 + $0x8] sm:$0xff] %vm1045_vm3, %v1174_v3  ;;  %v1158_v13 = vmul.f32 %v1314_v0, %v1143_v11 }
 0x312   : > { %v1529_v14 = vpop.eup %1528  ;;  %v1161_v15 = vmul.f32 %v1314_v0, %v1146_v12 }
 0x313   : > { %v1173_v16 = vadd.f32 %v1315_v5, %v1158_v13  ;;  %v1145_v18 = vmul.f32 %v1529_v14, %v1803_v17 }
 0x314   : > { %v1176_v19 = vadd.f32 %v1315_v5, %v1161_v15 }
 0x315   : > { %1181 = vst.msk [vmem:[%s1841_s12] sm:$0xff] %vm1045_vm3, %v1173_v16  ;;  %v1160_v20 = vmul.f32 %v1314_v0, %v1145_v18 }
 0x316   : > { %v1531_v21 = vpop.eup %1530  ;;  %1184 = vst.msk [vmem:[%s1841_s12 + $0x18] sm:$0xff] %vm1045_vm3, %v1176_v19 }
 0x317   : > { %v1533_v9 = vpop.eup %1532  ;;  %v1175_v10 = vadd.f32 %v1315_v5, %v1160_v20  ;;  %v1147_v23 = vmul.f32 %v1531_v21, %v1807_v22 }
 0x318   : > { %v1148_v24 = vmul.f32 %v1533_v9, %v1811_v26 }
 0x319   : > { %1183 = vst.msk [vmem:[%s1841_s12 + $0x10] sm:$0xff] %vm1045_vm3, %v1175_v10  ;;  %v1162_v17 = vmul.f32 %v1314_v0, %v1147_v23 }
 0x31a   : > { %v1535_v25 = vpop.eup %1534  ;;  %v1163_v27 = vmul.f32 %v1314_v0, %v1148_v24 }
 0x31b   : > { %v1537_v28 = vpop.eup %1536  ;;  %v1177_v29 = vadd.f32 %v1315_v5, %v1162_v17  ;;  %v1149_v30 = vmul.f32 %v1535_v25, %v1816_v31 }
 0x31c   : > { %v1178_v32 = vadd.f32 %v1315_v5, %v1163_v27  ;;  %v1150_v34 = vmul.f32 %v1537_v28, %v1820_v35 }
 0x31d   : > { %1185 = vst.msk [vmem:[%s1841_s12 + $0x20] sm:$0xff] %vm1045_vm3, %v1177_v29  ;;  %v1164_v36 = vmul.f32 %v1314_v0, %v1149_v30 }
 0x31e   : > { %1186 = vst.msk [vmem:[%s1841_s12 + $0x28] sm:$0xff] %vm1045_vm3, %v1178_v32  ;;  %v1165_v22 = vmul.f32 %v1314_v0, %v1150_v34 }
 0x31f   : > { %v1179_v26 = vadd.f32 %v1315_v5, %v1164_v36 }
 0x320   : > { %v1180_v37 = vadd.f32 %v1315_v5, %v1165_v22 }
 0x321   : > { %1187 = vst.msk [vmem:[%s1841_s12 + $0x30] sm:$0xff] %vm1045_vm3, %v1179_v26 }
 0x322   : > { %1188 = vst.msk [vmem:[%s1841_s12 + $0x38] sm:$0xff] %vm1045_vm3, %v1180_v37 }
 0x323 PF: > { %s17_s24 = sadd.s32 1, %s1544_s24  }
 0x324   : > { %p14_p4 = scmp.ge.s32.totalorder %s17_s24, 4  }
 0x326   :  { %16 = sbr.rel (!%p14_p4) target bundleno = 1 (0x1), region = 81 }

</bundles_post_ra>
